<compile_context>
chip_gen: v7x
topology: tpu7x:2x2x1
jax: 0.10.0
libtpu: 0.0.40
codegen_flags: <defaults>
</compile_context>

<pallas_src>
import jax
import jax.numpy as jnp
from jax.experimental import pallas as pl
from jax.experimental.pallas import tpu as pltpu

IN_FEATURES = 64 * 7 * 7   # 3136
HIDDEN = 512
OUT_DIM = 10
LANE = 128


def _round_up(a: int, b: int) -> int:
    return ((a + b - 1) // b) * b


def _tpu_vmem_bytes() -> int:
    """Physical VMEM per core; conservative (v7x-sized) fallback if the query fails."""
    try:
        info = pltpu.get_tpu_info()
        return int(getattr(info, "vmem_capacity_bytes", 64 << 20))
    except Exception:
        return 64 << 20


def _pick_tile_m(n: int, vmem_bytes: int) -> int:
    n8 = _round_up(max(n, 1), 8)
    big_vmem = vmem_bytes >= (96 << 20)          # v5e/v6e: 128 MiB; v7x: 64 MiB
    max_tile = 1024 if big_vmem else 256
    if n8 <= max_tile:
        if n8 >= 128:
            # At least two tiles: v7x's two TensorCores split the batch, and the
            # x-tile DMA pipelines against compute on all generations.
            return _round_up(pl.cdiv(n8, 2), 8)
        return n8
    n_tiles = pl.cdiv(n8, max_tile)
    if (not big_vmem) and (n_tiles % 2):
        n_tiles += 1                              # even tile count -> balanced 2-TC split
    return _round_up(pl.cdiv(n8, n_tiles), 8)


def _vmem_limit(tile_m: int, out_p: int, vmem_bytes: int) -> int:
    work = (2 * tile_m * IN_FEATURES * 4          # f32 x tile, double-buffered
            + tile_m * IN_FEATURES * 2            # in-kernel bf16 copy of x
            + 2 * IN_FEATURES * HIDDEN * 2        # W1 (constant block index; 2 buffers allocated, DMA'd once)
            + 2 * HIDDEN * out_p * 2              # W2
            + tile_m * HIDDEN * 4                 # fc1 activation
            + 2 * tile_m * out_p * 4)             # output tile, double-buffered
    return min(work + (8 << 20), vmem_bytes - (8 << 20))


def dense_layer_kernel(x_ref, w1_ref, b1_ref, w2_ref, b2_ref, o_ref):
    # x arrives f32 (single HBM read); cast to bf16 in VMEM for the MXU.
    x_bf = x_ref[...].astype(jnp.bfloat16)
    # fc1 (bf16 x bf16 -> f32 accumulation) + bias + ReLU
    h = jnp.dot(x_bf, w1_ref[...], preferred_element_type=jnp.float32)
    h = jnp.maximum(h + b1_ref[...], 0.0)
    # fc2 (bf16 multiplicands, f32 accumulation)
    out = jnp.dot(h.astype(jnp.bfloat16), w2_ref[...],
                  preferred_element_type=jnp.float32)
    o_ref[...] = (out + b2_ref[...]).astype(o_ref.dtype)


def prepare_params(w1, b1, w2, b2):
    """One-time parameter prep: bf16 weights, lane-dense (128-col) padded fc2, 2-D biases.

    w1: (IN_FEATURES, HIDDEN), w2: (HIDDEN, out_dim)  -- i.e. torch weights transposed.
    """
    out_dim = w2.shape[1]
    out_p = _round_up(out_dim, LANE)
    w1_b = w1.astype(jnp.bfloat16)                                              # (3136, 512)
    w2_b = jnp.pad(w2.astype(jnp.bfloat16), ((0, 0), (0, out_p - out_dim)))     # (512, out_p)
    b1_2d = b1.reshape(1, HIDDEN).astype(jnp.float32)
    b2_2d = jnp.pad(b2.astype(jnp.float32), (0, out_p - out_dim)).reshape(1, out_p)
    return {"w1": w1_b, "b1": b1_2d, "w2": w2_b, "b2": b2_2d, "out_dim": out_dim}


def dense_layer(x_nchw, params):
    """x_nchw: (N, 64, 7, 7) float32. Returns (N, out_dim) float32."""
    w1_b, b1_2d, w2_b, b2_2d = params["w1"], params["b1"], params["w2"], params["b2"]
    out_dim = params["out_dim"]
    out_p = w2_b.shape[1]

    n = x_nchw.shape[0]
    x = x_nchw.reshape(n, IN_FEATURES)            # stays f32; cast happens in-kernel

    vmem_bytes = _tpu_vmem_bytes()
    tile_m = _pick_tile_m(n, vmem_bytes)
    n_pad = _round_up(max(n, 1), tile_m)
    if n_pad != n:
        x = jnp.pad(x, ((0, n_pad - n), (0, 0)))
    grid_m = n_pad // tile_m

    cost = pl.CostEstimate(
        flops=2 * n_pad * IN_FEATURES * HIDDEN + 2 * n_pad * HIDDEN * out_p,
        transcendentals=0,
        bytes_accessed=(n_pad * IN_FEATURES * 4 + w1_b.size * 2 + w2_b.size * 2
                        + b1_2d.size * 4 + b2_2d.size * 4 + n_pad * out_p * 4),
    )

    out_padded = pl.pallas_call(
        dense_layer_kernel,
        out_shape=jax.ShapeDtypeStruct((n_pad, out_p), jnp.float32),
        grid_spec=pltpu.PrefetchScalarGridSpec(
            num_scalar_prefetch=0,
            grid=(grid_m,),
            in_specs=[
                pl.BlockSpec((tile_m, IN_FEATURES), lambda i: (i, 0)),
                # Constant block index -> weights/biases are DMA'd once and stay
                # VMEM-resident across batch-tile steps.
                pl.BlockSpec((IN_FEATURES, HIDDEN), lambda i: (0, 0)),
                pl.BlockSpec((1, HIDDEN), lambda i: (0, 0)),
                pl.BlockSpec((HIDDEN, out_p), lambda i: (0, 0)),
                pl.BlockSpec((1, out_p), lambda i: (0, 0)),
            ],
            out_specs=pl.BlockSpec((tile_m, out_p), lambda i: (i, 0)),
        ),
        compiler_params=pltpu.CompilerParams(
            dimension_semantics=("parallel",),    # batch tiles split across TCs on v7x
            vmem_limit_bytes=_vmem_limit(tile_m, out_p, vmem_bytes),
        ),
        cost_estimate=cost,
    )(x, w1_b, b1_2d, w2_b, b2_2d)

    # Padded rows computed ReLU(b1) @ W2 + b2; always slice before any reduction.
    return out_padded[:n, :out_dim]


def init_params(key, out_dim=OUT_DIM):
    """Deterministic init mimicking PyTorch nn.Linear default (uniform +/- 1/sqrt(fan_in))."""
    k1, k2, k3, k4 = jax.random.split(key, 4)
    bound1 = 1.0 / jnp.sqrt(jnp.float32(IN_FEATURES))
    bound2 = 1.0 / jnp.sqrt(jnp.float32(HIDDEN))
    # Stored as (in_features, out_features), i.e. transpose of torch's weight layout.
    w1 = jax.random.uniform(k1, (IN_FEATURES, HIDDEN), jnp.float32, -bound1, bound1)
    b1 = jax.random.uniform(k2, (HIDDEN,), jnp.float32, -bound1, bound1)
    w2 = jax.random.uniform(k3, (HIDDEN, out_dim), jnp.float32, -bound2, bound2)
    b2 = jax.random.uniform(k4, (out_dim,), jnp.float32, -bound2, bound2)
    return w1, b1, w2, b2


def reference(x_nchw, w1, b1, w2, b2):
    """Pure-JAX reference with the same bf16-multiplicand / f32-accumulation precision."""
    x = x_nchw.reshape(x_nchw.shape[0], IN_FEATURES).astype(jnp.bfloat16)
    h = jnp.dot(x, w1.astype(jnp.bfloat16), preferred_element_type=jnp.float32) + b1
    h = jnp.maximum(h, 0.0)
    out = jnp.dot(h.astype(jnp.bfloat16), w2.astype(jnp.bfloat16),
                  preferred_element_type=jnp.float32) + b2
    return out


if __name__ == "__main__":
    key = jax.random.PRNGKey(0)
    kx, kp = jax.random.split(key)
    # Input consistent with the forward's implied shape: (batch, 64, 7, 7)
    x = jax.random.normal(kx, (2, 64, 7, 7), jnp.float32)
    w1, b1, w2, b2 = init_params(kp)

    params = prepare_params(w1, b1, w2, b2)        # one-time weight cast/pad
    out = dense_layer(x, params)
    out = jax.block_until_ready(out)

    ref = reference(x, w1, b1, w2, b2)
    assert out.shape == (2, OUT_DIM)
    assert jnp.allclose(out, ref, atol=1e-2, rtol=1e-2), "mismatch vs reference"
    print("KERNEL_OK")
</pallas_src>

<mosaic_0001>
module attributes {stable_mosaic.version = 11 : i64} {
  func.func @dense_layer_kernel(%arg0: i32, %arg1: memref<8x3136xf32, #tpu.memory_space<vmem>>, %arg2: memref<3136x512xbf16, #tpu.memory_space<vmem>>, %arg3: memref<1x512xf32, #tpu.memory_space<vmem>>, %arg4: memref<512x128xbf16, #tpu.memory_space<vmem>>, %arg5: memref<1x128xf32, #tpu.memory_space<vmem>>, %arg6: memref<8x128xf32, #tpu.memory_space<vmem>>) attributes {dimension_semantics = [#tpu.dimension_semantics<parallel>], iteration_bounds = array<i64: 1>, scalar_prefetch = 0 : i64, scratch_operands = 0 : i64, tpu.core_type = #tpu.core_type<tc>, window_params = [{transform_indices = @transform_0, window_bounds = array<i64: 8, 3136>}, {pipeline_mode = #tpu.pipeline_mode<synchronous>, transform_indices = @transform_1, window_bounds = array<i64: 3136, 512>}, {pipeline_mode = #tpu.pipeline_mode<synchronous>, transform_indices = @transform_2, window_bounds = array<i64: 1, 512>}, {pipeline_mode = #tpu.pipeline_mode<synchronous>, transform_indices = @transform_3, window_bounds = array<i64: 512, 128>}, {pipeline_mode = #tpu.pipeline_mode<synchronous>, transform_indices = @transform_4, window_bounds = array<i64: 1, 128>}, {transform_indices = @transform_5, window_bounds = array<i64: 8, 128>}]} {
    %c0 = arith.constant 0 : index
    %c0_0 = arith.constant 0 : index
    %0 = vector.load %arg1[%c0, %c0_0] : memref<8x3136xf32, #tpu.memory_space<vmem>>, vector<8x3136xf32>
    %1 = arith.truncf %0 : vector<8x3136xf32> to vector<8x3136xbf16>
    %c0_1 = arith.constant 0 : index
    %c0_2 = arith.constant 0 : index
    %2 = vector.load %arg2[%c0_1, %c0_2] : memref<3136x512xbf16, #tpu.memory_space<vmem>>, vector<3136x512xbf16>
    %cst = arith.constant dense<0.000000e+00> : vector<8x512xf32>
    %3 = tpu.matmul %1, %2, %cst {dimension_numbers = #tpu.dot_dimension_numbers<[1], [0], [0], [1], [0, 0, 1, 1], [], []>} : vector<8x3136xbf16>, vector<3136x512xbf16>, vector<8x512xf32> -> vector<8x512xf32>
    %c0_3 = arith.constant 0 : index
    %c0_4 = arith.constant 0 : index
    %4 = vector.load %arg3[%c0_3, %c0_4] : memref<1x512xf32, #tpu.memory_space<vmem>>, vector<1x512xf32>
    %5 = vector.broadcast %4 : vector<1x512xf32> to vector<8x512xf32>
    %6 = arith.addf %3, %5 : vector<8x512xf32>
    %cst_5 = arith.constant 0.000000e+00 : f32
    %7 = vector.broadcast %cst_5 : f32 to vector<8x512xf32>
    %8 = arith.maximumf %6, %7 : vector<8x512xf32>
    %9 = arith.truncf %8 : vector<8x512xf32> to vector<8x512xbf16>
    %c0_6 = arith.constant 0 : index
    %c0_7 = arith.constant 0 : index
    %10 = vector.load %arg4[%c0_6, %c0_7] : memref<512x128xbf16, #tpu.memory_space<vmem>>, vector<512x128xbf16>
    %cst_8 = arith.constant dense<0.000000e+00> : vector<8x128xf32>
    %11 = tpu.matmul %9, %10, %cst_8 {dimension_numbers = #tpu.dot_dimension_numbers<[1], [0], [0], [1], [0, 0, 1, 1], [], []>} : vector<8x512xbf16>, vector<512x128xbf16>, vector<8x128xf32> -> vector<8x128xf32>
    %c0_9 = arith.constant 0 : index
    %c0_10 = arith.constant 0 : index
    %12 = vector.load %arg5[%c0_9, %c0_10] : memref<1x128xf32, #tpu.memory_space<vmem>>, vector<1x128xf32>
    %13 = vector.broadcast %12 : vector<1x128xf32> to vector<8x128xf32>
    %14 = arith.addf %11, %13 : vector<8x128xf32>
    %c0_11 = arith.constant 0 : index
    %c0_12 = arith.constant 0 : index
    %15 = vector.load %arg6[%c0_11, %c0_12] : memref<8x128xf32, #tpu.memory_space<vmem>>, vector<8x128xf32>
    tpu.vector_store %arg6[%c0_11, %c0_12], %14 {strides = array<i32>} : memref<8x128xf32, #tpu.memory_space<vmem>>, vector<8x128xf32>,
    return
  }
  func.func @transform_0(%arg0: i32) -> (i32, i32) {
    %c0_i32 = arith.constant 0 : i32
    %c0_i32_0 = arith.constant 0 : i32
    return %arg0, %c0_i32 : i32, i32
  }
  func.func @transform_1(%arg0: i32) -> (i32, i32) {
    %c0_i32 = arith.constant 0 : i32
    %c0_i32_0 = arith.constant 0 : i32
    %c0_i32_1 = arith.constant 0 : i32
    return %c0_i32, %c0_i32_0 : i32, i32
  }
  func.func @transform_2(%arg0: i32) -> (i32, i32) {
    %c0_i32 = arith.constant 0 : i32
    %c0_i32_0 = arith.constant 0 : i32
    %c0_i32_1 = arith.constant 0 : i32
    return %c0_i32, %c0_i32_0 : i32, i32
  }
  func.func @transform_3(%arg0: i32) -> (i32, i32) {
    %c0_i32 = arith.constant 0 : i32
    %c0_i32_0 = arith.constant 0 : i32
    %c0_i32_1 = arith.constant 0 : i32
    return %c0_i32, %c0_i32_0 : i32, i32
  }
  func.func @transform_4(%arg0: i32) -> (i32, i32) {
    %c0_i32 = arith.constant 0 : i32
    %c0_i32_0 = arith.constant 0 : i32
    %c0_i32_1 = arith.constant 0 : i32
    return %c0_i32, %c0_i32_0 : i32, i32
  }
  func.func @transform_5(%arg0: i32) -> (i32, i32) {
    %c0_i32 = arith.constant 0 : i32
    %c0_i32_0 = arith.constant 0 : i32
    return %arg0, %c0_i32 : i32, i32
  }
}

</mosaic_0001>

<bundles_post_ra>
// kernel: tpu_custom_call.1
= control target key start
LH: loop header
LB: loop body
LE: loop exit
PB: predicated region body
PF: predicated region fallthrough
CT: control target
= control target key end

     0   :  { %10 = vsyncpa [#allocation3], 0  ;;  %s8734_s0 = inlined_call_operand.hbm [shape: f32[8,3136], index: 0, kind: input, shape index: {}]   ;;  %s8735_s1 = inlined_call_operand.hbm [shape: bf16[3136,512], index: 1, kind: input, shape index: {}]   ;;  %s8736_s2 = inlined_call_operand.hbm [shape: f32[1,512], index: 2, kind: input, shape index: {}]   ;;  %s8737_s3 = inlined_call_operand.hbm [shape: bf16[512,128], index: 3, kind: input, shape index: {}]   ;;  %s8738_s4 = inlined_call_operand.hbm [shape: f32[1,128], index: 4, kind: input, shape index: {}]   ;;  %s8739_s5 = inlined_call_operand.hbm [shape: f32[8,128], index: 5, kind: output, shape index: {}]  }
   0x1   :  { %11 = vsyncpa [#allocation6], 0 }
   0x2   :  { %12 = vsyncpa [#allocation9], 0 }
   0x3   :  { %13 = vsyncpa [#allocation4], 0  ;;  %s8621_s18 = smov [#allocation5]   ;;  %s8481_s22 = scalar_lea.hbm %s8735_s1, 100352 }
   0x4   :  { %s29_s19 = sshll.u32 %s8621_s18, 4  ;;  %p8482_p0 = scmp.ne.s32.totalorder %s8735_s1, %s8481_s22  ;;  %s30_s19 = int_to_ptr.vmem [resolvable:$true] %s29_s19 }
   0x5   :  { %p8485_p1 = scmp.lt.u32.totalorder %s8481_s22, %s8735_s1 }
   0x7   :  { %p8487_p2 = pnand %p8485_p1, %p8482_p0 }
   0x9   :  { %8490 = shalt.err (!%p8487_p2)
}
   0xa   :  { %s8491_s27 = scalar_lea.vmem %s30_s19, 100352  ;;  %p8496_p4 = scmp.lt.s32.totalorder %s30_s19, %s30_s19 }
   0xb   :  { %p8492_p3 = scmp.ne.s32.totalorder %s30_s19, %s8491_s27  ;;  %p8497_p5 = scmp.lt.s32.totalorder %s8491_s27, %s8491_s27 }
   0xd   :  { %p8498_p6 = por %p8497_p5, %p8496_p4 }
   0xf   :  { %p8499_p7 = pnand %p8498_p6, %p8492_p3 }
  0x11   :  { %8502 = shalt.err (!%p8499_p7)
}
  0x12   :  { %s8622_s28 = smov 256   ;;  %s8623_s29 = smov 16  }
  0x13   :  { %35 = dma.hbm_to_vmem [thread:$0]  %s8735_s1, 100352, %s30_s19, [#allocation6], %s8622_s28, %s8622_s28, %s8623_s29  }
  0x14   :  { %s8624_s7 = smov [#allocation8]   ;;  %s8503_s11 = scalar_lea.hbm %s8737_s3, 4096 }
  0x15   :  { %s51_s8 = sshll.u32 %s8624_s7, 4  ;;  %p8504_p8 = scmp.ne.s32.totalorder %s8737_s3, %s8503_s11  ;;  %s52_s8 = int_to_ptr.vmem [resolvable:$true] %s51_s8 }
  0x16   :  { %p8507_p9 = scmp.lt.u32.totalorder %s8503_s11, %s8737_s3 }
  0x18   :  { %p8509_p10 = pnand %p8507_p9, %p8504_p8 }
  0x1a   :  { %8512 = shalt.err (!%p8509_p10)
}
  0x1b   :  { %s8513_s16 = scalar_lea.vmem %s52_s8, 4096  ;;  %p8518_p12 = scmp.lt.s32.totalorder %s52_s8, %s52_s8 }
  0x1c   :  { %p8514_p11 = scmp.ne.s32.totalorder %s52_s8, %s8513_s16  ;;  %p8519_p13 = scmp.lt.s32.totalorder %s8513_s16, %s8513_s16 }
  0x1e   :  { %p8520_p0 = por %p8519_p13, %p8518_p12 }
  0x20   :  { %p8521_p1 = pnand %p8520_p0, %p8514_p11 }
  0x22   :  { %8524 = shalt.err (!%p8521_p1)
}
  0x23   :  { %s8625_s1 = smov 64   ;;  %s8626_s17 = smov 4  }
  0x24   :  { %57 = dma.hbm_to_vmem [thread:$0]  %s8737_s3, 4096, %s52_s8, [#allocation9], %s8625_s1, %s8625_s1, %s8626_s17  }
  0x25   :  { %s8627_s20 = smov [#allocation2]   ;;  %s8628_s22 = smov [#allocation7]  }
  0x26   :  { %s20_s21 = sshll.u32 %s8627_s20, 4  ;;  %s42_s23 = sshll.u32 %s8628_s22, 4  ;;  %s21_s21 = int_to_ptr.vmem [resolvable:$true] %s20_s21  ;;  %s43_s23 = int_to_ptr.vmem [resolvable:$true] %s42_s23 }
  0x27   :  { %s8525_s26 = scalar_lea.hbm %s8734_s0, 3200 }
  0x28   :  { %p8526_p2 = scmp.ne.s32.totalorder %s8734_s0, %s8525_s26  ;;  %p8529_p3 = scmp.lt.u32.totalorder %s8525_s26, %s8734_s0 }
  0x2a   :  { %p8531_p4 = pnand %p8529_p3, %p8526_p2 }
  0x2c   :  { %8534 = shalt.err (!%p8531_p4)
}
  0x2d   :  { %s8535_s3 = scalar_lea.vmem %s21_s21, 3200  ;;  %p8540_p6 = scmp.lt.s32.totalorder %s21_s21, %s21_s21 }
  0x2e   :  { %p8536_p5 = scmp.ne.s32.totalorder %s21_s21, %s8535_s3  ;;  %p8541_p7 = scmp.lt.s32.totalorder %s8535_s3, %s8535_s3 }
  0x30   :  { %p8542_p8 = por %p8541_p7, %p8540_p6 }
  0x32   :  { %p8543_p9 = pnand %p8542_p8, %p8536_p5 }
  0x34   :  { %8546 = shalt.err (!%p8543_p9)
}
  0x35   :  { %23 = dma.hbm_to_vmem [thread:$0]  %s8734_s0, 3200, %s21_s21, [#allocation3]  }
  0x36   :  { %s8547_s10 = scalar_lea.hbm %s8736_s2, 64 }
  0x37   :  { %p8548_p10 = scmp.ne.s32.totalorder %s8736_s2, %s8547_s10  ;;  %p8551_p11 = scmp.lt.u32.totalorder %s8547_s10, %s8736_s2 }
  0x39   :  { %p8553_p12 = pnand %p8551_p11, %p8548_p10 }
  0x3b   :  { %8556 = shalt.err (!%p8553_p12)
}
  0x3c   :  { %s8557_s15 = scalar_lea.vmem %s43_s23, 64  ;;  %p8562_p0 = scmp.lt.s32.totalorder %s43_s23, %s43_s23 }
  0x3d   :  { %p8558_p13 = scmp.ne.s32.totalorder %s43_s23, %s8557_s15  ;;  %p8563_p1 = scmp.lt.s32.totalorder %s8557_s15, %s8557_s15 }
  0x3f   :  { %p8564_p2 = por %p8563_p1, %p8562_p0 }
  0x41   :  { %p8565_p3 = pnand %p8564_p2, %p8558_p13 }
  0x43   :  { %8568 = shalt.err (!%p8565_p3)
}
  0x44   :  { %45 = dma.hbm_to_vmem [thread:$0]  %s8736_s2, 64, %s43_s23, [#allocation6]  }
  0x45   :  { %s8629_s1 = smov [#allocation10]   ;;  %s8569_s20 = scalar_lea.hbm %s8738_s4, 16 }
  0x46   :  { %s64_s17 = sshll.u32 %s8629_s1, 4  ;;  %p8570_p4 = scmp.ne.s32.totalorder %s8738_s4, %s8569_s20  ;;  %s65_s17 = int_to_ptr.vmem [resolvable:$true] %s64_s17 }
  0x47   :  { %p8573_p5 = scmp.lt.u32.totalorder %s8569_s20, %s8738_s4 }
  0x49   :  { %p8575_p6 = pnand %p8573_p5, %p8570_p4 }
  0x4b   :  { %8578 = shalt.err (!%p8575_p6)
}
  0x4c   :  { %s8579_s26 = scalar_lea.vmem %s65_s17, 16  ;;  %s8583_s2 = scalar_lea.vmem %s65_s17, 32 }
  0x4d   :  { %p8580_p7 = scmp.ne.s32.totalorder %s65_s17, %s8579_s26  ;;  %p8584_p8 = scmp.lt.s32.totalorder %s65_s17, %s65_s17 }
  0x4e   :  { %p8585_p9 = scmp.lt.s32.totalorder %s8583_s2, %s8579_s26 }
  0x50   :  { %p8586_p10 = por %p8585_p9, %p8584_p8 }
  0x52   :  { %p8587_p11 = pnand %p8586_p10, %p8580_p7 }
  0x54   :  { %8590 = shalt.err (!%p8587_p11)
}
  0x55   :  { %67 = dma.hbm_to_vmem [thread:$0]  %s8738_s4, 16, %s65_s17, [#allocation9]  }
  0x56   :  { %8613 = dma.done.wait [#allocation3], 3200  }
  0x57   :  { %8614 = vsyncadd [#allocation3], 4294964096 }
  0x58   :  { %8615 = dma.done.wait [#allocation6], 100416  }
  0x59   :  { %8616 = vsyncadd [#allocation6], 4294866880 }
  0x5a   :  { %8617 = dma.done.wait [#allocation9], 4112  }
  0x5b   :  { %8618 = vsyncadd [#allocation9], 4294963184  ;;  %v7273_v0 = vld [vmem:[#allocation5 + $0x4] ss:$16 sps:$4 sm:$0xff]   ;;  %v7275_v1 = vld [vmem:[#allocation5 + $0xc] ss:$16 sps:$4 sm:$0xff]  }
  0x5c   :  { %4864 = vmatprep.subr.bf16.mxu0 %v7273_v0  ;;  %v7277_v2 = vld [vmem:[#allocation5] ss:$16 sps:$4 sm:$0xff]   ;;  %v7278_v3 = vld [vmem:[#allocation5 + $0x8] ss:$16 sps:$4 sm:$0xff]   ;;  %5397 = vmatprep.subr.bf16.mxu1 %v7275_v1  ;;  %v7279_v4 = vld [vmem:[#allocation5 + $0x24] ss:$16 sps:$4 sm:$0xff]  }
  0x5d   :  { %4865 = vmatpush1.bf16.msra.mxu0 %v7277_v2  ;;  %5398 = vmatpush1.bf16.msra.mxu1 %v7278_v3  ;;  %v7281_v5 = vld [vmem:[#allocation5 + $0x2c] ss:$16 sps:$4 sm:$0xff]   ;;  %v7283_v6 = vld [vmem:[#allocation5 + $0x20] ss:$16 sps:$4 sm:$0xff]   ;;  %v7284_v7 = vld [vmem:[#allocation5 + $0x28] ss:$16 sps:$4 sm:$0xff]  }
  0x5e   :  { %4866 = vmatprep.subr.bf16.mxu0 %v7279_v4  ;;  %5399 = vmatprep.subr.bf16.mxu1 %v7281_v5  ;;  %v7285_v8 = vld [vmem:[#allocation5 + $0x44] ss:$16 sps:$4 sm:$0xff]   ;;  %v7287_v9 = vld [vmem:[#allocation5 + $0x4c] ss:$16 sps:$4 sm:$0xff]   ;;  %v7289_v10 = vld [vmem:[#allocation5 + $0x40] ss:$16 sps:$4 sm:$0xff]  }
  0x5f   :  { %v7290_v11 = vld [vmem:[#allocation5 + $0x48] ss:$16 sps:$4 sm:$0xff]   ;;  %v7291_v12 = vld [vmem:[#allocation5 + $0x64] ss:$16 sps:$4 sm:$0xff]   ;;  %v7293_v13 = vld [vmem:[#allocation5 + $0x6c] ss:$16 sps:$4 sm:$0xff]  }
  0x60   :  { %v7295_v14 = vld [vmem:[#allocation5 + $0x60] ss:$16 sps:$4 sm:$0xff]   ;;  %v7296_v15 = vld [vmem:[#allocation5 + $0x68] ss:$16 sps:$4 sm:$0xff]   ;;  %v7297_v16 = vld [vmem:[#allocation5 + $0x84] ss:$16 sps:$4 sm:$0xff]  }
  0x61   :  { %4867 = vmatpush1.bf16.msra.mxu0 %v7283_v6  ;;  %5400 = vmatpush1.bf16.msra.mxu1 %v7284_v7  ;;  %v7299_v17 = vld [vmem:[#allocation5 + $0x8c] ss:$16 sps:$4 sm:$0xff]   ;;  %v7301_v18 = vld [vmem:[#allocation5 + $0x80] ss:$16 sps:$4 sm:$0xff]   ;;  %v7302_v19 = vld [vmem:[#allocation5 + $0x88] ss:$16 sps:$4 sm:$0xff]  }
  0x62   :  { %4868 = vmatprep.subr.bf16.mxu0 %v7285_v8  ;;  %5401 = vmatprep.subr.bf16.mxu1 %v7287_v9  ;;  %v7303_v20 = vld [vmem:[#allocation5 + $0xa4] ss:$16 sps:$4 sm:$0xff]   ;;  %v7305_v21 = vld [vmem:[#allocation5 + $0xac] ss:$16 sps:$4 sm:$0xff]   ;;  %v7307_v22 = vld [vmem:[#allocation5 + $0xa0] ss:$16 sps:$4 sm:$0xff]  }
  0x63   :  { %v7308_v23 = vld [vmem:[#allocation5 + $0xa8] ss:$16 sps:$4 sm:$0xff]   ;;  %v7309_v24 = vld [vmem:[#allocation5 + $0xc4] ss:$16 sps:$4 sm:$0xff]   ;;  %v7311_v25 = vld [vmem:[#allocation5 + $0xcc] ss:$16 sps:$4 sm:$0xff]  }
  0x64   :  { %v7313_v26 = vld [vmem:[#allocation5 + $0xc0] ss:$16 sps:$4 sm:$0xff]   ;;  %v7314_v27 = vld [vmem:[#allocation5 + $0xc8] ss:$16 sps:$4 sm:$0xff]   ;;  %v7315_v28 = vld [vmem:[#allocation5 + $0xe4] ss:$16 sps:$4 sm:$0xff]  }
  0x65   :  { %4869 = vmatpush1.bf16.msra.mxu0 %v7289_v10  ;;  %5402 = vmatpush1.bf16.msra.mxu1 %v7290_v11  ;;  %v7317_v29 = vld [vmem:[#allocation5 + $0xec] ss:$16 sps:$4 sm:$0xff]   ;;  %v7319_v30 = vld [vmem:[#allocation5 + $0xe0] ss:$16 sps:$4 sm:$0xff]   ;;  %v7320_v31 = vld [vmem:[#allocation5 + $0xe8] ss:$16 sps:$4 sm:$0xff]  }
  0x66   :  { %4870 = vmatprep.subr.bf16.mxu0 %v7291_v12  ;;  %5403 = vmatprep.subr.bf16.mxu1 %v7293_v13  ;;  %v7321_v32 = vld [vmem:[#allocation5 + $0x104] ss:$16 sps:$4 sm:$0xff]   ;;  %v7323_v33 = vld [vmem:[#allocation5 + $0x10c] ss:$16 sps:$4 sm:$0xff]   ;;  %v7325_v34 = vld [vmem:[#allocation5 + $0x100] ss:$16 sps:$4 sm:$0xff]  }
  0x67   :  { %v7326_v35 = vld [vmem:[#allocation5 + $0x108] ss:$16 sps:$4 sm:$0xff]   ;;  %v7327_v36 = vld [vmem:[#allocation5 + $0x124] ss:$16 sps:$4 sm:$0xff]   ;;  %v7329_v37 = vld [vmem:[#allocation5 + $0x12c] ss:$16 sps:$4 sm:$0xff]  }
  0x68   :  { %v7331_v38 = vld [vmem:[#allocation5 + $0x120] ss:$16 sps:$4 sm:$0xff]   ;;  %v7332_v39 = vld [vmem:[#allocation5 + $0x128] ss:$16 sps:$4 sm:$0xff]   ;;  %v7333_v40 = vld [vmem:[#allocation5 + $0x144] ss:$16 sps:$4 sm:$0xff]  }
  0x69   :  { %4871 = vmatpush1.bf16.msra.mxu0 %v7295_v14  ;;  %5404 = vmatpush1.bf16.msra.mxu1 %v7296_v15  ;;  %v7335_v41 = vld [vmem:[#allocation5 + $0x14c] ss:$16 sps:$4 sm:$0xff]   ;;  %v7337_v42 = vld [vmem:[#allocation5 + $0x140] ss:$16 sps:$4 sm:$0xff]   ;;  %v7338_v43 = vld [vmem:[#allocation5 + $0x148] ss:$16 sps:$4 sm:$0xff]  }
  0x6a   :  { %4872 = vmatprep.subr.bf16.mxu0 %v7297_v16  ;;  %5405 = vmatprep.subr.bf16.mxu1 %v7299_v17  ;;  %v7339_v44 = vld [vmem:[#allocation5 + $0x164] ss:$16 sps:$4 sm:$0xff]   ;;  %v7341_v45 = vld [vmem:[#allocation5 + $0x16c] ss:$16 sps:$4 sm:$0xff]   ;;  %v7343_v47 = vld [vmem:[#allocation5 + $0x160] ss:$16 sps:$4 sm:$0xff]  }
  0x6b   :  { %v85_v46 = vld [vmem:[#allocation2 + $0x8] sm:$0xff]  ;;  %v7344_v49 = vld [vmem:[#allocation5 + $0x168] ss:$16 sps:$4 sm:$0xff]   ;;  %v7347_v51 = vld [vmem:[#allocation5 + $0x18c] ss:$16 sps:$4 sm:$0xff]   ;;  %vm4860_vm0 = vcmask 523264  }
  0x6c   :  { %v110_v48 = vpack.c.bf16 %v85_v46, %v85_v46  ;;  %v7345_v50 = vld [vmem:[#allocation5 + $0x184] ss:$16 sps:$4 sm:$0xff]   ;;  %v7349_v52 = vld [vmem:[#allocation5 + $0x180] ss:$16 sps:$4 sm:$0xff]   ;;  %v7350_v53 = vld [vmem:[#allocation5 + $0x188] ss:$16 sps:$4 sm:$0xff]  }
  0x6d   :  { %4873 = vmatpush1.bf16.msra.mxu0 %v7301_v18  ;;  %5406 = vmatpush1.bf16.msra.mxu1 %v7302_v19  ;;  %v7351_v54 = vld [vmem:[#allocation5 + $0x1a4] ss:$16 sps:$4 sm:$0xff]   ;;  %v7353_v55 = vld [vmem:[#allocation5 + $0x1ac] ss:$16 sps:$4 sm:$0xff]   ;;  %v7355_v56 = vld [vmem:[#allocation5 + $0x1a0] ss:$16 sps:$4 sm:$0xff]  }
  0x6e   :  { %4874 = vmatprep.subr.bf16.mxu0 %v7303_v20  ;;  %5407 = vmatprep.subr.bf16.mxu1 %v7305_v21  ;;  %v7356_v57 = vld [vmem:[#allocation5 + $0x1a8] ss:$16 sps:$4 sm:$0xff]   ;;  %v7357_v58 = vld [vmem:[#allocation5 + $0x1c4] ss:$16 sps:$4 sm:$0xff]   ;;  %v7359_v59 = vld [vmem:[#allocation5 + $0x1cc] ss:$16 sps:$4 sm:$0xff]  }
  0x6f   :  { %4896 = vmatprep.mubr.bf16.mxu0 %v110_v48  ;;  %5429 = vmatprep.mubr.bf16.mxu1 %v110_v48  ;;  %v7361_v60 = vld [vmem:[#allocation5 + $0x1c0] ss:$16 sps:$4 sm:$0xff]   ;;  %v7362_v61 = vld [vmem:[#allocation5 + $0x1c8] ss:$16 sps:$4 sm:$0xff]   ;;  %v7363_v62 = vld [vmem:[#allocation5 + $0x1e4] ss:$16 sps:$4 sm:$0xff]  }
  0x70   :  { %v7365_v63 = vld [vmem:[#allocation5 + $0x1ec] ss:$16 sps:$4 sm:$0xff]   ;;  %v7367_v0 = vld [vmem:[#allocation5 + $0x1e0] ss:$16 sps:$4 sm:$0xff]   ;;  %v7368_v1 = vld [vmem:[#allocation5 + $0x1e8] ss:$16 sps:$4 sm:$0xff]  }
  0x71   :  { %4875 = vmatpush1.bf16.msra.mxu0 %v7307_v22  ;;  %5408 = vmatpush1.bf16.msra.mxu1 %v7308_v23  ;;  %v84_v2 = vld [vmem:[#allocation2] sm:$0xff]  ;;  %v7371_v3 = vld [vmem:[#allocation5 + $0x204] ss:$16 sps:$4 sm:$0xff]   ;;  %v7369_v6 = vld [vmem:[#allocation5 + $0x200] ss:$16 sps:$4 sm:$0xff]   ;;  %s8631_s4 = smov [#allocation11]  }
  0x72   :  { %4876 = vmatprep.subr.bf16.mxu0 %v7309_v24  ;;  %5409 = vmatprep.subr.bf16.mxu1 %v7311_v25  ;;  %v7374_v4 = vld [vmem:[#allocation5 + $0x20c] ss:$16 sps:$4 sm:$0xff]   ;;  %v109_v5 = vpack.c.bf16 %v84_v2, %v84_v2  ;;  %v7372_v7 = vld [vmem:[#allocation5 + $0x208] ss:$16 sps:$4 sm:$0xff]   ;;  %v7377_v8 = vld [vmem:[#allocation5 + $0x224] ss:$16 sps:$4 sm:$0xff]  }
  0x73   :  { %v7380_v9 = vld [vmem:[#allocation5 + $0x22c] ss:$16 sps:$4 sm:$0xff]   ;;  %v7375_v10 = vld [vmem:[#allocation5 + $0x220] ss:$16 sps:$4 sm:$0xff]   ;;  %v7378_v11 = vld [vmem:[#allocation5 + $0x228] ss:$16 sps:$4 sm:$0xff]  }
  0x74   :  { %v7383_v12 = vld [vmem:[#allocation5 + $0x244] ss:$16 sps:$4 sm:$0xff]   ;;  %v7386_v13 = vld [vmem:[#allocation5 + $0x24c] ss:$16 sps:$4 sm:$0xff]   ;;  %v7381_v14 = vld [vmem:[#allocation5 + $0x240] ss:$16 sps:$4 sm:$0xff]  }
  0x75   :  { %4877 = vmatpush1.bf16.msra.mxu0 %v7313_v26  ;;  %5410 = vmatpush1.bf16.msra.mxu1 %v7314_v27  ;;  %v7384_v15 = vld [vmem:[#allocation5 + $0x248] ss:$16 sps:$4 sm:$0xff]   ;;  %v7389_v16 = vld [vmem:[#allocation5 + $0x264] ss:$16 sps:$4 sm:$0xff]   ;;  %v7392_v17 = vld [vmem:[#allocation5 + $0x26c] ss:$16 sps:$4 sm:$0xff]  }
  0x76   :  { %4878 = vmatprep.subr.bf16.mxu0 %v7315_v28  ;;  %5411 = vmatprep.subr.bf16.mxu1 %v7317_v29  ;;  %v7387_v18 = vld [vmem:[#allocation5 + $0x260] ss:$16 sps:$4 sm:$0xff]   ;;  %v7390_v19 = vld [vmem:[#allocation5 + $0x268] ss:$16 sps:$4 sm:$0xff]   ;;  %v7395_v20 = vld [vmem:[#allocation5 + $0x284] ss:$16 sps:$4 sm:$0xff]  }
  0x77   :  { %v7398_v21 = vld [vmem:[#allocation5 + $0x28c] ss:$16 sps:$4 sm:$0xff]   ;;  %v7393_v22 = vld [vmem:[#allocation5 + $0x280] ss:$16 sps:$4 sm:$0xff]   ;;  %v7396_v23 = vld [vmem:[#allocation5 + $0x288] ss:$16 sps:$4 sm:$0xff]  }
  0x78   :  { %v7401_v24 = vld [vmem:[#allocation5 + $0x2a4] ss:$16 sps:$4 sm:$0xff]   ;;  %v7404_v25 = vld [vmem:[#allocation5 + $0x2ac] ss:$16 sps:$4 sm:$0xff]   ;;  %v7399_v26 = vld [vmem:[#allocation5 + $0x2a0] ss:$16 sps:$4 sm:$0xff]  }
  0x79   :  { %4879 = vmatpush1.bf16.msra.mxu0 %v7319_v30  ;;  %5412 = vmatpush1.bf16.msra.mxu1 %v7320_v31  ;;  %v7402_v27 = vld [vmem:[#allocation5 + $0x2a8] ss:$16 sps:$4 sm:$0xff]   ;;  %v7407_v28 = vld [vmem:[#allocation5 + $0x2c4] ss:$16 sps:$4 sm:$0xff]   ;;  %v7410_v29 = vld [vmem:[#allocation5 + $0x2cc] ss:$16 sps:$4 sm:$0xff]  }
  0x7a   :  { %4880 = vmatprep.subr.bf16.mxu0 %v7321_v32  ;;  %5413 = vmatprep.subr.bf16.mxu1 %v7323_v33  ;;  %v87_v30 = vld [vmem:[#allocation2 + $0x18] sm:$0xff]  ;;  %v7408_v33 = vld [vmem:[#allocation5 + $0x2c8] ss:$16 sps:$4 sm:$0xff]   ;;  %s6288_s28 = sshll.u32 %s8631_s4, 4  ;;  %s6289_s28 = int_to_ptr.vmem [resolvable:$true] %s6288_s28 }
  0x7b   :  { %v7405_v31 = vld [vmem:[#allocation5 + $0x2c0] ss:$16 sps:$4 sm:$0xff]   ;;  %v112_v32 = vpack.c.bf16 %v87_v30, %v87_v30  ;;  %v7431_v46 = vld [vmem:[#allocation5 + $0x344] ss:$16 sps:$4 sm:$0xff]   ;;  %s8591_s29 = scalar_lea.vmem %s6289_s28, 128  ;;  %p8596_p13 = scmp.lt.s32.totalorder %s6289_s28, %s6289_s28 }
  0x7c   :  { %v7429_v48 = vld [vmem:[#allocation5 + $0x340] ss:$16 sps:$4 sm:$0xff]   ;;  %v7461_v2 = vld [vmem:[#allocation5 + $0x3e4] ss:$16 sps:$4 sm:$0xff]   ;;  %p8592_p12 = scmp.ne.s32.totalorder %s6289_s28, %s8591_s29  ;;  %p8597_p0 = scmp.lt.s32.totalorder %s8591_s29, %s8591_s29 }
  0x7d   :  { %4881 = vmatpush1.bf16.msra.mxu0 %v7325_v34  ;;  %5414 = vmatpush1.bf16.msra.mxu1 %v7326_v35  ;;  %v7413_v34 = vld [vmem:[#allocation5 + $0x2e4] ss:$16 sps:$4 sm:$0xff]   ;;  %v7416_v35 = vld [vmem:[#allocation5 + $0x2ec] ss:$16 sps:$4 sm:$0xff]  }
  0x7e   :  { %4882 = vmatprep.subr.bf16.mxu0 %v7327_v36  ;;  %5415 = vmatprep.subr.bf16.mxu1 %v7329_v37  ;;  %v7411_v36 = vld [vmem:[#allocation5 + $0x2e0] ss:$16 sps:$4 sm:$0xff]   ;;  %v7414_v37 = vld [vmem:[#allocation5 + $0x2e8] ss:$16 sps:$4 sm:$0xff]   ;;  %v7497_v30 = vld [vmem:[#allocation5 + $0x4a4] ss:$16 sps:$4 sm:$0xff]   ;;  %p8598_p1 = por %p8597_p0, %p8596_p13 }
  0x80   :  { %p8599_p2 = pnand %p8598_p1, %p8592_p12 }
  0x81   :  { %4883 = vmatpush1.bf16.msra.mxu0 %v7331_v38  ;;  %5416 = vmatpush1.bf16.msra.mxu1 %v7332_v39  ;;  %v7419_v38 = vld [vmem:[#allocation5 + $0x304] ss:$16 sps:$4 sm:$0xff]   ;;  %v7422_v39 = vld [vmem:[#allocation5 + $0x30c] ss:$16 sps:$4 sm:$0xff]  }
  0x82   :  { %4884 = vmatprep.subr.bf16.mxu0 %v7333_v40  ;;  %5417 = vmatprep.subr.bf16.mxu1 %v7335_v41  ;;  %v7417_v40 = vld [vmem:[#allocation5 + $0x300] ss:$16 sps:$4 sm:$0xff]   ;;  %v7420_v41 = vld [vmem:[#allocation5 + $0x308] ss:$16 sps:$4 sm:$0xff]  }
  0x85   :  { %4885 = vmatpush1.bf16.msra.mxu0 %v7337_v42  ;;  %5418 = vmatpush1.bf16.msra.mxu1 %v7338_v43  ;;  %v7425_v42 = vld [vmem:[#allocation5 + $0x324] ss:$16 sps:$4 sm:$0xff]   ;;  %v7428_v43 = vld [vmem:[#allocation5 + $0x32c] ss:$16 sps:$4 sm:$0xff]  }
  0x86   :  { %4886 = vmatprep.subr.bf16.mxu0 %v7339_v44  ;;  %5419 = vmatprep.subr.bf16.mxu1 %v7341_v45  ;;  %v7423_v44 = vld [vmem:[#allocation5 + $0x320] ss:$16 sps:$4 sm:$0xff]   ;;  %v7426_v45 = vld [vmem:[#allocation5 + $0x328] ss:$16 sps:$4 sm:$0xff]  }
  0x89   :  { %4887 = vmatpush1.bf16.msra.mxu0 %v7343_v47  ;;  %5420 = vmatpush1.bf16.msra.mxu1 %v7344_v49  ;;  %v7434_v47 = vld [vmem:[#allocation5 + $0x34c] ss:$16 sps:$4 sm:$0xff]   ;;  %v7432_v49 = vld [vmem:[#allocation5 + $0x348] ss:$16 sps:$4 sm:$0xff]  }
  0x8a   :  { %4888 = vmatprep.subr.bf16.mxu0 %v7345_v50  ;;  %5421 = vmatprep.subr.bf16.mxu1 %v7347_v51  ;;  %v7437_v50 = vld [vmem:[#allocation5 + $0x364] ss:$16 sps:$4 sm:$0xff]   ;;  %v7440_v51 = vld [vmem:[#allocation5 + $0x36c] ss:$16 sps:$4 sm:$0xff]  }
  0x8d   :  { %4889 = vmatpush1.bf16.msra.mxu0 %v7349_v52  ;;  %5422 = vmatpush1.bf16.msra.mxu1 %v7350_v53  ;;  %v7435_v52 = vld [vmem:[#allocation5 + $0x360] ss:$16 sps:$4 sm:$0xff]   ;;  %v7438_v53 = vld [vmem:[#allocation5 + $0x368] ss:$16 sps:$4 sm:$0xff]  }
  0x8e   :  { %4890 = vmatprep.subr.bf16.mxu0 %v7351_v54  ;;  %5423 = vmatprep.subr.bf16.mxu1 %v7353_v55  ;;  %v7443_v54 = vld [vmem:[#allocation5 + $0x384] ss:$16 sps:$4 sm:$0xff]   ;;  %v7446_v55 = vld [vmem:[#allocation5 + $0x38c] ss:$16 sps:$4 sm:$0xff]  }
  0x91   :  { %4891 = vmatpush1.bf16.msra.mxu0 %v7355_v56  ;;  %5424 = vmatpush1.bf16.msra.mxu1 %v7356_v57  ;;  %v7441_v56 = vld [vmem:[#allocation5 + $0x380] ss:$16 sps:$4 sm:$0xff]   ;;  %v7444_v57 = vld [vmem:[#allocation5 + $0x388] ss:$16 sps:$4 sm:$0xff]  }
  0x92   :  { %4892 = vmatprep.subr.bf16.mxu0 %v7357_v58  ;;  %5425 = vmatprep.subr.bf16.mxu1 %v7359_v59  ;;  %v7449_v58 = vld [vmem:[#allocation5 + $0x3a4] ss:$16 sps:$4 sm:$0xff]   ;;  %v7452_v59 = vld [vmem:[#allocation5 + $0x3ac] ss:$16 sps:$4 sm:$0xff]  }
  0x95   :  { %4893 = vmatpush1.bf16.msra.mxu0 %v7361_v60  ;;  %5426 = vmatpush1.bf16.msra.mxu1 %v7362_v61  ;;  %v7447_v60 = vld [vmem:[#allocation5 + $0x3a0] ss:$16 sps:$4 sm:$0xff]   ;;  %v7450_v61 = vld [vmem:[#allocation5 + $0x3a8] ss:$16 sps:$4 sm:$0xff]  }
  0x96   :  { %4894 = vmatprep.subr.bf16.mxu0 %v7363_v62  ;;  %5427 = vmatprep.subr.bf16.mxu1 %v7365_v63  ;;  %v7455_v62 = vld [vmem:[#allocation5 + $0x3c4] ss:$16 sps:$4 sm:$0xff]   ;;  %v7458_v63 = vld [vmem:[#allocation5 + $0x3cc] ss:$16 sps:$4 sm:$0xff]  }
  0x99   :  { %4895 = vmatpush1.bf16.msra.mxu0 %v7367_v0  ;;  %5428 = vmatpush1.bf16.msra.mxu1 %v7368_v1  ;;  %v7453_v0 = vld [vmem:[#allocation5 + $0x3c0] ss:$16 sps:$4 sm:$0xff]   ;;  %v7456_v1 = vld [vmem:[#allocation5 + $0x3c8] ss:$16 sps:$4 sm:$0xff]  }
  0x9a   :  { %4905 = vmatprep.subr.bf16.mxu0 %v7371_v3  ;;  %5438 = vmatprep.subr.bf16.mxu1 %v7374_v4  ;;  %v7464_v3 = vld [vmem:[#allocation5 + $0x3ec] ss:$16 sps:$4 sm:$0xff]   ;;  %v7459_v4 = vld [vmem:[#allocation5 + $0x3e0] ss:$16 sps:$4 sm:$0xff]  }
  0x9c   :  { %4897 = vmatmul.mubr.bf16.vlgmr.msra.gmra.mrb[0].mxu0 %v109_v5  ;;  %5430 = vmatmul.mubr.bf16.vlgmr.msra.gmra.mrb[0].mxu1 %v109_v5  ;;  %v7462_v5 = vld [vmem:[#allocation5 + $0x3e8] ss:$16 sps:$4 sm:$0xff]  }
  0x9d   :  { %4906 = vmatpush1.bf16.msra.mxu0 %v7369_v6  ;;  %5439 = vmatpush1.bf16.msra.mxu1 %v7372_v7  ;;  %v7467_v6 = vld [vmem:[#allocation5 + $0x404] ss:$16 sps:$4 sm:$0xff]   ;;  %v86_v7 = vld [vmem:[#allocation2 + $0x10] sm:$0xff] }
  0x9e   :  { %4907 = vmatprep.subr.bf16.mxu0 %v7377_v8  ;;  %5440 = vmatprep.subr.bf16.mxu1 %v7380_v9  ;;  %v7470_v8 = vld [vmem:[#allocation5 + $0x40c] ss:$16 sps:$4 sm:$0xff]   ;;  %v7465_v9 = vld [vmem:[#allocation5 + $0x400] ss:$16 sps:$4 sm:$0xff]  }
  0x9f   :  { %4937 = vmatprep.mubr.bf16.mxu0 %v112_v32  ;;  %5470 = vmatprep.mubr.bf16.mxu1 %v112_v32  ;;  %v7495_v32 = vld [vmem:[#allocation5 + $0x4a0] ss:$16 sps:$4 sm:$0xff]  }
  0xa1   :  { %4908 = vmatpush1.bf16.msra.mxu0 %v7375_v10  ;;  %5441 = vmatpush1.bf16.msra.mxu1 %v7378_v11  ;;  %v7468_v10 = vld [vmem:[#allocation5 + $0x408] ss:$16 sps:$4 sm:$0xff]   ;;  %v111_v11 = vpack.c.bf16 %v86_v7, %v86_v7  ;;  %v7560_v7 = vld [vmem:[#allocation5 + $0x5ec] ss:$16 sps:$4 sm:$0xff]  }
  0xa2   :  { %4909 = vmatprep.subr.bf16.mxu0 %v7383_v12  ;;  %5442 = vmatprep.subr.bf16.mxu1 %v7386_v13  ;;  %v7473_v12 = vld [vmem:[#allocation5 + $0x424] ss:$16 sps:$4 sm:$0xff]   ;;  %v7476_v13 = vld [vmem:[#allocation5 + $0x42c] ss:$16 sps:$4 sm:$0xff]  }
  0xa5   :  { %4910 = vmatpush1.bf16.msra.mxu0 %v7381_v14  ;;  %5443 = vmatpush1.bf16.msra.mxu1 %v7384_v15  ;;  %v89_v14 = vld [vmem:[#allocation2 + $0x28] sm:$0xff] }
  0xa6   :  { %4911 = vmatprep.subr.bf16.mxu0 %v7389_v16  ;;  %5444 = vmatprep.subr.bf16.mxu1 %v7392_v17  ;;  %v114_v15 = vpack.c.bf16 %v89_v14, %v89_v14  ;;  %v7471_v16 = vld [vmem:[#allocation5 + $0x420] ss:$16 sps:$4 sm:$0xff]   ;;  %v7474_v17 = vld [vmem:[#allocation5 + $0x428] ss:$16 sps:$4 sm:$0xff]  }
  0xa7   :  { %v7564_v14 = vld [vmem:[#allocation5 + $0x608] ss:$16 sps:$4 sm:$0xff]  }
  0xa9   :  { %4912 = vmatpush1.bf16.msra.mxu0 %v7387_v18  ;;  %5445 = vmatpush1.bf16.msra.mxu1 %v7390_v19  ;;  %v7479_v18 = vld [vmem:[#allocation5 + $0x444] ss:$16 sps:$4 sm:$0xff]   ;;  %v7482_v19 = vld [vmem:[#allocation5 + $0x44c] ss:$16 sps:$4 sm:$0xff]  }
  0xaa   :  { %4913 = vmatprep.subr.bf16.mxu0 %v7395_v20  ;;  %5446 = vmatprep.subr.bf16.mxu1 %v7398_v21  ;;  %v7477_v20 = vld [vmem:[#allocation5 + $0x440] ss:$16 sps:$4 sm:$0xff]   ;;  %v7480_v21 = vld [vmem:[#allocation5 + $0x448] ss:$16 sps:$4 sm:$0xff]  }
  0xad   :  { %4914 = vmatpush1.bf16.msra.mxu0 %v7393_v22  ;;  %5447 = vmatpush1.bf16.msra.mxu1 %v7396_v23  ;;  %v7485_v22 = vld [vmem:[#allocation5 + $0x464] ss:$16 sps:$4 sm:$0xff]   ;;  %v7488_v23 = vld [vmem:[#allocation5 + $0x46c] ss:$16 sps:$4 sm:$0xff]  }
  0xae   :  { %4915 = vmatprep.subr.bf16.mxu0 %v7401_v24  ;;  %5448 = vmatprep.subr.bf16.mxu1 %v7404_v25  ;;  %v7483_v24 = vld [vmem:[#allocation5 + $0x460] ss:$16 sps:$4 sm:$0xff]   ;;  %v7486_v25 = vld [vmem:[#allocation5 + $0x468] ss:$16 sps:$4 sm:$0xff]  }
  0xb1   :  { %4916 = vmatpush1.bf16.msra.mxu0 %v7399_v26  ;;  %5449 = vmatpush1.bf16.msra.mxu1 %v7402_v27  ;;  %v7491_v26 = vld [vmem:[#allocation5 + $0x484] ss:$16 sps:$4 sm:$0xff]   ;;  %v7494_v27 = vld [vmem:[#allocation5 + $0x48c] ss:$16 sps:$4 sm:$0xff]  }
  0xb2   :  { %4917 = vmatprep.subr.bf16.mxu0 %v7407_v28  ;;  %5450 = vmatprep.subr.bf16.mxu1 %v7410_v29  ;;  %v7489_v28 = vld [vmem:[#allocation5 + $0x480] ss:$16 sps:$4 sm:$0xff]   ;;  %v7492_v29 = vld [vmem:[#allocation5 + $0x488] ss:$16 sps:$4 sm:$0xff]  }
  0xb5   :  { %4918 = vmatpush1.bf16.msra.mxu0 %v7405_v31  ;;  %5451 = vmatpush1.bf16.msra.mxu1 %v7408_v33  ;;  %v7500_v31 = vld [vmem:[#allocation5 + $0x4ac] ss:$16 sps:$4 sm:$0xff]   ;;  %v7498_v33 = vld [vmem:[#allocation5 + $0x4a8] ss:$16 sps:$4 sm:$0xff]  }
  0xb6   :  { %4919 = vmatprep.subr.bf16.mxu0 %v7413_v34  ;;  %5452 = vmatprep.subr.bf16.mxu1 %v7416_v35  ;;  %v7503_v34 = vld [vmem:[#allocation5 + $0x4c4] ss:$16 sps:$4 sm:$0xff]   ;;  %v7506_v35 = vld [vmem:[#allocation5 + $0x4cc] ss:$16 sps:$4 sm:$0xff]  }
  0xb9   :  { %4920 = vmatpush1.bf16.msra.mxu0 %v7411_v36  ;;  %5453 = vmatpush1.bf16.msra.mxu1 %v7414_v37  ;;  %v7501_v36 = vld [vmem:[#allocation5 + $0x4c0] ss:$16 sps:$4 sm:$0xff]   ;;  %v7504_v37 = vld [vmem:[#allocation5 + $0x4c8] ss:$16 sps:$4 sm:$0xff]  }
  0xba   :  { %4921 = vmatprep.subr.bf16.mxu0 %v7419_v38  ;;  %5454 = vmatprep.subr.bf16.mxu1 %v7422_v39  ;;  %v7509_v38 = vld [vmem:[#allocation5 + $0x4e4] ss:$16 sps:$4 sm:$0xff]   ;;  %v7512_v39 = vld [vmem:[#allocation5 + $0x4ec] ss:$16 sps:$4 sm:$0xff]  }
  0xbd   :  { %4922 = vmatpush1.bf16.msra.mxu0 %v7417_v40  ;;  %5455 = vmatpush1.bf16.msra.mxu1 %v7420_v41  ;;  %v7507_v40 = vld [vmem:[#allocation5 + $0x4e0] ss:$16 sps:$4 sm:$0xff]   ;;  %v7510_v41 = vld [vmem:[#allocation5 + $0x4e8] ss:$16 sps:$4 sm:$0xff]  }
  0xbe   :  { %4923 = vmatprep.subr.bf16.mxu0 %v7425_v42  ;;  %5456 = vmatprep.subr.bf16.mxu1 %v7428_v43  ;;  %v7515_v42 = vld [vmem:[#allocation5 + $0x504] ss:$16 sps:$4 sm:$0xff]   ;;  %v7518_v43 = vld [vmem:[#allocation5 + $0x50c] ss:$16 sps:$4 sm:$0xff]  }
  0xc1   :  { %4924 = vmatpush1.bf16.msra.mxu0 %v7423_v44  ;;  %5457 = vmatpush1.bf16.msra.mxu1 %v7426_v45  ;;  %v7513_v44 = vld [vmem:[#allocation5 + $0x500] ss:$16 sps:$4 sm:$0xff]   ;;  %v7516_v45 = vld [vmem:[#allocation5 + $0x508] ss:$16 sps:$4 sm:$0xff]  }
  0xc2   :  { %4925 = vmatprep.subr.bf16.mxu0 %v7431_v46  ;;  %5458 = vmatprep.subr.bf16.mxu1 %v7434_v47  ;;  %v7521_v46 = vld [vmem:[#allocation5 + $0x524] ss:$16 sps:$4 sm:$0xff]   ;;  %v7524_v47 = vld [vmem:[#allocation5 + $0x52c] ss:$16 sps:$4 sm:$0xff]  }
  0xc5   :  { %4926 = vmatpush1.bf16.msra.mxu0 %v7429_v48  ;;  %5459 = vmatpush1.bf16.msra.mxu1 %v7432_v49  ;;  %v7519_v48 = vld [vmem:[#allocation5 + $0x520] ss:$16 sps:$4 sm:$0xff]   ;;  %v7522_v49 = vld [vmem:[#allocation5 + $0x528] ss:$16 sps:$4 sm:$0xff]  }
  0xc6   :  { %4927 = vmatprep.subr.bf16.mxu0 %v7437_v50  ;;  %5460 = vmatprep.subr.bf16.mxu1 %v7440_v51  ;;  %v7527_v50 = vld [vmem:[#allocation5 + $0x544] ss:$16 sps:$4 sm:$0xff]   ;;  %v7530_v51 = vld [vmem:[#allocation5 + $0x54c] ss:$16 sps:$4 sm:$0xff]  }
  0xc9   :  { %4928 = vmatpush1.bf16.msra.mxu0 %v7435_v52  ;;  %5461 = vmatpush1.bf16.msra.mxu1 %v7438_v53  ;;  %v7525_v52 = vld [vmem:[#allocation5 + $0x540] ss:$16 sps:$4 sm:$0xff]   ;;  %v7528_v53 = vld [vmem:[#allocation5 + $0x548] ss:$16 sps:$4 sm:$0xff]  }
  0xca   :  { %4929 = vmatprep.subr.bf16.mxu0 %v7443_v54  ;;  %5462 = vmatprep.subr.bf16.mxu1 %v7446_v55  ;;  %v7533_v54 = vld [vmem:[#allocation5 + $0x564] ss:$16 sps:$4 sm:$0xff]   ;;  %v7536_v55 = vld [vmem:[#allocation5 + $0x56c] ss:$16 sps:$4 sm:$0xff]  }
  0xcd   :  { %4930 = vmatpush1.bf16.msra.mxu0 %v7441_v56  ;;  %5463 = vmatpush1.bf16.msra.mxu1 %v7444_v57  ;;  %v7531_v56 = vld [vmem:[#allocation5 + $0x560] ss:$16 sps:$4 sm:$0xff]   ;;  %v7534_v57 = vld [vmem:[#allocation5 + $0x568] ss:$16 sps:$4 sm:$0xff]  }
  0xce   :  { %4931 = vmatprep.subr.bf16.mxu0 %v7449_v58  ;;  %5464 = vmatprep.subr.bf16.mxu1 %v7452_v59  ;;  %v7539_v58 = vld [vmem:[#allocation5 + $0x584] ss:$16 sps:$4 sm:$0xff]   ;;  %v7542_v59 = vld [vmem:[#allocation5 + $0x58c] ss:$16 sps:$4 sm:$0xff]  }
  0xd1   :  { %4932 = vmatpush1.bf16.msra.mxu0 %v7447_v60  ;;  %5465 = vmatpush1.bf16.msra.mxu1 %v7450_v61  ;;  %v7537_v60 = vld [vmem:[#allocation5 + $0x580] ss:$16 sps:$4 sm:$0xff]   ;;  %v7540_v61 = vld [vmem:[#allocation5 + $0x588] ss:$16 sps:$4 sm:$0xff]  }
  0xd2   :  { %4933 = vmatprep.subr.bf16.mxu0 %v7455_v62  ;;  %5466 = vmatprep.subr.bf16.mxu1 %v7458_v63  ;;  %v7545_v62 = vld [vmem:[#allocation5 + $0x5a4] ss:$16 sps:$4 sm:$0xff]   ;;  %v7548_v63 = vld [vmem:[#allocation5 + $0x5ac] ss:$16 sps:$4 sm:$0xff]  }
  0xd5   :  { %4934 = vmatpush1.bf16.msra.mxu0 %v7453_v0  ;;  %5467 = vmatpush1.bf16.msra.mxu1 %v7456_v1  ;;  %v7543_v0 = vld [vmem:[#allocation5 + $0x5a0] ss:$16 sps:$4 sm:$0xff]   ;;  %v7546_v1 = vld [vmem:[#allocation5 + $0x5a8] ss:$16 sps:$4 sm:$0xff]  }
  0xd6   :  { %4935 = vmatprep.subr.bf16.mxu0 %v7461_v2  ;;  %5468 = vmatprep.subr.bf16.mxu1 %v7464_v3  ;;  %v7551_v2 = vld [vmem:[#allocation5 + $0x5c4] ss:$16 sps:$4 sm:$0xff]   ;;  %v7554_v3 = vld [vmem:[#allocation5 + $0x5cc] ss:$16 sps:$4 sm:$0xff]  }
  0xd9   :  { %4936 = vmatpush1.bf16.msra.mxu0 %v7459_v4  ;;  %5469 = vmatpush1.bf16.msra.mxu1 %v7462_v5  ;;  %v7549_v4 = vld [vmem:[#allocation5 + $0x5c0] ss:$16 sps:$4 sm:$0xff]   ;;  %v7552_v5 = vld [vmem:[#allocation5 + $0x5c8] ss:$16 sps:$4 sm:$0xff]  }
  0xda   :  { %4946 = vmatprep.subr.bf16.mxu0 %v7467_v6  ;;  %5479 = vmatprep.subr.bf16.mxu1 %v7470_v8  ;;  %v7557_v6 = vld [vmem:[#allocation5 + $0x5e4] ss:$16 sps:$4 sm:$0xff]   ;;  %v7555_v8 = vld [vmem:[#allocation5 + $0x5e0] ss:$16 sps:$4 sm:$0xff]  }
  0xdc   :  { %4938 = vmatmul.mubr.bf16.vlgmr.msra.gmra.mrb[0].mxu0 %v111_v11  ;;  %5471 = vmatmul.mubr.bf16.vlgmr.msra.gmra.mrb[0].mxu1 %v111_v11  ;;  %v88_v11 = vld [vmem:[#allocation2 + $0x20] sm:$0xff] }
  0xdd   :  { %4947 = vmatpush1.bf16.msra.mxu0 %v7465_v9  ;;  %5480 = vmatpush1.bf16.msra.mxu1 %v7468_v10  ;;  %v7558_v9 = vld [vmem:[#allocation5 + $0x5e8] ss:$16 sps:$4 sm:$0xff]   ;;  %v7563_v10 = vld [vmem:[#allocation5 + $0x604] ss:$16 sps:$4 sm:$0xff]  }
  0xde   :  { %4948 = vmatprep.subr.bf16.mxu0 %v7473_v12  ;;  %5481 = vmatprep.subr.bf16.mxu1 %v7476_v13  ;;  %v7566_v12 = vld [vmem:[#allocation5 + $0x60c] ss:$16 sps:$4 sm:$0xff]   ;;  %v7561_v13 = vld [vmem:[#allocation5 + $0x600] ss:$16 sps:$4 sm:$0xff]  }
  0xdf   :  { %4978 = vmatprep.mubr.bf16.mxu0 %v114_v15  ;;  %5511 = vmatprep.mubr.bf16.mxu1 %v114_v15  ;;  %v113_v15 = vpack.c.bf16 %v88_v11, %v88_v11  ;;  %v7656_v11 = vld [vmem:[#allocation5 + $0x7ec] ss:$16 sps:$4 sm:$0xff]  }
  0xe1   :  { %4949 = vmatpush1.bf16.msra.mxu0 %v7471_v16  ;;  %5482 = vmatpush1.bf16.msra.mxu1 %v7474_v17  ;;  %v91_v16 = vld [vmem:[#allocation2 + $0x38] sm:$0xff] }
  0xe2   :  { %4950 = vmatprep.subr.bf16.mxu0 %v7479_v18  ;;  %5483 = vmatprep.subr.bf16.mxu1 %v7482_v19  ;;  %v7569_v17 = vld [vmem:[#allocation5 + $0x624] ss:$16 sps:$4 sm:$0xff]   ;;  %v7572_v18 = vld [vmem:[#allocation5 + $0x62c] ss:$16 sps:$4 sm:$0xff]   ;;  %v116_v19 = vpack.c.bf16 %v91_v16, %v91_v16 }
  0xe3   :  { %v7662_v16 = vld [vmem:[#allocation5 + $0x80c] ss:$16 sps:$4 sm:$0xff]  }
  0xe5   :  { %4951 = vmatpush1.bf16.msra.mxu0 %v7477_v20  ;;  %5484 = vmatpush1.bf16.msra.mxu1 %v7480_v21  ;;  %v7567_v20 = vld [vmem:[#allocation5 + $0x620] ss:$16 sps:$4 sm:$0xff]   ;;  %v7570_v21 = vld [vmem:[#allocation5 + $0x628] ss:$16 sps:$4 sm:$0xff]  }
  0xe6   :  { %4952 = vmatprep.subr.bf16.mxu0 %v7485_v22  ;;  %5485 = vmatprep.subr.bf16.mxu1 %v7488_v23  ;;  %v7575_v22 = vld [vmem:[#allocation5 + $0x644] ss:$16 sps:$4 sm:$0xff]   ;;  %v7578_v23 = vld [vmem:[#allocation5 + $0x64c] ss:$16 sps:$4 sm:$0xff]  }
  0xe9   :  { %4953 = vmatpush1.bf16.msra.mxu0 %v7483_v24  ;;  %5486 = vmatpush1.bf16.msra.mxu1 %v7486_v25  ;;  %v7573_v24 = vld [vmem:[#allocation5 + $0x640] ss:$16 sps:$4 sm:$0xff]   ;;  %v7576_v25 = vld [vmem:[#allocation5 + $0x648] ss:$16 sps:$4 sm:$0xff]  }
  0xea   :  { %4954 = vmatprep.subr.bf16.mxu0 %v7491_v26  ;;  %5487 = vmatprep.subr.bf16.mxu1 %v7494_v27  ;;  %v7581_v26 = vld [vmem:[#allocation5 + $0x664] ss:$16 sps:$4 sm:$0xff]   ;;  %v7584_v27 = vld [vmem:[#allocation5 + $0x66c] ss:$16 sps:$4 sm:$0xff]  }
  0xed   :  { %4955 = vmatpush1.bf16.msra.mxu0 %v7489_v28  ;;  %5488 = vmatpush1.bf16.msra.mxu1 %v7492_v29  ;;  %v7579_v28 = vld [vmem:[#allocation5 + $0x660] ss:$16 sps:$4 sm:$0xff]   ;;  %v7582_v29 = vld [vmem:[#allocation5 + $0x668] ss:$16 sps:$4 sm:$0xff]  }
  0xee   :  { %4956 = vmatprep.subr.bf16.mxu0 %v7497_v30  ;;  %5489 = vmatprep.subr.bf16.mxu1 %v7500_v31  ;;  %v7587_v30 = vld [vmem:[#allocation5 + $0x684] ss:$16 sps:$4 sm:$0xff]   ;;  %v7590_v31 = vld [vmem:[#allocation5 + $0x68c] ss:$16 sps:$4 sm:$0xff]  }
  0xf1   :  { %4957 = vmatpush1.bf16.msra.mxu0 %v7495_v32  ;;  %5490 = vmatpush1.bf16.msra.mxu1 %v7498_v33  ;;  %v7585_v32 = vld [vmem:[#allocation5 + $0x680] ss:$16 sps:$4 sm:$0xff]   ;;  %v7588_v33 = vld [vmem:[#allocation5 + $0x688] ss:$16 sps:$4 sm:$0xff]  }
  0xf2   :  { %4958 = vmatprep.subr.bf16.mxu0 %v7503_v34  ;;  %5491 = vmatprep.subr.bf16.mxu1 %v7506_v35  ;;  %v7593_v34 = vld [vmem:[#allocation5 + $0x6a4] ss:$16 sps:$4 sm:$0xff]   ;;  %v7596_v35 = vld [vmem:[#allocation5 + $0x6ac] ss:$16 sps:$4 sm:$0xff]  }
  0xf5   :  { %4959 = vmatpush1.bf16.msra.mxu0 %v7501_v36  ;;  %5492 = vmatpush1.bf16.msra.mxu1 %v7504_v37  ;;  %v7591_v36 = vld [vmem:[#allocation5 + $0x6a0] ss:$16 sps:$4 sm:$0xff]   ;;  %v7594_v37 = vld [vmem:[#allocation5 + $0x6a8] ss:$16 sps:$4 sm:$0xff]  }
  0xf6   :  { %4960 = vmatprep.subr.bf16.mxu0 %v7509_v38  ;;  %5493 = vmatprep.subr.bf16.mxu1 %v7512_v39  ;;  %v7599_v38 = vld [vmem:[#allocation5 + $0x6c4] ss:$16 sps:$4 sm:$0xff]   ;;  %v7602_v39 = vld [vmem:[#allocation5 + $0x6cc] ss:$16 sps:$4 sm:$0xff]  }
  0xf9   :  { %4961 = vmatpush1.bf16.msra.mxu0 %v7507_v40  ;;  %5494 = vmatpush1.bf16.msra.mxu1 %v7510_v41  ;;  %v7597_v40 = vld [vmem:[#allocation5 + $0x6c0] ss:$16 sps:$4 sm:$0xff]   ;;  %v7600_v41 = vld [vmem:[#allocation5 + $0x6c8] ss:$16 sps:$4 sm:$0xff]  }
  0xfa   :  { %4962 = vmatprep.subr.bf16.mxu0 %v7515_v42  ;;  %5495 = vmatprep.subr.bf16.mxu1 %v7518_v43  ;;  %v7605_v42 = vld [vmem:[#allocation5 + $0x6e4] ss:$16 sps:$4 sm:$0xff]   ;;  %v7608_v43 = vld [vmem:[#allocation5 + $0x6ec] ss:$16 sps:$4 sm:$0xff]  }
  0xfd   :  { %4963 = vmatpush1.bf16.msra.mxu0 %v7513_v44  ;;  %5496 = vmatpush1.bf16.msra.mxu1 %v7516_v45  ;;  %v7603_v44 = vld [vmem:[#allocation5 + $0x6e0] ss:$16 sps:$4 sm:$0xff]   ;;  %v7606_v45 = vld [vmem:[#allocation5 + $0x6e8] ss:$16 sps:$4 sm:$0xff]  }
  0xfe   :  { %4964 = vmatprep.subr.bf16.mxu0 %v7521_v46  ;;  %5497 = vmatprep.subr.bf16.mxu1 %v7524_v47  ;;  %v7611_v46 = vld [vmem:[#allocation5 + $0x704] ss:$16 sps:$4 sm:$0xff]   ;;  %v7614_v47 = vld [vmem:[#allocation5 + $0x70c] ss:$16 sps:$4 sm:$0xff]  }
 0x101   :  { %4965 = vmatpush1.bf16.msra.mxu0 %v7519_v48  ;;  %5498 = vmatpush1.bf16.msra.mxu1 %v7522_v49  ;;  %v7609_v48 = vld [vmem:[#allocation5 + $0x700] ss:$16 sps:$4 sm:$0xff]   ;;  %v7612_v49 = vld [vmem:[#allocation5 + $0x708] ss:$16 sps:$4 sm:$0xff]  }
 0x102   :  { %4966 = vmatprep.subr.bf16.mxu0 %v7527_v50  ;;  %5499 = vmatprep.subr.bf16.mxu1 %v7530_v51  ;;  %v7617_v50 = vld [vmem:[#allocation5 + $0x724] ss:$16 sps:$4 sm:$0xff]   ;;  %v7620_v51 = vld [vmem:[#allocation5 + $0x72c] ss:$16 sps:$4 sm:$0xff]  }
 0x105   :  { %4967 = vmatpush1.bf16.msra.mxu0 %v7525_v52  ;;  %5500 = vmatpush1.bf16.msra.mxu1 %v7528_v53  ;;  %v7615_v52 = vld [vmem:[#allocation5 + $0x720] ss:$16 sps:$4 sm:$0xff]   ;;  %v7618_v53 = vld [vmem:[#allocation5 + $0x728] ss:$16 sps:$4 sm:$0xff]  }
 0x106   :  { %4968 = vmatprep.subr.bf16.mxu0 %v7533_v54  ;;  %5501 = vmatprep.subr.bf16.mxu1 %v7536_v55  ;;  %v7623_v54 = vld [vmem:[#allocation5 + $0x744] ss:$16 sps:$4 sm:$0xff]   ;;  %v7626_v55 = vld [vmem:[#allocation5 + $0x74c] ss:$16 sps:$4 sm:$0xff]  }
 0x109   :  { %4969 = vmatpush1.bf16.msra.mxu0 %v7531_v56  ;;  %5502 = vmatpush1.bf16.msra.mxu1 %v7534_v57  ;;  %v7621_v56 = vld [vmem:[#allocation5 + $0x740] ss:$16 sps:$4 sm:$0xff]   ;;  %v7624_v57 = vld [vmem:[#allocation5 + $0x748] ss:$16 sps:$4 sm:$0xff]  }
 0x10a   :  { %4970 = vmatprep.subr.bf16.mxu0 %v7539_v58  ;;  %5503 = vmatprep.subr.bf16.mxu1 %v7542_v59  ;;  %v7629_v58 = vld [vmem:[#allocation5 + $0x764] ss:$16 sps:$4 sm:$0xff]   ;;  %v7632_v59 = vld [vmem:[#allocation5 + $0x76c] ss:$16 sps:$4 sm:$0xff]  }
 0x10d   :  { %4971 = vmatpush1.bf16.msra.mxu0 %v7537_v60  ;;  %5504 = vmatpush1.bf16.msra.mxu1 %v7540_v61  ;;  %v7627_v60 = vld [vmem:[#allocation5 + $0x760] ss:$16 sps:$4 sm:$0xff]   ;;  %v7630_v61 = vld [vmem:[#allocation5 + $0x768] ss:$16 sps:$4 sm:$0xff]  }
 0x10e   :  { %4972 = vmatprep.subr.bf16.mxu0 %v7545_v62  ;;  %5505 = vmatprep.subr.bf16.mxu1 %v7548_v63  ;;  %v7635_v62 = vld [vmem:[#allocation5 + $0x784] ss:$16 sps:$4 sm:$0xff]   ;;  %v7638_v63 = vld [vmem:[#allocation5 + $0x78c] ss:$16 sps:$4 sm:$0xff]  }
 0x111   :  { %4973 = vmatpush1.bf16.msra.mxu0 %v7543_v0  ;;  %5506 = vmatpush1.bf16.msra.mxu1 %v7546_v1  ;;  %v7633_v0 = vld [vmem:[#allocation5 + $0x780] ss:$16 sps:$4 sm:$0xff]   ;;  %v7636_v1 = vld [vmem:[#allocation5 + $0x788] ss:$16 sps:$4 sm:$0xff]  }
 0x112   :  { %4974 = vmatprep.subr.bf16.mxu0 %v7551_v2  ;;  %5507 = vmatprep.subr.bf16.mxu1 %v7554_v3  ;;  %v7641_v2 = vld [vmem:[#allocation5 + $0x7a4] ss:$16 sps:$4 sm:$0xff]   ;;  %v7644_v3 = vld [vmem:[#allocation5 + $0x7ac] ss:$16 sps:$4 sm:$0xff]  }
 0x115   :  { %4975 = vmatpush1.bf16.msra.mxu0 %v7549_v4  ;;  %5508 = vmatpush1.bf16.msra.mxu1 %v7552_v5  ;;  %v7639_v4 = vld [vmem:[#allocation5 + $0x7a0] ss:$16 sps:$4 sm:$0xff]   ;;  %v7642_v5 = vld [vmem:[#allocation5 + $0x7a8] ss:$16 sps:$4 sm:$0xff]  }
 0x116   :  { %4976 = vmatprep.subr.bf16.mxu0 %v7557_v6  ;;  %5509 = vmatprep.subr.bf16.mxu1 %v7560_v7  ;;  %v7647_v6 = vld [vmem:[#allocation5 + $0x7c4] ss:$16 sps:$4 sm:$0xff]   ;;  %v7650_v7 = vld [vmem:[#allocation5 + $0x7cc] ss:$16 sps:$4 sm:$0xff]  }
 0x119   :  { %4977 = vmatpush1.bf16.msra.mxu0 %v7555_v8  ;;  %5510 = vmatpush1.bf16.msra.mxu1 %v7558_v9  ;;  %v7645_v8 = vld [vmem:[#allocation5 + $0x7c0] ss:$16 sps:$4 sm:$0xff]   ;;  %v7648_v9 = vld [vmem:[#allocation5 + $0x7c8] ss:$16 sps:$4 sm:$0xff]  }
 0x11a   :  { %4987 = vmatprep.subr.bf16.mxu0 %v7563_v10  ;;  %5520 = vmatprep.subr.bf16.mxu1 %v7566_v12  ;;  %v7653_v10 = vld [vmem:[#allocation5 + $0x7e4] ss:$16 sps:$4 sm:$0xff]   ;;  %v7651_v12 = vld [vmem:[#allocation5 + $0x7e0] ss:$16 sps:$4 sm:$0xff]  }
 0x11c   :  { %4979 = vmatmul.mubr.bf16.vlgmr.msra.gmra.mrb[0].mxu0 %v113_v15  ;;  %5512 = vmatmul.mubr.bf16.vlgmr.msra.gmra.mrb[0].mxu1 %v113_v15  ;;  %v7659_v15 = vld [vmem:[#allocation5 + $0x804] ss:$16 sps:$4 sm:$0xff]  }
 0x11d   :  { %4988 = vmatpush1.bf16.msra.mxu0 %v7561_v13  ;;  %5521 = vmatpush1.bf16.msra.mxu1 %v7564_v14  ;;  %v7654_v13 = vld [vmem:[#allocation5 + $0x7e8] ss:$16 sps:$4 sm:$0xff]  }
 0x11e   :  { %4989 = vmatprep.subr.bf16.mxu0 %v7569_v17  ;;  %5522 = vmatprep.subr.bf16.mxu1 %v7572_v18  ;;  %v90_v14 = vld [vmem:[#allocation2 + $0x30] sm:$0xff]  ;;  %v93_v18 = vld [vmem:[#allocation2 + $0x48] sm:$0xff] }
 0x11f   :  { %5019 = vmatprep.mubr.bf16.mxu0 %v116_v19  ;;  %5552 = vmatprep.mubr.bf16.mxu1 %v116_v19  ;;  %v115_v17 = vpack.c.bf16 %v90_v14, %v90_v14  ;;  %v7657_v19 = vld [vmem:[#allocation5 + $0x800] ss:$16 sps:$4 sm:$0xff]   ;;  %v7749_v14 = vld [vmem:[#allocation5 + $0x9e4] ss:$16 sps:$4 sm:$0xff]  }
 0x121   :  { %4990 = vmatpush1.bf16.msra.mxu0 %v7567_v20  ;;  %5523 = vmatpush1.bf16.msra.mxu1 %v7570_v21  ;;  %v7660_v20 = vld [vmem:[#allocation5 + $0x808] ss:$16 sps:$4 sm:$0xff]   ;;  %v7665_v21 = vld [vmem:[#allocation5 + $0x824] ss:$16 sps:$4 sm:$0xff]  }
 0x122   :  { %4991 = vmatprep.subr.bf16.mxu0 %v7575_v22  ;;  %5524 = vmatprep.subr.bf16.mxu1 %v7578_v23  ;;  %v7668_v22 = vld [vmem:[#allocation5 + $0x82c] ss:$16 sps:$4 sm:$0xff]   ;;  %v118_v23 = vpack.c.bf16 %v93_v18, %v93_v18  ;;  %v7755_v18 = vld [vmem:[#allocation5 + $0xa04] ss:$16 sps:$4 sm:$0xff]  }
 0x125   :  { %4992 = vmatpush1.bf16.msra.mxu0 %v7573_v24  ;;  %5525 = vmatpush1.bf16.msra.mxu1 %v7576_v25  ;;  %v7663_v24 = vld [vmem:[#allocation5 + $0x820] ss:$16 sps:$4 sm:$0xff]   ;;  %v7666_v25 = vld [vmem:[#allocation5 + $0x828] ss:$16 sps:$4 sm:$0xff]  }
 0x126   :  { %4993 = vmatprep.subr.bf16.mxu0 %v7581_v26  ;;  %5526 = vmatprep.subr.bf16.mxu1 %v7584_v27  ;;  %v7671_v26 = vld [vmem:[#allocation5 + $0x844] ss:$16 sps:$4 sm:$0xff]   ;;  %v7674_v27 = vld [vmem:[#allocation5 + $0x84c] ss:$16 sps:$4 sm:$0xff]  }
 0x129   :  { %4994 = vmatpush1.bf16.msra.mxu0 %v7579_v28  ;;  %5527 = vmatpush1.bf16.msra.mxu1 %v7582_v29  ;;  %v7669_v28 = vld [vmem:[#allocation5 + $0x840] ss:$16 sps:$4 sm:$0xff]   ;;  %v7672_v29 = vld [vmem:[#allocation5 + $0x848] ss:$16 sps:$4 sm:$0xff]  }
 0x12a   :  { %4995 = vmatprep.subr.bf16.mxu0 %v7587_v30  ;;  %5528 = vmatprep.subr.bf16.mxu1 %v7590_v31  ;;  %v7677_v30 = vld [vmem:[#allocation5 + $0x864] ss:$16 sps:$4 sm:$0xff]   ;;  %v7680_v31 = vld [vmem:[#allocation5 + $0x86c] ss:$16 sps:$4 sm:$0xff]  }
 0x12d   :  { %4996 = vmatpush1.bf16.msra.mxu0 %v7585_v32  ;;  %5529 = vmatpush1.bf16.msra.mxu1 %v7588_v33  ;;  %v7675_v32 = vld [vmem:[#allocation5 + $0x860] ss:$16 sps:$4 sm:$0xff]   ;;  %v7678_v33 = vld [vmem:[#allocation5 + $0x868] ss:$16 sps:$4 sm:$0xff]  }
 0x12e   :  { %4997 = vmatprep.subr.bf16.mxu0 %v7593_v34  ;;  %5530 = vmatprep.subr.bf16.mxu1 %v7596_v35  ;;  %v7683_v34 = vld [vmem:[#allocation5 + $0x884] ss:$16 sps:$4 sm:$0xff]   ;;  %v7686_v35 = vld [vmem:[#allocation5 + $0x88c] ss:$16 sps:$4 sm:$0xff]  }
 0x131   :  { %4998 = vmatpush1.bf16.msra.mxu0 %v7591_v36  ;;  %5531 = vmatpush1.bf16.msra.mxu1 %v7594_v37  ;;  %v7681_v36 = vld [vmem:[#allocation5 + $0x880] ss:$16 sps:$4 sm:$0xff]   ;;  %v7684_v37 = vld [vmem:[#allocation5 + $0x888] ss:$16 sps:$4 sm:$0xff]  }
 0x132   :  { %4999 = vmatprep.subr.bf16.mxu0 %v7599_v38  ;;  %5532 = vmatprep.subr.bf16.mxu1 %v7602_v39  ;;  %v7689_v38 = vld [vmem:[#allocation5 + $0x8a4] ss:$16 sps:$4 sm:$0xff]   ;;  %v7692_v39 = vld [vmem:[#allocation5 + $0x8ac] ss:$16 sps:$4 sm:$0xff]  }
 0x135   :  { %5000 = vmatpush1.bf16.msra.mxu0 %v7597_v40  ;;  %5533 = vmatpush1.bf16.msra.mxu1 %v7600_v41  ;;  %v7687_v40 = vld [vmem:[#allocation5 + $0x8a0] ss:$16 sps:$4 sm:$0xff]   ;;  %v7690_v41 = vld [vmem:[#allocation5 + $0x8a8] ss:$16 sps:$4 sm:$0xff]  }
 0x136   :  { %5001 = vmatprep.subr.bf16.mxu0 %v7605_v42  ;;  %5534 = vmatprep.subr.bf16.mxu1 %v7608_v43  ;;  %v7695_v42 = vld [vmem:[#allocation5 + $0x8c4] ss:$16 sps:$4 sm:$0xff]   ;;  %v7698_v43 = vld [vmem:[#allocation5 + $0x8cc] ss:$16 sps:$4 sm:$0xff]  }
 0x139   :  { %5002 = vmatpush1.bf16.msra.mxu0 %v7603_v44  ;;  %5535 = vmatpush1.bf16.msra.mxu1 %v7606_v45  ;;  %v7693_v44 = vld [vmem:[#allocation5 + $0x8c0] ss:$16 sps:$4 sm:$0xff]   ;;  %v7696_v45 = vld [vmem:[#allocation5 + $0x8c8] ss:$16 sps:$4 sm:$0xff]  }
 0x13a   :  { %5003 = vmatprep.subr.bf16.mxu0 %v7611_v46  ;;  %5536 = vmatprep.subr.bf16.mxu1 %v7614_v47  ;;  %v7701_v46 = vld [vmem:[#allocation5 + $0x8e4] ss:$16 sps:$4 sm:$0xff]   ;;  %v7704_v47 = vld [vmem:[#allocation5 + $0x8ec] ss:$16 sps:$4 sm:$0xff]  }
 0x13d   :  { %5004 = vmatpush1.bf16.msra.mxu0 %v7609_v48  ;;  %5537 = vmatpush1.bf16.msra.mxu1 %v7612_v49  ;;  %v7699_v48 = vld [vmem:[#allocation5 + $0x8e0] ss:$16 sps:$4 sm:$0xff]   ;;  %v7702_v49 = vld [vmem:[#allocation5 + $0x8e8] ss:$16 sps:$4 sm:$0xff]  }
 0x13e   :  { %5005 = vmatprep.subr.bf16.mxu0 %v7617_v50  ;;  %5538 = vmatprep.subr.bf16.mxu1 %v7620_v51  ;;  %v7707_v50 = vld [vmem:[#allocation5 + $0x904] ss:$16 sps:$4 sm:$0xff]   ;;  %v7710_v51 = vld [vmem:[#allocation5 + $0x90c] ss:$16 sps:$4 sm:$0xff]  }
 0x141   :  { %5006 = vmatpush1.bf16.msra.mxu0 %v7615_v52  ;;  %5539 = vmatpush1.bf16.msra.mxu1 %v7618_v53  ;;  %v7705_v52 = vld [vmem:[#allocation5 + $0x900] ss:$16 sps:$4 sm:$0xff]   ;;  %v7708_v53 = vld [vmem:[#allocation5 + $0x908] ss:$16 sps:$4 sm:$0xff]  }
 0x142   :  { %5007 = vmatprep.subr.bf16.mxu0 %v7623_v54  ;;  %5540 = vmatprep.subr.bf16.mxu1 %v7626_v55  ;;  %v7713_v54 = vld [vmem:[#allocation5 + $0x924] ss:$16 sps:$4 sm:$0xff]   ;;  %v7716_v55 = vld [vmem:[#allocation5 + $0x92c] ss:$16 sps:$4 sm:$0xff]  }
 0x145   :  { %5008 = vmatpush1.bf16.msra.mxu0 %v7621_v56  ;;  %5541 = vmatpush1.bf16.msra.mxu1 %v7624_v57  ;;  %v7711_v56 = vld [vmem:[#allocation5 + $0x920] ss:$16 sps:$4 sm:$0xff]   ;;  %v7714_v57 = vld [vmem:[#allocation5 + $0x928] ss:$16 sps:$4 sm:$0xff]  }
 0x146   :  { %5009 = vmatprep.subr.bf16.mxu0 %v7629_v58  ;;  %5542 = vmatprep.subr.bf16.mxu1 %v7632_v59  ;;  %v7719_v58 = vld [vmem:[#allocation5 + $0x944] ss:$16 sps:$4 sm:$0xff]   ;;  %v7722_v59 = vld [vmem:[#allocation5 + $0x94c] ss:$16 sps:$4 sm:$0xff]  }
 0x149   :  { %5010 = vmatpush1.bf16.msra.mxu0 %v7627_v60  ;;  %5543 = vmatpush1.bf16.msra.mxu1 %v7630_v61  ;;  %v7717_v60 = vld [vmem:[#allocation5 + $0x940] ss:$16 sps:$4 sm:$0xff]   ;;  %v7720_v61 = vld [vmem:[#allocation5 + $0x948] ss:$16 sps:$4 sm:$0xff]  }
 0x14a   :  { %5011 = vmatprep.subr.bf16.mxu0 %v7635_v62  ;;  %5544 = vmatprep.subr.bf16.mxu1 %v7638_v63  ;;  %v7725_v62 = vld [vmem:[#allocation5 + $0x964] ss:$16 sps:$4 sm:$0xff]   ;;  %v7728_v63 = vld [vmem:[#allocation5 + $0x96c] ss:$16 sps:$4 sm:$0xff]  }
 0x14d   :  { %5012 = vmatpush1.bf16.msra.mxu0 %v7633_v0  ;;  %5545 = vmatpush1.bf16.msra.mxu1 %v7636_v1  ;;  %v7723_v0 = vld [vmem:[#allocation5 + $0x960] ss:$16 sps:$4 sm:$0xff]   ;;  %v7726_v1 = vld [vmem:[#allocation5 + $0x968] ss:$16 sps:$4 sm:$0xff]  }
 0x14e   :  { %5013 = vmatprep.subr.bf16.mxu0 %v7641_v2  ;;  %5546 = vmatprep.subr.bf16.mxu1 %v7644_v3  ;;  %v7731_v2 = vld [vmem:[#allocation5 + $0x984] ss:$16 sps:$4 sm:$0xff]   ;;  %v7734_v3 = vld [vmem:[#allocation5 + $0x98c] ss:$16 sps:$4 sm:$0xff]  }
 0x151   :  { %5014 = vmatpush1.bf16.msra.mxu0 %v7639_v4  ;;  %5547 = vmatpush1.bf16.msra.mxu1 %v7642_v5  ;;  %v7729_v4 = vld [vmem:[#allocation5 + $0x980] ss:$16 sps:$4 sm:$0xff]   ;;  %v7732_v5 = vld [vmem:[#allocation5 + $0x988] ss:$16 sps:$4 sm:$0xff]  }
 0x152   :  { %5015 = vmatprep.subr.bf16.mxu0 %v7647_v6  ;;  %5548 = vmatprep.subr.bf16.mxu1 %v7650_v7  ;;  %v7737_v6 = vld [vmem:[#allocation5 + $0x9a4] ss:$16 sps:$4 sm:$0xff]   ;;  %v7740_v7 = vld [vmem:[#allocation5 + $0x9ac] ss:$16 sps:$4 sm:$0xff]  }
 0x155   :  { %5016 = vmatpush1.bf16.msra.mxu0 %v7645_v8  ;;  %5549 = vmatpush1.bf16.msra.mxu1 %v7648_v9  ;;  %v7735_v8 = vld [vmem:[#allocation5 + $0x9a0] ss:$16 sps:$4 sm:$0xff]   ;;  %v7738_v9 = vld [vmem:[#allocation5 + $0x9a8] ss:$16 sps:$4 sm:$0xff]  }
 0x156   :  { %5017 = vmatprep.subr.bf16.mxu0 %v7653_v10  ;;  %5550 = vmatprep.subr.bf16.mxu1 %v7656_v11  ;;  %v7743_v10 = vld [vmem:[#allocation5 + $0x9c4] ss:$16 sps:$4 sm:$0xff]   ;;  %v7746_v11 = vld [vmem:[#allocation5 + $0x9cc] ss:$16 sps:$4 sm:$0xff]  }
 0x159   :  { %5018 = vmatpush1.bf16.msra.mxu0 %v7651_v12  ;;  %5551 = vmatpush1.bf16.msra.mxu1 %v7654_v13  ;;  %v7741_v12 = vld [vmem:[#allocation5 + $0x9c0] ss:$16 sps:$4 sm:$0xff]   ;;  %v7744_v13 = vld [vmem:[#allocation5 + $0x9c8] ss:$16 sps:$4 sm:$0xff]  }
 0x15a   :  { %5028 = vmatprep.subr.bf16.mxu0 %v7659_v15  ;;  %5561 = vmatprep.subr.bf16.mxu1 %v7662_v16  ;;  %v7752_v15 = vld [vmem:[#allocation5 + $0x9ec] ss:$16 sps:$4 sm:$0xff]   ;;  %v7747_v16 = vld [vmem:[#allocation5 + $0x9e0] ss:$16 sps:$4 sm:$0xff]  }
 0x15c   :  { %5020 = vmatmul.mubr.bf16.vlgmr.msra.gmra.mrb[0].mxu0 %v115_v17  ;;  %5553 = vmatmul.mubr.bf16.vlgmr.msra.gmra.mrb[0].mxu1 %v115_v17  ;;  %v7750_v17 = vld [vmem:[#allocation5 + $0x9e8] ss:$16 sps:$4 sm:$0xff]  }
 0x15d   :  { %5029 = vmatpush1.bf16.msra.mxu0 %v7657_v19  ;;  %5562 = vmatpush1.bf16.msra.mxu1 %v7660_v20  ;;  %v92_v19 = vld [vmem:[#allocation2 + $0x40] sm:$0xff] }
 0x15e   :  { %5030 = vmatprep.subr.bf16.mxu0 %v7665_v21  ;;  %5563 = vmatprep.subr.bf16.mxu1 %v7668_v22  ;;  %v7758_v20 = vld [vmem:[#allocation5 + $0xa0c] ss:$16 sps:$4 sm:$0xff]   ;;  %v95_v21 = vld [vmem:[#allocation2 + $0x58] sm:$0xff]  ;;  %v117_v22 = vpack.c.bf16 %v92_v19, %v92_v19 }
 0x15f   :  { %5060 = vmatprep.mubr.bf16.mxu0 %v118_v23  ;;  %5593 = vmatprep.mubr.bf16.mxu1 %v118_v23  ;;  %v7753_v23 = vld [vmem:[#allocation5 + $0xa00] ss:$16 sps:$4 sm:$0xff]   ;;  %v7848_v19 = vld [vmem:[#allocation5 + $0xbec] ss:$16 sps:$4 sm:$0xff]  }
 0x161   :  { %5031 = vmatpush1.bf16.msra.mxu0 %v7663_v24  ;;  %5564 = vmatpush1.bf16.msra.mxu1 %v7666_v25  ;;  %v7756_v24 = vld [vmem:[#allocation5 + $0xa08] ss:$16 sps:$4 sm:$0xff]   ;;  %v7761_v25 = vld [vmem:[#allocation5 + $0xa24] ss:$16 sps:$4 sm:$0xff]  }
 0x162   :  { %5032 = vmatprep.subr.bf16.mxu0 %v7671_v26  ;;  %5565 = vmatprep.subr.bf16.mxu1 %v7674_v27  ;;  %v7764_v26 = vld [vmem:[#allocation5 + $0xa2c] ss:$16 sps:$4 sm:$0xff]   ;;  %v120_v27 = vpack.c.bf16 %v95_v21, %v95_v21  ;;  %v7846_v21 = vld [vmem:[#allocation5 + $0xbe8] ss:$16 sps:$4 sm:$0xff]  }
 0x165   :  { %5033 = vmatpush1.bf16.msra.mxu0 %v7669_v28  ;;  %5566 = vmatpush1.bf16.msra.mxu1 %v7672_v29  ;;  %v7759_v28 = vld [vmem:[#allocation5 + $0xa20] ss:$16 sps:$4 sm:$0xff]   ;;  %v7762_v29 = vld [vmem:[#allocation5 + $0xa28] ss:$16 sps:$4 sm:$0xff]  }
 0x166   :  { %5034 = vmatprep.subr.bf16.mxu0 %v7677_v30  ;;  %5567 = vmatprep.subr.bf16.mxu1 %v7680_v31  ;;  %v7767_v30 = vld [vmem:[#allocation5 + $0xa44] ss:$16 sps:$4 sm:$0xff]   ;;  %v7770_v31 = vld [vmem:[#allocation5 + $0xa4c] ss:$16 sps:$4 sm:$0xff]  }
 0x169   :  { %5035 = vmatpush1.bf16.msra.mxu0 %v7675_v32  ;;  %5568 = vmatpush1.bf16.msra.mxu1 %v7678_v33  ;;  %v7765_v32 = vld [vmem:[#allocation5 + $0xa40] ss:$16 sps:$4 sm:$0xff]   ;;  %v7768_v33 = vld [vmem:[#allocation5 + $0xa48] ss:$16 sps:$4 sm:$0xff]  }
 0x16a   :  { %5036 = vmatprep.subr.bf16.mxu0 %v7683_v34  ;;  %5569 = vmatprep.subr.bf16.mxu1 %v7686_v35  ;;  %v7773_v34 = vld [vmem:[#allocation5 + $0xa64] ss:$16 sps:$4 sm:$0xff]   ;;  %v7776_v35 = vld [vmem:[#allocation5 + $0xa6c] ss:$16 sps:$4 sm:$0xff]  }
 0x16d   :  { %5037 = vmatpush1.bf16.msra.mxu0 %v7681_v36  ;;  %5570 = vmatpush1.bf16.msra.mxu1 %v7684_v37  ;;  %v7771_v36 = vld [vmem:[#allocation5 + $0xa60] ss:$16 sps:$4 sm:$0xff]   ;;  %v7774_v37 = vld [vmem:[#allocation5 + $0xa68] ss:$16 sps:$4 sm:$0xff]  }
 0x16e   :  { %5038 = vmatprep.subr.bf16.mxu0 %v7689_v38  ;;  %5571 = vmatprep.subr.bf16.mxu1 %v7692_v39  ;;  %v7779_v38 = vld [vmem:[#allocation5 + $0xa84] ss:$16 sps:$4 sm:$0xff]   ;;  %v7782_v39 = vld [vmem:[#allocation5 + $0xa8c] ss:$16 sps:$4 sm:$0xff]  }
 0x171   :  { %5039 = vmatpush1.bf16.msra.mxu0 %v7687_v40  ;;  %5572 = vmatpush1.bf16.msra.mxu1 %v7690_v41  ;;  %v7777_v40 = vld [vmem:[#allocation5 + $0xa80] ss:$16 sps:$4 sm:$0xff]   ;;  %v7780_v41 = vld [vmem:[#allocation5 + $0xa88] ss:$16 sps:$4 sm:$0xff]  }
 0x172   :  { %5040 = vmatprep.subr.bf16.mxu0 %v7695_v42  ;;  %5573 = vmatprep.subr.bf16.mxu1 %v7698_v43  ;;  %v7785_v42 = vld [vmem:[#allocation5 + $0xaa4] ss:$16 sps:$4 sm:$0xff]   ;;  %v7788_v43 = vld [vmem:[#allocation5 + $0xaac] ss:$16 sps:$4 sm:$0xff]  }
 0x175   :  { %5041 = vmatpush1.bf16.msra.mxu0 %v7693_v44  ;;  %5574 = vmatpush1.bf16.msra.mxu1 %v7696_v45  ;;  %v7783_v44 = vld [vmem:[#allocation5 + $0xaa0] ss:$16 sps:$4 sm:$0xff]   ;;  %v7786_v45 = vld [vmem:[#allocation5 + $0xaa8] ss:$16 sps:$4 sm:$0xff]  }
 0x176   :  { %5042 = vmatprep.subr.bf16.mxu0 %v7701_v46  ;;  %5575 = vmatprep.subr.bf16.mxu1 %v7704_v47  ;;  %v7791_v46 = vld [vmem:[#allocation5 + $0xac4] ss:$16 sps:$4 sm:$0xff]   ;;  %v7794_v47 = vld [vmem:[#allocation5 + $0xacc] ss:$16 sps:$4 sm:$0xff]  }
 0x179   :  { %5043 = vmatpush1.bf16.msra.mxu0 %v7699_v48  ;;  %5576 = vmatpush1.bf16.msra.mxu1 %v7702_v49  ;;  %v7789_v48 = vld [vmem:[#allocation5 + $0xac0] ss:$16 sps:$4 sm:$0xff]   ;;  %v7792_v49 = vld [vmem:[#allocation5 + $0xac8] ss:$16 sps:$4 sm:$0xff]  }
 0x17a   :  { %5044 = vmatprep.subr.bf16.mxu0 %v7707_v50  ;;  %5577 = vmatprep.subr.bf16.mxu1 %v7710_v51  ;;  %v7797_v50 = vld [vmem:[#allocation5 + $0xae4] ss:$16 sps:$4 sm:$0xff]   ;;  %v7800_v51 = vld [vmem:[#allocation5 + $0xaec] ss:$16 sps:$4 sm:$0xff]  }
 0x17d   :  { %5045 = vmatpush1.bf16.msra.mxu0 %v7705_v52  ;;  %5578 = vmatpush1.bf16.msra.mxu1 %v7708_v53  ;;  %v7795_v52 = vld [vmem:[#allocation5 + $0xae0] ss:$16 sps:$4 sm:$0xff]   ;;  %v7798_v53 = vld [vmem:[#allocation5 + $0xae8] ss:$16 sps:$4 sm:$0xff]  }
 0x17e   :  { %5046 = vmatprep.subr.bf16.mxu0 %v7713_v54  ;;  %5579 = vmatprep.subr.bf16.mxu1 %v7716_v55  ;;  %v7803_v54 = vld [vmem:[#allocation5 + $0xb04] ss:$16 sps:$4 sm:$0xff]   ;;  %v7806_v55 = vld [vmem:[#allocation5 + $0xb0c] ss:$16 sps:$4 sm:$0xff]  }
 0x181   :  { %5047 = vmatpush1.bf16.msra.mxu0 %v7711_v56  ;;  %5580 = vmatpush1.bf16.msra.mxu1 %v7714_v57  ;;  %v7801_v56 = vld [vmem:[#allocation5 + $0xb00] ss:$16 sps:$4 sm:$0xff]   ;;  %v7804_v57 = vld [vmem:[#allocation5 + $0xb08] ss:$16 sps:$4 sm:$0xff]  }
 0x182   :  { %5048 = vmatprep.subr.bf16.mxu0 %v7719_v58  ;;  %5581 = vmatprep.subr.bf16.mxu1 %v7722_v59  ;;  %v7809_v58 = vld [vmem:[#allocation5 + $0xb24] ss:$16 sps:$4 sm:$0xff]   ;;  %v7812_v59 = vld [vmem:[#allocation5 + $0xb2c] ss:$16 sps:$4 sm:$0xff]  }
 0x185   :  { %5049 = vmatpush1.bf16.msra.mxu0 %v7717_v60  ;;  %5582 = vmatpush1.bf16.msra.mxu1 %v7720_v61  ;;  %v7807_v60 = vld [vmem:[#allocation5 + $0xb20] ss:$16 sps:$4 sm:$0xff]   ;;  %v7810_v61 = vld [vmem:[#allocation5 + $0xb28] ss:$16 sps:$4 sm:$0xff]  }
 0x186   :  { %5050 = vmatprep.subr.bf16.mxu0 %v7725_v62  ;;  %5583 = vmatprep.subr.bf16.mxu1 %v7728_v63  ;;  %v7815_v62 = vld [vmem:[#allocation5 + $0xb44] ss:$16 sps:$4 sm:$0xff]   ;;  %v7818_v63 = vld [vmem:[#allocation5 + $0xb4c] ss:$16 sps:$4 sm:$0xff]  }
 0x189   :  { %5051 = vmatpush1.bf16.msra.mxu0 %v7723_v0  ;;  %5584 = vmatpush1.bf16.msra.mxu1 %v7726_v1  ;;  %v7813_v0 = vld [vmem:[#allocation5 + $0xb40] ss:$16 sps:$4 sm:$0xff]   ;;  %v7816_v1 = vld [vmem:[#allocation5 + $0xb48] ss:$16 sps:$4 sm:$0xff]  }
 0x18a   :  { %5052 = vmatprep.subr.bf16.mxu0 %v7731_v2  ;;  %5585 = vmatprep.subr.bf16.mxu1 %v7734_v3  ;;  %v7821_v2 = vld [vmem:[#allocation5 + $0xb64] ss:$16 sps:$4 sm:$0xff]   ;;  %v7824_v3 = vld [vmem:[#allocation5 + $0xb6c] ss:$16 sps:$4 sm:$0xff]  }
 0x18d   :  { %5053 = vmatpush1.bf16.msra.mxu0 %v7729_v4  ;;  %5586 = vmatpush1.bf16.msra.mxu1 %v7732_v5  ;;  %v7819_v4 = vld [vmem:[#allocation5 + $0xb60] ss:$16 sps:$4 sm:$0xff]   ;;  %v7822_v5 = vld [vmem:[#allocation5 + $0xb68] ss:$16 sps:$4 sm:$0xff]  }
 0x18e   :  { %5054 = vmatprep.subr.bf16.mxu0 %v7737_v6  ;;  %5587 = vmatprep.subr.bf16.mxu1 %v7740_v7  ;;  %v7827_v6 = vld [vmem:[#allocation5 + $0xb84] ss:$16 sps:$4 sm:$0xff]   ;;  %v7830_v7 = vld [vmem:[#allocation5 + $0xb8c] ss:$16 sps:$4 sm:$0xff]  }
 0x191   :  { %5055 = vmatpush1.bf16.msra.mxu0 %v7735_v8  ;;  %5588 = vmatpush1.bf16.msra.mxu1 %v7738_v9  ;;  %v7825_v8 = vld [vmem:[#allocation5 + $0xb80] ss:$16 sps:$4 sm:$0xff]   ;;  %v7828_v9 = vld [vmem:[#allocation5 + $0xb88] ss:$16 sps:$4 sm:$0xff]  }
 0x192   :  { %5056 = vmatprep.subr.bf16.mxu0 %v7743_v10  ;;  %5589 = vmatprep.subr.bf16.mxu1 %v7746_v11  ;;  %v7833_v10 = vld [vmem:[#allocation5 + $0xba4] ss:$16 sps:$4 sm:$0xff]   ;;  %v7836_v11 = vld [vmem:[#allocation5 + $0xbac] ss:$16 sps:$4 sm:$0xff]  }
 0x195   :  { %5057 = vmatpush1.bf16.msra.mxu0 %v7741_v12  ;;  %5590 = vmatpush1.bf16.msra.mxu1 %v7744_v13  ;;  %v7831_v12 = vld [vmem:[#allocation5 + $0xba0] ss:$16 sps:$4 sm:$0xff]   ;;  %v7834_v13 = vld [vmem:[#allocation5 + $0xba8] ss:$16 sps:$4 sm:$0xff]  }
 0x196   :  { %5058 = vmatprep.subr.bf16.mxu0 %v7749_v14  ;;  %5591 = vmatprep.subr.bf16.mxu1 %v7752_v15  ;;  %v7839_v14 = vld [vmem:[#allocation5 + $0xbc4] ss:$16 sps:$4 sm:$0xff]   ;;  %v7842_v15 = vld [vmem:[#allocation5 + $0xbcc] ss:$16 sps:$4 sm:$0xff]  }
 0x199   :  { %5059 = vmatpush1.bf16.msra.mxu0 %v7747_v16  ;;  %5592 = vmatpush1.bf16.msra.mxu1 %v7750_v17  ;;  %v7837_v16 = vld [vmem:[#allocation5 + $0xbc0] ss:$16 sps:$4 sm:$0xff]   ;;  %v7840_v17 = vld [vmem:[#allocation5 + $0xbc8] ss:$16 sps:$4 sm:$0xff]  }
 0x19a   :  { %5069 = vmatprep.subr.bf16.mxu0 %v7755_v18  ;;  %5602 = vmatprep.subr.bf16.mxu1 %v7758_v20  ;;  %v7845_v18 = vld [vmem:[#allocation5 + $0xbe4] ss:$16 sps:$4 sm:$0xff]   ;;  %v7843_v20 = vld [vmem:[#allocation5 + $0xbe0] ss:$16 sps:$4 sm:$0xff]  }
 0x19c   :  { %5061 = vmatmul.mubr.bf16.vlgmr.msra.gmra.mrb[0].mxu0 %v117_v22  ;;  %5594 = vmatmul.mubr.bf16.vlgmr.msra.gmra.mrb[0].mxu1 %v117_v22  ;;  %v7851_v22 = vld [vmem:[#allocation5 + $0xc04] ss:$16 sps:$4 sm:$0xff]  }
 0x19d   :  { %5070 = vmatpush1.bf16.msra.mxu0 %v7753_v23  ;;  %5603 = vmatpush1.bf16.msra.mxu1 %v7756_v24  ;;  %v94_v23 = vld [vmem:[#allocation2 + $0x50] sm:$0xff] }
 0x19e   :  { %5071 = vmatprep.subr.bf16.mxu0 %v7761_v25  ;;  %5604 = vmatprep.subr.bf16.mxu1 %v7764_v26  ;;  %v7854_v24 = vld [vmem:[#allocation5 + $0xc0c] ss:$16 sps:$4 sm:$0xff]   ;;  %v97_v25 = vld [vmem:[#allocation2 + $0x68] sm:$0xff]  ;;  %v119_v26 = vpack.c.bf16 %v94_v23, %v94_v23 }
 0x19f   :  { %5101 = vmatprep.mubr.bf16.mxu0 %v120_v27  ;;  %5634 = vmatprep.mubr.bf16.mxu1 %v120_v27  ;;  %v7849_v27 = vld [vmem:[#allocation5 + $0xc00] ss:$16 sps:$4 sm:$0xff]   ;;  %v7944_v23 = vld [vmem:[#allocation5 + $0xdec] ss:$16 sps:$4 sm:$0xff]  }
 0x1a1   :  { %5072 = vmatpush1.bf16.msra.mxu0 %v7759_v28  ;;  %5605 = vmatpush1.bf16.msra.mxu1 %v7762_v29  ;;  %v7852_v28 = vld [vmem:[#allocation5 + $0xc08] ss:$16 sps:$4 sm:$0xff]   ;;  %v7857_v29 = vld [vmem:[#allocation5 + $0xc24] ss:$16 sps:$4 sm:$0xff]  }
 0x1a2   :  { %5073 = vmatprep.subr.bf16.mxu0 %v7767_v30  ;;  %5606 = vmatprep.subr.bf16.mxu1 %v7770_v31  ;;  %v7860_v30 = vld [vmem:[#allocation5 + $0xc2c] ss:$16 sps:$4 sm:$0xff]   ;;  %v122_v31 = vpack.c.bf16 %v97_v25, %v97_v25  ;;  %v7942_v25 = vld [vmem:[#allocation5 + $0xde8] ss:$16 sps:$4 sm:$0xff]  }
 0x1a5   :  { %5074 = vmatpush1.bf16.msra.mxu0 %v7765_v32  ;;  %5607 = vmatpush1.bf16.msra.mxu1 %v7768_v33  ;;  %v7855_v32 = vld [vmem:[#allocation5 + $0xc20] ss:$16 sps:$4 sm:$0xff]   ;;  %v7858_v33 = vld [vmem:[#allocation5 + $0xc28] ss:$16 sps:$4 sm:$0xff]  }
 0x1a6   :  { %5075 = vmatprep.subr.bf16.mxu0 %v7773_v34  ;;  %5608 = vmatprep.subr.bf16.mxu1 %v7776_v35  ;;  %v7863_v34 = vld [vmem:[#allocation5 + $0xc44] ss:$16 sps:$4 sm:$0xff]   ;;  %v7866_v35 = vld [vmem:[#allocation5 + $0xc4c] ss:$16 sps:$4 sm:$0xff]  }
 0x1a9   :  { %5076 = vmatpush1.bf16.msra.mxu0 %v7771_v36  ;;  %5609 = vmatpush1.bf16.msra.mxu1 %v7774_v37  ;;  %v7861_v36 = vld [vmem:[#allocation5 + $0xc40] ss:$16 sps:$4 sm:$0xff]   ;;  %v7864_v37 = vld [vmem:[#allocation5 + $0xc48] ss:$16 sps:$4 sm:$0xff]  }
 0x1aa   :  { %5077 = vmatprep.subr.bf16.mxu0 %v7779_v38  ;;  %5610 = vmatprep.subr.bf16.mxu1 %v7782_v39  ;;  %v7869_v38 = vld [vmem:[#allocation5 + $0xc64] ss:$16 sps:$4 sm:$0xff]   ;;  %v7872_v39 = vld [vmem:[#allocation5 + $0xc6c] ss:$16 sps:$4 sm:$0xff]  }
 0x1ad   :  { %5078 = vmatpush1.bf16.msra.mxu0 %v7777_v40  ;;  %5611 = vmatpush1.bf16.msra.mxu1 %v7780_v41  ;;  %v7867_v40 = vld [vmem:[#allocation5 + $0xc60] ss:$16 sps:$4 sm:$0xff]   ;;  %v7870_v41 = vld [vmem:[#allocation5 + $0xc68] ss:$16 sps:$4 sm:$0xff]  }
 0x1ae   :  { %5079 = vmatprep.subr.bf16.mxu0 %v7785_v42  ;;  %5612 = vmatprep.subr.bf16.mxu1 %v7788_v43  ;;  %v7875_v42 = vld [vmem:[#allocation5 + $0xc84] ss:$16 sps:$4 sm:$0xff]   ;;  %v7878_v43 = vld [vmem:[#allocation5 + $0xc8c] ss:$16 sps:$4 sm:$0xff]  }
 0x1b1   :  { %5080 = vmatpush1.bf16.msra.mxu0 %v7783_v44  ;;  %5613 = vmatpush1.bf16.msra.mxu1 %v7786_v45  ;;  %v7873_v44 = vld [vmem:[#allocation5 + $0xc80] ss:$16 sps:$4 sm:$0xff]   ;;  %v7876_v45 = vld [vmem:[#allocation5 + $0xc88] ss:$16 sps:$4 sm:$0xff]  }
 0x1b2   :  { %5081 = vmatprep.subr.bf16.mxu0 %v7791_v46  ;;  %5614 = vmatprep.subr.bf16.mxu1 %v7794_v47  ;;  %v7881_v46 = vld [vmem:[#allocation5 + $0xca4] ss:$16 sps:$4 sm:$0xff]   ;;  %v7884_v47 = vld [vmem:[#allocation5 + $0xcac] ss:$16 sps:$4 sm:$0xff]  }
 0x1b5   :  { %5082 = vmatpush1.bf16.msra.mxu0 %v7789_v48  ;;  %5615 = vmatpush1.bf16.msra.mxu1 %v7792_v49  ;;  %v7879_v48 = vld [vmem:[#allocation5 + $0xca0] ss:$16 sps:$4 sm:$0xff]   ;;  %v7882_v49 = vld [vmem:[#allocation5 + $0xca8] ss:$16 sps:$4 sm:$0xff]  }
 0x1b6   :  { %5083 = vmatprep.subr.bf16.mxu0 %v7797_v50  ;;  %5616 = vmatprep.subr.bf16.mxu1 %v7800_v51  ;;  %v7887_v50 = vld [vmem:[#allocation5 + $0xcc4] ss:$16 sps:$4 sm:$0xff]   ;;  %v7890_v51 = vld [vmem:[#allocation5 + $0xccc] ss:$16 sps:$4 sm:$0xff]  }
 0x1b9   :  { %5084 = vmatpush1.bf16.msra.mxu0 %v7795_v52  ;;  %5617 = vmatpush1.bf16.msra.mxu1 %v7798_v53  ;;  %v7885_v52 = vld [vmem:[#allocation5 + $0xcc0] ss:$16 sps:$4 sm:$0xff]   ;;  %v7888_v53 = vld [vmem:[#allocation5 + $0xcc8] ss:$16 sps:$4 sm:$0xff]  }
 0x1ba   :  { %5085 = vmatprep.subr.bf16.mxu0 %v7803_v54  ;;  %5618 = vmatprep.subr.bf16.mxu1 %v7806_v55  ;;  %v7893_v54 = vld [vmem:[#allocation5 + $0xce4] ss:$16 sps:$4 sm:$0xff]   ;;  %v7896_v55 = vld [vmem:[#allocation5 + $0xcec] ss:$16 sps:$4 sm:$0xff]  }
 0x1bd   :  { %5086 = vmatpush1.bf16.msra.mxu0 %v7801_v56  ;;  %5619 = vmatpush1.bf16.msra.mxu1 %v7804_v57  ;;  %v7891_v56 = vld [vmem:[#allocation5 + $0xce0] ss:$16 sps:$4 sm:$0xff]   ;;  %v7894_v57 = vld [vmem:[#allocation5 + $0xce8] ss:$16 sps:$4 sm:$0xff]  }
 0x1be   :  { %5087 = vmatprep.subr.bf16.mxu0 %v7809_v58  ;;  %5620 = vmatprep.subr.bf16.mxu1 %v7812_v59  ;;  %v7899_v58 = vld [vmem:[#allocation5 + $0xd04] ss:$16 sps:$4 sm:$0xff]   ;;  %v7902_v59 = vld [vmem:[#allocation5 + $0xd0c] ss:$16 sps:$4 sm:$0xff]  }
 0x1c1   :  { %5088 = vmatpush1.bf16.msra.mxu0 %v7807_v60  ;;  %5621 = vmatpush1.bf16.msra.mxu1 %v7810_v61  ;;  %v7897_v60 = vld [vmem:[#allocation5 + $0xd00] ss:$16 sps:$4 sm:$0xff]   ;;  %v7900_v61 = vld [vmem:[#allocation5 + $0xd08] ss:$16 sps:$4 sm:$0xff]  }
 0x1c2   :  { %5089 = vmatprep.subr.bf16.mxu0 %v7815_v62  ;;  %5622 = vmatprep.subr.bf16.mxu1 %v7818_v63  ;;  %v7905_v62 = vld [vmem:[#allocation5 + $0xd24] ss:$16 sps:$4 sm:$0xff]   ;;  %v7908_v63 = vld [vmem:[#allocation5 + $0xd2c] ss:$16 sps:$4 sm:$0xff]  }
 0x1c5   :  { %5090 = vmatpush1.bf16.msra.mxu0 %v7813_v0  ;;  %5623 = vmatpush1.bf16.msra.mxu1 %v7816_v1  ;;  %v7903_v0 = vld [vmem:[#allocation5 + $0xd20] ss:$16 sps:$4 sm:$0xff]   ;;  %v7906_v1 = vld [vmem:[#allocation5 + $0xd28] ss:$16 sps:$4 sm:$0xff]  }
 0x1c6   :  { %5091 = vmatprep.subr.bf16.mxu0 %v7821_v2  ;;  %5624 = vmatprep.subr.bf16.mxu1 %v7824_v3  ;;  %v7911_v2 = vld [vmem:[#allocation5 + $0xd44] ss:$16 sps:$4 sm:$0xff]   ;;  %v7914_v3 = vld [vmem:[#allocation5 + $0xd4c] ss:$16 sps:$4 sm:$0xff]  }
 0x1c9   :  { %5092 = vmatpush1.bf16.msra.mxu0 %v7819_v4  ;;  %5625 = vmatpush1.bf16.msra.mxu1 %v7822_v5  ;;  %v7909_v4 = vld [vmem:[#allocation5 + $0xd40] ss:$16 sps:$4 sm:$0xff]   ;;  %v7912_v5 = vld [vmem:[#allocation5 + $0xd48] ss:$16 sps:$4 sm:$0xff]  }
 0x1ca   :  { %5093 = vmatprep.subr.bf16.mxu0 %v7827_v6  ;;  %5626 = vmatprep.subr.bf16.mxu1 %v7830_v7  ;;  %v7917_v6 = vld [vmem:[#allocation5 + $0xd64] ss:$16 sps:$4 sm:$0xff]   ;;  %v7920_v7 = vld [vmem:[#allocation5 + $0xd6c] ss:$16 sps:$4 sm:$0xff]  }
 0x1cd   :  { %5094 = vmatpush1.bf16.msra.mxu0 %v7825_v8  ;;  %5627 = vmatpush1.bf16.msra.mxu1 %v7828_v9  ;;  %v7915_v8 = vld [vmem:[#allocation5 + $0xd60] ss:$16 sps:$4 sm:$0xff]   ;;  %v7918_v9 = vld [vmem:[#allocation5 + $0xd68] ss:$16 sps:$4 sm:$0xff]  }
 0x1ce   :  { %5095 = vmatprep.subr.bf16.mxu0 %v7833_v10  ;;  %5628 = vmatprep.subr.bf16.mxu1 %v7836_v11  ;;  %v7923_v10 = vld [vmem:[#allocation5 + $0xd84] ss:$16 sps:$4 sm:$0xff]   ;;  %v7926_v11 = vld [vmem:[#allocation5 + $0xd8c] ss:$16 sps:$4 sm:$0xff]  }
 0x1d1   :  { %5096 = vmatpush1.bf16.msra.mxu0 %v7831_v12  ;;  %5629 = vmatpush1.bf16.msra.mxu1 %v7834_v13  ;;  %v7921_v12 = vld [vmem:[#allocation5 + $0xd80] ss:$16 sps:$4 sm:$0xff]   ;;  %v7924_v13 = vld [vmem:[#allocation5 + $0xd88] ss:$16 sps:$4 sm:$0xff]  }
 0x1d2   :  { %5097 = vmatprep.subr.bf16.mxu0 %v7839_v14  ;;  %5630 = vmatprep.subr.bf16.mxu1 %v7842_v15  ;;  %v7929_v14 = vld [vmem:[#allocation5 + $0xda4] ss:$16 sps:$4 sm:$0xff]   ;;  %v7932_v15 = vld [vmem:[#allocation5 + $0xdac] ss:$16 sps:$4 sm:$0xff]  }
 0x1d5   :  { %5098 = vmatpush1.bf16.msra.mxu0 %v7837_v16  ;;  %5631 = vmatpush1.bf16.msra.mxu1 %v7840_v17  ;;  %v7927_v16 = vld [vmem:[#allocation5 + $0xda0] ss:$16 sps:$4 sm:$0xff]   ;;  %v7930_v17 = vld [vmem:[#allocation5 + $0xda8] ss:$16 sps:$4 sm:$0xff]  }
 0x1d6   :  { %5099 = vmatprep.subr.bf16.mxu0 %v7845_v18  ;;  %5632 = vmatprep.subr.bf16.mxu1 %v7848_v19  ;;  %v7935_v18 = vld [vmem:[#allocation5 + $0xdc4] ss:$16 sps:$4 sm:$0xff]   ;;  %v7938_v19 = vld [vmem:[#allocation5 + $0xdcc] ss:$16 sps:$4 sm:$0xff]  }
 0x1d9   :  { %5100 = vmatpush1.bf16.msra.mxu0 %v7843_v20  ;;  %5633 = vmatpush1.bf16.msra.mxu1 %v7846_v21  ;;  %v7933_v20 = vld [vmem:[#allocation5 + $0xdc0] ss:$16 sps:$4 sm:$0xff]   ;;  %v7936_v21 = vld [vmem:[#allocation5 + $0xdc8] ss:$16 sps:$4 sm:$0xff]  }
 0x1da   :  { %5110 = vmatprep.subr.bf16.mxu0 %v7851_v22  ;;  %5643 = vmatprep.subr.bf16.mxu1 %v7854_v24  ;;  %v7941_v22 = vld [vmem:[#allocation5 + $0xde4] ss:$16 sps:$4 sm:$0xff]   ;;  %v7939_v24 = vld [vmem:[#allocation5 + $0xde0] ss:$16 sps:$4 sm:$0xff]  }
 0x1dc   :  { %5102 = vmatmul.mubr.bf16.vlgmr.msra.gmra.mrb[0].mxu0 %v119_v26  ;;  %5635 = vmatmul.mubr.bf16.vlgmr.msra.gmra.mrb[0].mxu1 %v119_v26  ;;  %v7947_v26 = vld [vmem:[#allocation5 + $0xe04] ss:$16 sps:$4 sm:$0xff]  }
 0x1dd   :  { %5111 = vmatpush1.bf16.msra.mxu0 %v7849_v27  ;;  %5644 = vmatpush1.bf16.msra.mxu1 %v7852_v28  ;;  %v96_v27 = vld [vmem:[#allocation2 + $0x60] sm:$0xff] }
 0x1de   :  { %5112 = vmatprep.subr.bf16.mxu0 %v7857_v29  ;;  %5645 = vmatprep.subr.bf16.mxu1 %v7860_v30  ;;  %v7950_v28 = vld [vmem:[#allocation5 + $0xe0c] ss:$16 sps:$4 sm:$0xff]   ;;  %v99_v29 = vld [vmem:[#allocation2 + $0x78] sm:$0xff]  ;;  %v121_v30 = vpack.c.bf16 %v96_v27, %v96_v27 }
 0x1df   :  { %5142 = vmatprep.mubr.bf16.mxu0 %v122_v31  ;;  %5675 = vmatprep.mubr.bf16.mxu1 %v122_v31  ;;  %v7945_v31 = vld [vmem:[#allocation5 + $0xe00] ss:$16 sps:$4 sm:$0xff]   ;;  %v8040_v27 = vld [vmem:[#allocation5 + $0xfec] ss:$16 sps:$4 sm:$0xff]  }
 0x1e1   :  { %5113 = vmatpush1.bf16.msra.mxu0 %v7855_v32  ;;  %5646 = vmatpush1.bf16.msra.mxu1 %v7858_v33  ;;  %v7948_v32 = vld [vmem:[#allocation5 + $0xe08] ss:$16 sps:$4 sm:$0xff]   ;;  %v7953_v33 = vld [vmem:[#allocation5 + $0xe24] ss:$16 sps:$4 sm:$0xff]  }
 0x1e2   :  { %5114 = vmatprep.subr.bf16.mxu0 %v7863_v34  ;;  %5647 = vmatprep.subr.bf16.mxu1 %v7866_v35  ;;  %v7956_v34 = vld [vmem:[#allocation5 + $0xe2c] ss:$16 sps:$4 sm:$0xff]   ;;  %v124_v35 = vpack.c.bf16 %v99_v29, %v99_v29  ;;  %v8038_v29 = vld [vmem:[#allocation5 + $0xfe8] ss:$16 sps:$4 sm:$0xff]  }
 0x1e5   :  { %5115 = vmatpush1.bf16.msra.mxu0 %v7861_v36  ;;  %5648 = vmatpush1.bf16.msra.mxu1 %v7864_v37  ;;  %v7951_v36 = vld [vmem:[#allocation5 + $0xe20] ss:$16 sps:$4 sm:$0xff]   ;;  %v7954_v37 = vld [vmem:[#allocation5 + $0xe28] ss:$16 sps:$4 sm:$0xff]  }
 0x1e6   :  { %5116 = vmatprep.subr.bf16.mxu0 %v7869_v38  ;;  %5649 = vmatprep.subr.bf16.mxu1 %v7872_v39  ;;  %v7959_v38 = vld [vmem:[#allocation5 + $0xe44] ss:$16 sps:$4 sm:$0xff]   ;;  %v7962_v39 = vld [vmem:[#allocation5 + $0xe4c] ss:$16 sps:$4 sm:$0xff]  }
 0x1e9   :  { %5117 = vmatpush1.bf16.msra.mxu0 %v7867_v40  ;;  %5650 = vmatpush1.bf16.msra.mxu1 %v7870_v41  ;;  %v7957_v40 = vld [vmem:[#allocation5 + $0xe40] ss:$16 sps:$4 sm:$0xff]   ;;  %v7960_v41 = vld [vmem:[#allocation5 + $0xe48] ss:$16 sps:$4 sm:$0xff]  }
 0x1ea   :  { %5118 = vmatprep.subr.bf16.mxu0 %v7875_v42  ;;  %5651 = vmatprep.subr.bf16.mxu1 %v7878_v43  ;;  %v7965_v42 = vld [vmem:[#allocation5 + $0xe64] ss:$16 sps:$4 sm:$0xff]   ;;  %v7968_v43 = vld [vmem:[#allocation5 + $0xe6c] ss:$16 sps:$4 sm:$0xff]  }
 0x1ed   :  { %5119 = vmatpush1.bf16.msra.mxu0 %v7873_v44  ;;  %5652 = vmatpush1.bf16.msra.mxu1 %v7876_v45  ;;  %v7963_v44 = vld [vmem:[#allocation5 + $0xe60] ss:$16 sps:$4 sm:$0xff]   ;;  %v7966_v45 = vld [vmem:[#allocation5 + $0xe68] ss:$16 sps:$4 sm:$0xff]  }
 0x1ee   :  { %5120 = vmatprep.subr.bf16.mxu0 %v7881_v46  ;;  %5653 = vmatprep.subr.bf16.mxu1 %v7884_v47  ;;  %v7971_v46 = vld [vmem:[#allocation5 + $0xe84] ss:$16 sps:$4 sm:$0xff]   ;;  %v7974_v47 = vld [vmem:[#allocation5 + $0xe8c] ss:$16 sps:$4 sm:$0xff]  }
 0x1f1   :  { %5121 = vmatpush1.bf16.msra.mxu0 %v7879_v48  ;;  %5654 = vmatpush1.bf16.msra.mxu1 %v7882_v49  ;;  %v7969_v48 = vld [vmem:[#allocation5 + $0xe80] ss:$16 sps:$4 sm:$0xff]   ;;  %v7972_v49 = vld [vmem:[#allocation5 + $0xe88] ss:$16 sps:$4 sm:$0xff]  }
 0x1f2   :  { %5122 = vmatprep.subr.bf16.mxu0 %v7887_v50  ;;  %5655 = vmatprep.subr.bf16.mxu1 %v7890_v51  ;;  %v7977_v50 = vld [vmem:[#allocation5 + $0xea4] ss:$16 sps:$4 sm:$0xff]   ;;  %v7980_v51 = vld [vmem:[#allocation5 + $0xeac] ss:$16 sps:$4 sm:$0xff]  }
 0x1f5   :  { %5123 = vmatpush1.bf16.msra.mxu0 %v7885_v52  ;;  %5656 = vmatpush1.bf16.msra.mxu1 %v7888_v53  ;;  %v7975_v52 = vld [vmem:[#allocation5 + $0xea0] ss:$16 sps:$4 sm:$0xff]   ;;  %v7978_v53 = vld [vmem:[#allocation5 + $0xea8] ss:$16 sps:$4 sm:$0xff]  }
 0x1f6   :  { %5124 = vmatprep.subr.bf16.mxu0 %v7893_v54  ;;  %5657 = vmatprep.subr.bf16.mxu1 %v7896_v55  ;;  %v7983_v54 = vld [vmem:[#allocation5 + $0xec4] ss:$16 sps:$4 sm:$0xff]   ;;  %v7986_v55 = vld [vmem:[#allocation5 + $0xecc] ss:$16 sps:$4 sm:$0xff]  }
 0x1f9   :  { %5125 = vmatpush1.bf16.msra.mxu0 %v7891_v56  ;;  %5658 = vmatpush1.bf16.msra.mxu1 %v7894_v57  ;;  %v7981_v56 = vld [vmem:[#allocation5 + $0xec0] ss:$16 sps:$4 sm:$0xff]   ;;  %v7984_v57 = vld [vmem:[#allocation5 + $0xec8] ss:$16 sps:$4 sm:$0xff]  }
 0x1fa   :  { %5126 = vmatprep.subr.bf16.mxu0 %v7899_v58  ;;  %5659 = vmatprep.subr.bf16.mxu1 %v7902_v59  ;;  %v7989_v58 = vld [vmem:[#allocation5 + $0xee4] ss:$16 sps:$4 sm:$0xff]   ;;  %v7992_v59 = vld [vmem:[#allocation5 + $0xeec] ss:$16 sps:$4 sm:$0xff]  }
 0x1fd   :  { %5127 = vmatpush1.bf16.msra.mxu0 %v7897_v60  ;;  %5660 = vmatpush1.bf16.msra.mxu1 %v7900_v61  ;;  %v7987_v60 = vld [vmem:[#allocation5 + $0xee0] ss:$16 sps:$4 sm:$0xff]   ;;  %v7990_v61 = vld [vmem:[#allocation5 + $0xee8] ss:$16 sps:$4 sm:$0xff]  }
 0x1fe   :  { %5128 = vmatprep.subr.bf16.mxu0 %v7905_v62  ;;  %5661 = vmatprep.subr.bf16.mxu1 %v7908_v63  ;;  %v7995_v62 = vld [vmem:[#allocation5 + $0xf04] ss:$16 sps:$4 sm:$0xff]   ;;  %v7998_v63 = vld [vmem:[#allocation5 + $0xf0c] ss:$16 sps:$4 sm:$0xff]  }
 0x201   :  { %5129 = vmatpush1.bf16.msra.mxu0 %v7903_v0  ;;  %5662 = vmatpush1.bf16.msra.mxu1 %v7906_v1  ;;  %v7993_v0 = vld [vmem:[#allocation5 + $0xf00] ss:$16 sps:$4 sm:$0xff]   ;;  %v7996_v1 = vld [vmem:[#allocation5 + $0xf08] ss:$16 sps:$4 sm:$0xff]  }
 0x202   :  { %5130 = vmatprep.subr.bf16.mxu0 %v7911_v2  ;;  %5663 = vmatprep.subr.bf16.mxu1 %v7914_v3  ;;  %v8001_v2 = vld [vmem:[#allocation5 + $0xf24] ss:$16 sps:$4 sm:$0xff]   ;;  %v8004_v3 = vld [vmem:[#allocation5 + $0xf2c] ss:$16 sps:$4 sm:$0xff]  }
 0x205   :  { %5131 = vmatpush1.bf16.msra.mxu0 %v7909_v4  ;;  %5664 = vmatpush1.bf16.msra.mxu1 %v7912_v5  ;;  %v7999_v4 = vld [vmem:[#allocation5 + $0xf20] ss:$16 sps:$4 sm:$0xff]   ;;  %v8002_v5 = vld [vmem:[#allocation5 + $0xf28] ss:$16 sps:$4 sm:$0xff]  }
 0x206   :  { %5132 = vmatprep.subr.bf16.mxu0 %v7917_v6  ;;  %5665 = vmatprep.subr.bf16.mxu1 %v7920_v7  ;;  %v8007_v6 = vld [vmem:[#allocation5 + $0xf44] ss:$16 sps:$4 sm:$0xff]   ;;  %v8010_v7 = vld [vmem:[#allocation5 + $0xf4c] ss:$16 sps:$4 sm:$0xff]  }
 0x209   :  { %5133 = vmatpush1.bf16.msra.mxu0 %v7915_v8  ;;  %5666 = vmatpush1.bf16.msra.mxu1 %v7918_v9  ;;  %v8005_v8 = vld [vmem:[#allocation5 + $0xf40] ss:$16 sps:$4 sm:$0xff]   ;;  %v8008_v9 = vld [vmem:[#allocation5 + $0xf48] ss:$16 sps:$4 sm:$0xff]  }
 0x20a   :  { %5134 = vmatprep.subr.bf16.mxu0 %v7923_v10  ;;  %5667 = vmatprep.subr.bf16.mxu1 %v7926_v11  ;;  %v8013_v10 = vld [vmem:[#allocation5 + $0xf64] ss:$16 sps:$4 sm:$0xff]   ;;  %v8016_v11 = vld [vmem:[#allocation5 + $0xf6c] ss:$16 sps:$4 sm:$0xff]  }
 0x20d   :  { %5135 = vmatpush1.bf16.msra.mxu0 %v7921_v12  ;;  %5668 = vmatpush1.bf16.msra.mxu1 %v7924_v13  ;;  %v8011_v12 = vld [vmem:[#allocation5 + $0xf60] ss:$16 sps:$4 sm:$0xff]   ;;  %v8014_v13 = vld [vmem:[#allocation5 + $0xf68] ss:$16 sps:$4 sm:$0xff]  }
 0x20e   :  { %5136 = vmatprep.subr.bf16.mxu0 %v7929_v14  ;;  %5669 = vmatprep.subr.bf16.mxu1 %v7932_v15  ;;  %v8019_v14 = vld [vmem:[#allocation5 + $0xf84] ss:$16 sps:$4 sm:$0xff]   ;;  %v8022_v15 = vld [vmem:[#allocation5 + $0xf8c] ss:$16 sps:$4 sm:$0xff]  }
 0x211   :  { %5137 = vmatpush1.bf16.msra.mxu0 %v7927_v16  ;;  %5670 = vmatpush1.bf16.msra.mxu1 %v7930_v17  ;;  %v8017_v16 = vld [vmem:[#allocation5 + $0xf80] ss:$16 sps:$4 sm:$0xff]   ;;  %v8020_v17 = vld [vmem:[#allocation5 + $0xf88] ss:$16 sps:$4 sm:$0xff]  }
 0x212   :  { %5138 = vmatprep.subr.bf16.mxu0 %v7935_v18  ;;  %5671 = vmatprep.subr.bf16.mxu1 %v7938_v19  ;;  %v8025_v18 = vld [vmem:[#allocation5 + $0xfa4] ss:$16 sps:$4 sm:$0xff]   ;;  %v8028_v19 = vld [vmem:[#allocation5 + $0xfac] ss:$16 sps:$4 sm:$0xff]  }
 0x215   :  { %5139 = vmatpush1.bf16.msra.mxu0 %v7933_v20  ;;  %5672 = vmatpush1.bf16.msra.mxu1 %v7936_v21  ;;  %v8023_v20 = vld [vmem:[#allocation5 + $0xfa0] ss:$16 sps:$4 sm:$0xff]   ;;  %v8026_v21 = vld [vmem:[#allocation5 + $0xfa8] ss:$16 sps:$4 sm:$0xff]  }
 0x216   :  { %5140 = vmatprep.subr.bf16.mxu0 %v7941_v22  ;;  %5673 = vmatprep.subr.bf16.mxu1 %v7944_v23  ;;  %v8031_v22 = vld [vmem:[#allocation5 + $0xfc4] ss:$16 sps:$4 sm:$0xff]   ;;  %v8034_v23 = vld [vmem:[#allocation5 + $0xfcc] ss:$16 sps:$4 sm:$0xff]  }
 0x219   :  { %5141 = vmatpush1.bf16.msra.mxu0 %v7939_v24  ;;  %5674 = vmatpush1.bf16.msra.mxu1 %v7942_v25  ;;  %v8029_v24 = vld [vmem:[#allocation5 + $0xfc0] ss:$16 sps:$4 sm:$0xff]   ;;  %v8032_v25 = vld [vmem:[#allocation5 + $0xfc8] ss:$16 sps:$4 sm:$0xff]  }
 0x21a   :  { %5151 = vmatprep.subr.bf16.mxu0 %v7947_v26  ;;  %5684 = vmatprep.subr.bf16.mxu1 %v7950_v28  ;;  %v8037_v26 = vld [vmem:[#allocation5 + $0xfe4] ss:$16 sps:$4 sm:$0xff]   ;;  %v8035_v28 = vld [vmem:[#allocation5 + $0xfe0] ss:$16 sps:$4 sm:$0xff]  }
 0x21c   :  { %5143 = vmatmul.mubr.bf16.vlgmr.msra.gmra.mrb[0].mxu0 %v121_v30  ;;  %5676 = vmatmul.mubr.bf16.vlgmr.msra.gmra.mrb[0].mxu1 %v121_v30  ;;  %v98_v30 = vld [vmem:[#allocation2 + $0x70] sm:$0xff] }
 0x21d   :  { %5152 = vmatpush1.bf16.msra.mxu0 %v7945_v31  ;;  %5685 = vmatpush1.bf16.msra.mxu1 %v7948_v32  ;;  %v8043_v31 = vld [vmem:[#allocation5 + $0x1004] ss:$16 sps:$4 sm:$0xff]   ;;  %v8046_v32 = vld [vmem:[#allocation5 + $0x100c] ss:$16 sps:$4 sm:$0xff]  }
 0x21e   :  { %5153 = vmatprep.subr.bf16.mxu0 %v7953_v33  ;;  %5686 = vmatprep.subr.bf16.mxu1 %v7956_v34  ;;  %v123_v33 = vpack.c.bf16 %v98_v30, %v98_v30  ;;  %v101_v34 = vld [vmem:[#allocation2 + $0x88] sm:$0xff] }
 0x21f   :  { %5183 = vmatprep.mubr.bf16.mxu0 %v124_v35  ;;  %5716 = vmatprep.mubr.bf16.mxu1 %v124_v35  ;;  %v8041_v35 = vld [vmem:[#allocation5 + $0x1000] ss:$16 sps:$4 sm:$0xff]   ;;  %v8133_v30 = vld [vmem:[#allocation5 + $0x11e4] ss:$16 sps:$4 sm:$0xff]  }
 0x221   :  { %5154 = vmatpush1.bf16.msra.mxu0 %v7951_v36  ;;  %5687 = vmatpush1.bf16.msra.mxu1 %v7954_v37  ;;  %v8044_v36 = vld [vmem:[#allocation5 + $0x1008] ss:$16 sps:$4 sm:$0xff]   ;;  %v8049_v37 = vld [vmem:[#allocation5 + $0x1024] ss:$16 sps:$4 sm:$0xff]  }
 0x222   :  { %5155 = vmatprep.subr.bf16.mxu0 %v7959_v38  ;;  %5688 = vmatprep.subr.bf16.mxu1 %v7962_v39  ;;  %v8052_v38 = vld [vmem:[#allocation5 + $0x102c] ss:$16 sps:$4 sm:$0xff]   ;;  %v126_v39 = vpack.c.bf16 %v101_v34, %v101_v34 }
 0x223   :  { %v100_v34 = vld [vmem:[#allocation2 + $0x80] sm:$0xff] }
 0x225   :  { %5156 = vmatpush1.bf16.msra.mxu0 %v7957_v40  ;;  %5689 = vmatpush1.bf16.msra.mxu1 %v7960_v41  ;;  %v8047_v40 = vld [vmem:[#allocation5 + $0x1020] ss:$16 sps:$4 sm:$0xff]   ;;  %v8050_v41 = vld [vmem:[#allocation5 + $0x1028] ss:$16 sps:$4 sm:$0xff]  }
 0x226   :  { %5157 = vmatprep.subr.bf16.mxu0 %v7965_v42  ;;  %5690 = vmatprep.subr.bf16.mxu1 %v7968_v43  ;;  %v8055_v42 = vld [vmem:[#allocation5 + $0x1044] ss:$16 sps:$4 sm:$0xff]   ;;  %v8058_v43 = vld [vmem:[#allocation5 + $0x104c] ss:$16 sps:$4 sm:$0xff]  }
 0x229   :  { %5158 = vmatpush1.bf16.msra.mxu0 %v7963_v44  ;;  %5691 = vmatpush1.bf16.msra.mxu1 %v7966_v45  ;;  %v8053_v44 = vld [vmem:[#allocation5 + $0x1040] ss:$16 sps:$4 sm:$0xff]   ;;  %v8056_v45 = vld [vmem:[#allocation5 + $0x1048] ss:$16 sps:$4 sm:$0xff]  }
 0x22a   :  { %5159 = vmatprep.subr.bf16.mxu0 %v7971_v46  ;;  %5692 = vmatprep.subr.bf16.mxu1 %v7974_v47  ;;  %v8061_v46 = vld [vmem:[#allocation5 + $0x1064] ss:$16 sps:$4 sm:$0xff]   ;;  %v8064_v47 = vld [vmem:[#allocation5 + $0x106c] ss:$16 sps:$4 sm:$0xff]  }
 0x22d   :  { %5160 = vmatpush1.bf16.msra.mxu0 %v7969_v48  ;;  %5693 = vmatpush1.bf16.msra.mxu1 %v7972_v49  ;;  %v8059_v48 = vld [vmem:[#allocation5 + $0x1060] ss:$16 sps:$4 sm:$0xff]   ;;  %v8062_v49 = vld [vmem:[#allocation5 + $0x1068] ss:$16 sps:$4 sm:$0xff]  }
 0x22e   :  { %5161 = vmatprep.subr.bf16.mxu0 %v7977_v50  ;;  %5694 = vmatprep.subr.bf16.mxu1 %v7980_v51  ;;  %v8067_v50 = vld [vmem:[#allocation5 + $0x1084] ss:$16 sps:$4 sm:$0xff]   ;;  %v8070_v51 = vld [vmem:[#allocation5 + $0x108c] ss:$16 sps:$4 sm:$0xff]  }
 0x231   :  { %5162 = vmatpush1.bf16.msra.mxu0 %v7975_v52  ;;  %5695 = vmatpush1.bf16.msra.mxu1 %v7978_v53  ;;  %v8065_v52 = vld [vmem:[#allocation5 + $0x1080] ss:$16 sps:$4 sm:$0xff]   ;;  %v8068_v53 = vld [vmem:[#allocation5 + $0x1088] ss:$16 sps:$4 sm:$0xff]  }
 0x232   :  { %5163 = vmatprep.subr.bf16.mxu0 %v7983_v54  ;;  %5696 = vmatprep.subr.bf16.mxu1 %v7986_v55  ;;  %v8073_v54 = vld [vmem:[#allocation5 + $0x10a4] ss:$16 sps:$4 sm:$0xff]   ;;  %v8076_v55 = vld [vmem:[#allocation5 + $0x10ac] ss:$16 sps:$4 sm:$0xff]  }
 0x235   :  { %5164 = vmatpush1.bf16.msra.mxu0 %v7981_v56  ;;  %5697 = vmatpush1.bf16.msra.mxu1 %v7984_v57  ;;  %v8071_v56 = vld [vmem:[#allocation5 + $0x10a0] ss:$16 sps:$4 sm:$0xff]   ;;  %v8074_v57 = vld [vmem:[#allocation5 + $0x10a8] ss:$16 sps:$4 sm:$0xff]  }
 0x236   :  { %5165 = vmatprep.subr.bf16.mxu0 %v7989_v58  ;;  %5698 = vmatprep.subr.bf16.mxu1 %v7992_v59  ;;  %v8079_v58 = vld [vmem:[#allocation5 + $0x10c4] ss:$16 sps:$4 sm:$0xff]   ;;  %v8082_v59 = vld [vmem:[#allocation5 + $0x10cc] ss:$16 sps:$4 sm:$0xff]  }
 0x239   :  { %5166 = vmatpush1.bf16.msra.mxu0 %v7987_v60  ;;  %5699 = vmatpush1.bf16.msra.mxu1 %v7990_v61  ;;  %v8077_v60 = vld [vmem:[#allocation5 + $0x10c0] ss:$16 sps:$4 sm:$0xff]   ;;  %v8080_v61 = vld [vmem:[#allocation5 + $0x10c8] ss:$16 sps:$4 sm:$0xff]  }
 0x23a   :  { %5167 = vmatprep.subr.bf16.mxu0 %v7995_v62  ;;  %5700 = vmatprep.subr.bf16.mxu1 %v7998_v63  ;;  %v8085_v62 = vld [vmem:[#allocation5 + $0x10e4] ss:$16 sps:$4 sm:$0xff]   ;;  %v8088_v63 = vld [vmem:[#allocation5 + $0x10ec] ss:$16 sps:$4 sm:$0xff]  }
 0x23d   :  { %5168 = vmatpush1.bf16.msra.mxu0 %v7993_v0  ;;  %5701 = vmatpush1.bf16.msra.mxu1 %v7996_v1  ;;  %v8083_v0 = vld [vmem:[#allocation5 + $0x10e0] ss:$16 sps:$4 sm:$0xff]   ;;  %v8086_v1 = vld [vmem:[#allocation5 + $0x10e8] ss:$16 sps:$4 sm:$0xff]  }
 0x23e   :  { %5169 = vmatprep.subr.bf16.mxu0 %v8001_v2  ;;  %5702 = vmatprep.subr.bf16.mxu1 %v8004_v3  ;;  %v8091_v2 = vld [vmem:[#allocation5 + $0x1104] ss:$16 sps:$4 sm:$0xff]   ;;  %v8094_v3 = vld [vmem:[#allocation5 + $0x110c] ss:$16 sps:$4 sm:$0xff]  }
 0x241   :  { %5170 = vmatpush1.bf16.msra.mxu0 %v7999_v4  ;;  %5703 = vmatpush1.bf16.msra.mxu1 %v8002_v5  ;;  %v8089_v4 = vld [vmem:[#allocation5 + $0x1100] ss:$16 sps:$4 sm:$0xff]   ;;  %v8092_v5 = vld [vmem:[#allocation5 + $0x1108] ss:$16 sps:$4 sm:$0xff]  }
 0x242   :  { %5171 = vmatprep.subr.bf16.mxu0 %v8007_v6  ;;  %5704 = vmatprep.subr.bf16.mxu1 %v8010_v7  ;;  %v8097_v6 = vld [vmem:[#allocation5 + $0x1124] ss:$16 sps:$4 sm:$0xff]   ;;  %v8100_v7 = vld [vmem:[#allocation5 + $0x112c] ss:$16 sps:$4 sm:$0xff]  }
 0x245   :  { %5172 = vmatpush1.bf16.msra.mxu0 %v8005_v8  ;;  %5705 = vmatpush1.bf16.msra.mxu1 %v8008_v9  ;;  %v8095_v8 = vld [vmem:[#allocation5 + $0x1120] ss:$16 sps:$4 sm:$0xff]   ;;  %v8098_v9 = vld [vmem:[#allocation5 + $0x1128] ss:$16 sps:$4 sm:$0xff]  }
 0x246   :  { %5173 = vmatprep.subr.bf16.mxu0 %v8013_v10  ;;  %5706 = vmatprep.subr.bf16.mxu1 %v8016_v11  ;;  %v8103_v10 = vld [vmem:[#allocation5 + $0x1144] ss:$16 sps:$4 sm:$0xff]   ;;  %v8106_v11 = vld [vmem:[#allocation5 + $0x114c] ss:$16 sps:$4 sm:$0xff]  }
 0x249   :  { %5174 = vmatpush1.bf16.msra.mxu0 %v8011_v12  ;;  %5707 = vmatpush1.bf16.msra.mxu1 %v8014_v13  ;;  %v8101_v12 = vld [vmem:[#allocation5 + $0x1140] ss:$16 sps:$4 sm:$0xff]   ;;  %v8104_v13 = vld [vmem:[#allocation5 + $0x1148] ss:$16 sps:$4 sm:$0xff]  }
 0x24a   :  { %5175 = vmatprep.subr.bf16.mxu0 %v8019_v14  ;;  %5708 = vmatprep.subr.bf16.mxu1 %v8022_v15  ;;  %v8109_v14 = vld [vmem:[#allocation5 + $0x1164] ss:$16 sps:$4 sm:$0xff]   ;;  %v8112_v15 = vld [vmem:[#allocation5 + $0x116c] ss:$16 sps:$4 sm:$0xff]  }
 0x24d   :  { %5176 = vmatpush1.bf16.msra.mxu0 %v8017_v16  ;;  %5709 = vmatpush1.bf16.msra.mxu1 %v8020_v17  ;;  %v8107_v16 = vld [vmem:[#allocation5 + $0x1160] ss:$16 sps:$4 sm:$0xff]   ;;  %v8110_v17 = vld [vmem:[#allocation5 + $0x1168] ss:$16 sps:$4 sm:$0xff]  }
 0x24e   :  { %5177 = vmatprep.subr.bf16.mxu0 %v8025_v18  ;;  %5710 = vmatprep.subr.bf16.mxu1 %v8028_v19  ;;  %v8115_v18 = vld [vmem:[#allocation5 + $0x1184] ss:$16 sps:$4 sm:$0xff]   ;;  %v8118_v19 = vld [vmem:[#allocation5 + $0x118c] ss:$16 sps:$4 sm:$0xff]  }
 0x251   :  { %5178 = vmatpush1.bf16.msra.mxu0 %v8023_v20  ;;  %5711 = vmatpush1.bf16.msra.mxu1 %v8026_v21  ;;  %v8113_v20 = vld [vmem:[#allocation5 + $0x1180] ss:$16 sps:$4 sm:$0xff]   ;;  %v8116_v21 = vld [vmem:[#allocation5 + $0x1188] ss:$16 sps:$4 sm:$0xff]  }
 0x252   :  { %5179 = vmatprep.subr.bf16.mxu0 %v8031_v22  ;;  %5712 = vmatprep.subr.bf16.mxu1 %v8034_v23  ;;  %v8121_v22 = vld [vmem:[#allocation5 + $0x11a4] ss:$16 sps:$4 sm:$0xff]   ;;  %v8124_v23 = vld [vmem:[#allocation5 + $0x11ac] ss:$16 sps:$4 sm:$0xff]  }
 0x255   :  { %5180 = vmatpush1.bf16.msra.mxu0 %v8029_v24  ;;  %5713 = vmatpush1.bf16.msra.mxu1 %v8032_v25  ;;  %v8119_v24 = vld [vmem:[#allocation5 + $0x11a0] ss:$16 sps:$4 sm:$0xff]   ;;  %v8122_v25 = vld [vmem:[#allocation5 + $0x11a8] ss:$16 sps:$4 sm:$0xff]  }
 0x256   :  { %5181 = vmatprep.subr.bf16.mxu0 %v8037_v26  ;;  %5714 = vmatprep.subr.bf16.mxu1 %v8040_v27  ;;  %v8127_v26 = vld [vmem:[#allocation5 + $0x11c4] ss:$16 sps:$4 sm:$0xff]   ;;  %v8130_v27 = vld [vmem:[#allocation5 + $0x11cc] ss:$16 sps:$4 sm:$0xff]  }
 0x259   :  { %5182 = vmatpush1.bf16.msra.mxu0 %v8035_v28  ;;  %5715 = vmatpush1.bf16.msra.mxu1 %v8038_v29  ;;  %v8125_v28 = vld [vmem:[#allocation5 + $0x11c0] ss:$16 sps:$4 sm:$0xff]   ;;  %v8128_v29 = vld [vmem:[#allocation5 + $0x11c8] ss:$16 sps:$4 sm:$0xff]  }
 0x25a   :  { %5192 = vmatprep.subr.bf16.mxu0 %v8043_v31  ;;  %5725 = vmatprep.subr.bf16.mxu1 %v8046_v32  ;;  %v8136_v31 = vld [vmem:[#allocation5 + $0x11ec] ss:$16 sps:$4 sm:$0xff]   ;;  %v8131_v32 = vld [vmem:[#allocation5 + $0x11e0] ss:$16 sps:$4 sm:$0xff]  }
 0x25c   :  { %5184 = vmatmul.mubr.bf16.vlgmr.msra.gmra.mrb[0].mxu0 %v123_v33  ;;  %5717 = vmatmul.mubr.bf16.vlgmr.msra.gmra.mrb[0].mxu1 %v123_v33  ;;  %v8134_v33 = vld [vmem:[#allocation5 + $0x11e8] ss:$16 sps:$4 sm:$0xff]  }
 0x25d   :  { %5193 = vmatpush1.bf16.msra.mxu0 %v8041_v35  ;;  %5726 = vmatpush1.bf16.msra.mxu1 %v8044_v36  ;;  %v8139_v35 = vld [vmem:[#allocation5 + $0x1204] ss:$16 sps:$4 sm:$0xff]   ;;  %v8142_v36 = vld [vmem:[#allocation5 + $0x120c] ss:$16 sps:$4 sm:$0xff]  }
 0x25e   :  { %5194 = vmatprep.subr.bf16.mxu0 %v8049_v37  ;;  %5727 = vmatprep.subr.bf16.mxu1 %v8052_v38  ;;  %v125_v37 = vpack.c.bf16 %v100_v34, %v100_v34  ;;  %v103_v38 = vld [vmem:[#allocation2 + $0x98] sm:$0xff] }
 0x25f   :  { %5224 = vmatprep.mubr.bf16.mxu0 %v126_v39  ;;  %5757 = vmatprep.mubr.bf16.mxu1 %v126_v39  ;;  %v8137_v39 = vld [vmem:[#allocation5 + $0x1200] ss:$16 sps:$4 sm:$0xff]   ;;  %v8229_v34 = vld [vmem:[#allocation5 + $0x13e4] ss:$16 sps:$4 sm:$0xff]  }
 0x261   :  { %5195 = vmatpush1.bf16.msra.mxu0 %v8047_v40  ;;  %5728 = vmatpush1.bf16.msra.mxu1 %v8050_v41  ;;  %v8140_v40 = vld [vmem:[#allocation5 + $0x1208] ss:$16 sps:$4 sm:$0xff]   ;;  %v8145_v41 = vld [vmem:[#allocation5 + $0x1224] ss:$16 sps:$4 sm:$0xff]  }
 0x262   :  { %5196 = vmatprep.subr.bf16.mxu0 %v8055_v42  ;;  %5729 = vmatprep.subr.bf16.mxu1 %v8058_v43  ;;  %v8148_v42 = vld [vmem:[#allocation5 + $0x122c] ss:$16 sps:$4 sm:$0xff]   ;;  %v128_v43 = vpack.c.bf16 %v103_v38, %v103_v38 }
 0x263   :  { %v102_v38 = vld [vmem:[#allocation2 + $0x90] sm:$0xff] }
 0x265   :  { %5197 = vmatpush1.bf16.msra.mxu0 %v8053_v44  ;;  %5730 = vmatpush1.bf16.msra.mxu1 %v8056_v45  ;;  %v8143_v44 = vld [vmem:[#allocation5 + $0x1220] ss:$16 sps:$4 sm:$0xff]   ;;  %v8146_v45 = vld [vmem:[#allocation5 + $0x1228] ss:$16 sps:$4 sm:$0xff]  }
 0x266   :  { %5198 = vmatprep.subr.bf16.mxu0 %v8061_v46  ;;  %5731 = vmatprep.subr.bf16.mxu1 %v8064_v47  ;;  %v8151_v46 = vld [vmem:[#allocation5 + $0x1244] ss:$16 sps:$4 sm:$0xff]   ;;  %v8154_v47 = vld [vmem:[#allocation5 + $0x124c] ss:$16 sps:$4 sm:$0xff]  }
 0x269   :  { %5199 = vmatpush1.bf16.msra.mxu0 %v8059_v48  ;;  %5732 = vmatpush1.bf16.msra.mxu1 %v8062_v49  ;;  %v8149_v48 = vld [vmem:[#allocation5 + $0x1240] ss:$16 sps:$4 sm:$0xff]   ;;  %v8152_v49 = vld [vmem:[#allocation5 + $0x1248] ss:$16 sps:$4 sm:$0xff]  }
 0x26a   :  { %5200 = vmatprep.subr.bf16.mxu0 %v8067_v50  ;;  %5733 = vmatprep.subr.bf16.mxu1 %v8070_v51  ;;  %v8157_v50 = vld [vmem:[#allocation5 + $0x1264] ss:$16 sps:$4 sm:$0xff]   ;;  %v8160_v51 = vld [vmem:[#allocation5 + $0x126c] ss:$16 sps:$4 sm:$0xff]  }
 0x26d   :  { %5201 = vmatpush1.bf16.msra.mxu0 %v8065_v52  ;;  %5734 = vmatpush1.bf16.msra.mxu1 %v8068_v53  ;;  %v8155_v52 = vld [vmem:[#allocation5 + $0x1260] ss:$16 sps:$4 sm:$0xff]   ;;  %v8158_v53 = vld [vmem:[#allocation5 + $0x1268] ss:$16 sps:$4 sm:$0xff]  }
 0x26e   :  { %5202 = vmatprep.subr.bf16.mxu0 %v8073_v54  ;;  %5735 = vmatprep.subr.bf16.mxu1 %v8076_v55  ;;  %v8163_v54 = vld [vmem:[#allocation5 + $0x1284] ss:$16 sps:$4 sm:$0xff]   ;;  %v8166_v55 = vld [vmem:[#allocation5 + $0x128c] ss:$16 sps:$4 sm:$0xff]  }
 0x271   :  { %5203 = vmatpush1.bf16.msra.mxu0 %v8071_v56  ;;  %5736 = vmatpush1.bf16.msra.mxu1 %v8074_v57  ;;  %v8161_v56 = vld [vmem:[#allocation5 + $0x1280] ss:$16 sps:$4 sm:$0xff]   ;;  %v8164_v57 = vld [vmem:[#allocation5 + $0x1288] ss:$16 sps:$4 sm:$0xff]  }
 0x272   :  { %5204 = vmatprep.subr.bf16.mxu0 %v8079_v58  ;;  %5737 = vmatprep.subr.bf16.mxu1 %v8082_v59  ;;  %v8169_v58 = vld [vmem:[#allocation5 + $0x12a4] ss:$16 sps:$4 sm:$0xff]   ;;  %v8172_v59 = vld [vmem:[#allocation5 + $0x12ac] ss:$16 sps:$4 sm:$0xff]  }
 0x275   :  { %5205 = vmatpush1.bf16.msra.mxu0 %v8077_v60  ;;  %5738 = vmatpush1.bf16.msra.mxu1 %v8080_v61  ;;  %v8167_v60 = vld [vmem:[#allocation5 + $0x12a0] ss:$16 sps:$4 sm:$0xff]   ;;  %v8170_v61 = vld [vmem:[#allocation5 + $0x12a8] ss:$16 sps:$4 sm:$0xff]  }
 0x276   :  { %5206 = vmatprep.subr.bf16.mxu0 %v8085_v62  ;;  %5739 = vmatprep.subr.bf16.mxu1 %v8088_v63  ;;  %v8175_v62 = vld [vmem:[#allocation5 + $0x12c4] ss:$16 sps:$4 sm:$0xff]   ;;  %v8178_v63 = vld [vmem:[#allocation5 + $0x12cc] ss:$16 sps:$4 sm:$0xff]  }
 0x279   :  { %5207 = vmatpush1.bf16.msra.mxu0 %v8083_v0  ;;  %5740 = vmatpush1.bf16.msra.mxu1 %v8086_v1  ;;  %v8173_v0 = vld [vmem:[#allocation5 + $0x12c0] ss:$16 sps:$4 sm:$0xff]   ;;  %v8176_v1 = vld [vmem:[#allocation5 + $0x12c8] ss:$16 sps:$4 sm:$0xff]  }
 0x27a   :  { %5208 = vmatprep.subr.bf16.mxu0 %v8091_v2  ;;  %5741 = vmatprep.subr.bf16.mxu1 %v8094_v3  ;;  %v8181_v2 = vld [vmem:[#allocation5 + $0x12e4] ss:$16 sps:$4 sm:$0xff]   ;;  %v8184_v3 = vld [vmem:[#allocation5 + $0x12ec] ss:$16 sps:$4 sm:$0xff]  }
 0x27d   :  { %5209 = vmatpush1.bf16.msra.mxu0 %v8089_v4  ;;  %5742 = vmatpush1.bf16.msra.mxu1 %v8092_v5  ;;  %v8179_v4 = vld [vmem:[#allocation5 + $0x12e0] ss:$16 sps:$4 sm:$0xff]   ;;  %v8182_v5 = vld [vmem:[#allocation5 + $0x12e8] ss:$16 sps:$4 sm:$0xff]  }
 0x27e   :  { %5210 = vmatprep.subr.bf16.mxu0 %v8097_v6  ;;  %5743 = vmatprep.subr.bf16.mxu1 %v8100_v7  ;;  %v8187_v6 = vld [vmem:[#allocation5 + $0x1304] ss:$16 sps:$4 sm:$0xff]   ;;  %v8190_v7 = vld [vmem:[#allocation5 + $0x130c] ss:$16 sps:$4 sm:$0xff]  }
 0x281   :  { %5211 = vmatpush1.bf16.msra.mxu0 %v8095_v8  ;;  %5744 = vmatpush1.bf16.msra.mxu1 %v8098_v9  ;;  %v8185_v8 = vld [vmem:[#allocation5 + $0x1300] ss:$16 sps:$4 sm:$0xff]   ;;  %v8188_v9 = vld [vmem:[#allocation5 + $0x1308] ss:$16 sps:$4 sm:$0xff]  }
 0x282   :  { %5212 = vmatprep.subr.bf16.mxu0 %v8103_v10  ;;  %5745 = vmatprep.subr.bf16.mxu1 %v8106_v11  ;;  %v8193_v10 = vld [vmem:[#allocation5 + $0x1324] ss:$16 sps:$4 sm:$0xff]   ;;  %v8196_v11 = vld [vmem:[#allocation5 + $0x132c] ss:$16 sps:$4 sm:$0xff]  }
 0x285   :  { %5213 = vmatpush1.bf16.msra.mxu0 %v8101_v12  ;;  %5746 = vmatpush1.bf16.msra.mxu1 %v8104_v13  ;;  %v8191_v12 = vld [vmem:[#allocation5 + $0x1320] ss:$16 sps:$4 sm:$0xff]   ;;  %v8194_v13 = vld [vmem:[#allocation5 + $0x1328] ss:$16 sps:$4 sm:$0xff]  }
 0x286   :  { %5214 = vmatprep.subr.bf16.mxu0 %v8109_v14  ;;  %5747 = vmatprep.subr.bf16.mxu1 %v8112_v15  ;;  %v8199_v14 = vld [vmem:[#allocation5 + $0x1344] ss:$16 sps:$4 sm:$0xff]   ;;  %v8202_v15 = vld [vmem:[#allocation5 + $0x134c] ss:$16 sps:$4 sm:$0xff]  }
 0x289   :  { %5215 = vmatpush1.bf16.msra.mxu0 %v8107_v16  ;;  %5748 = vmatpush1.bf16.msra.mxu1 %v8110_v17  ;;  %v8197_v16 = vld [vmem:[#allocation5 + $0x1340] ss:$16 sps:$4 sm:$0xff]   ;;  %v8200_v17 = vld [vmem:[#allocation5 + $0x1348] ss:$16 sps:$4 sm:$0xff]  }
 0x28a   :  { %5216 = vmatprep.subr.bf16.mxu0 %v8115_v18  ;;  %5749 = vmatprep.subr.bf16.mxu1 %v8118_v19  ;;  %v8205_v18 = vld [vmem:[#allocation5 + $0x1364] ss:$16 sps:$4 sm:$0xff]   ;;  %v8208_v19 = vld [vmem:[#allocation5 + $0x136c] ss:$16 sps:$4 sm:$0xff]  }
 0x28d   :  { %5217 = vmatpush1.bf16.msra.mxu0 %v8113_v20  ;;  %5750 = vmatpush1.bf16.msra.mxu1 %v8116_v21  ;;  %v8203_v20 = vld [vmem:[#allocation5 + $0x1360] ss:$16 sps:$4 sm:$0xff]   ;;  %v8206_v21 = vld [vmem:[#allocation5 + $0x1368] ss:$16 sps:$4 sm:$0xff]  }
 0x28e   :  { %5218 = vmatprep.subr.bf16.mxu0 %v8121_v22  ;;  %5751 = vmatprep.subr.bf16.mxu1 %v8124_v23  ;;  %v8211_v22 = vld [vmem:[#allocation5 + $0x1384] ss:$16 sps:$4 sm:$0xff]   ;;  %v8214_v23 = vld [vmem:[#allocation5 + $0x138c] ss:$16 sps:$4 sm:$0xff]  }
 0x291   :  { %5219 = vmatpush1.bf16.msra.mxu0 %v8119_v24  ;;  %5752 = vmatpush1.bf16.msra.mxu1 %v8122_v25  ;;  %v8209_v24 = vld [vmem:[#allocation5 + $0x1380] ss:$16 sps:$4 sm:$0xff]   ;;  %v8212_v25 = vld [vmem:[#allocation5 + $0x1388] ss:$16 sps:$4 sm:$0xff]  }
 0x292   :  { %5220 = vmatprep.subr.bf16.mxu0 %v8127_v26  ;;  %5753 = vmatprep.subr.bf16.mxu1 %v8130_v27  ;;  %v8217_v26 = vld [vmem:[#allocation5 + $0x13a4] ss:$16 sps:$4 sm:$0xff]   ;;  %v8220_v27 = vld [vmem:[#allocation5 + $0x13ac] ss:$16 sps:$4 sm:$0xff]  }
 0x295   :  { %5221 = vmatpush1.bf16.msra.mxu0 %v8125_v28  ;;  %5754 = vmatpush1.bf16.msra.mxu1 %v8128_v29  ;;  %v8215_v28 = vld [vmem:[#allocation5 + $0x13a0] ss:$16 sps:$4 sm:$0xff]   ;;  %v8218_v29 = vld [vmem:[#allocation5 + $0x13a8] ss:$16 sps:$4 sm:$0xff]  }
 0x296   :  { %5222 = vmatprep.subr.bf16.mxu0 %v8133_v30  ;;  %5755 = vmatprep.subr.bf16.mxu1 %v8136_v31  ;;  %v8223_v30 = vld [vmem:[#allocation5 + $0x13c4] ss:$16 sps:$4 sm:$0xff]   ;;  %v8226_v31 = vld [vmem:[#allocation5 + $0x13cc] ss:$16 sps:$4 sm:$0xff]  }
 0x299   :  { %5223 = vmatpush1.bf16.msra.mxu0 %v8131_v32  ;;  %5756 = vmatpush1.bf16.msra.mxu1 %v8134_v33  ;;  %v8221_v32 = vld [vmem:[#allocation5 + $0x13c0] ss:$16 sps:$4 sm:$0xff]   ;;  %v8224_v33 = vld [vmem:[#allocation5 + $0x13c8] ss:$16 sps:$4 sm:$0xff]  }
 0x29a   :  { %5233 = vmatprep.subr.bf16.mxu0 %v8139_v35  ;;  %5766 = vmatprep.subr.bf16.mxu1 %v8142_v36  ;;  %v8232_v35 = vld [vmem:[#allocation5 + $0x13ec] ss:$16 sps:$4 sm:$0xff]   ;;  %v8227_v36 = vld [vmem:[#allocation5 + $0x13e0] ss:$16 sps:$4 sm:$0xff]  }
 0x29c   :  { %5225 = vmatmul.mubr.bf16.vlgmr.msra.gmra.mrb[0].mxu0 %v125_v37  ;;  %5758 = vmatmul.mubr.bf16.vlgmr.msra.gmra.mrb[0].mxu1 %v125_v37  ;;  %v8230_v37 = vld [vmem:[#allocation5 + $0x13e8] ss:$16 sps:$4 sm:$0xff]  }
 0x29d   :  { %5234 = vmatpush1.bf16.msra.mxu0 %v8137_v39  ;;  %5767 = vmatpush1.bf16.msra.mxu1 %v8140_v40  ;;  %v8235_v39 = vld [vmem:[#allocation5 + $0x1404] ss:$16 sps:$4 sm:$0xff]   ;;  %v8238_v40 = vld [vmem:[#allocation5 + $0x140c] ss:$16 sps:$4 sm:$0xff]  }
 0x29e   :  { %5235 = vmatprep.subr.bf16.mxu0 %v8145_v41  ;;  %5768 = vmatprep.subr.bf16.mxu1 %v8148_v42  ;;  %v127_v41 = vpack.c.bf16 %v102_v38, %v102_v38  ;;  %v105_v42 = vld [vmem:[#allocation2 + $0xa8] sm:$0xff] }
 0x29f   :  { %5265 = vmatprep.mubr.bf16.mxu0 %v128_v43  ;;  %5798 = vmatprep.mubr.bf16.mxu1 %v128_v43  ;;  %v8233_v43 = vld [vmem:[#allocation5 + $0x1400] ss:$16 sps:$4 sm:$0xff]   ;;  %v8325_v38 = vld [vmem:[#allocation5 + $0x15e4] ss:$16 sps:$4 sm:$0xff]  }
 0x2a1   :  { %5236 = vmatpush1.bf16.msra.mxu0 %v8143_v44  ;;  %5769 = vmatpush1.bf16.msra.mxu1 %v8146_v45  ;;  %v8236_v44 = vld [vmem:[#allocation5 + $0x1408] ss:$16 sps:$4 sm:$0xff]   ;;  %v8241_v45 = vld [vmem:[#allocation5 + $0x1424] ss:$16 sps:$4 sm:$0xff]  }
 0x2a2   :  { %5237 = vmatprep.subr.bf16.mxu0 %v8151_v46  ;;  %5770 = vmatprep.subr.bf16.mxu1 %v8154_v47  ;;  %v8244_v46 = vld [vmem:[#allocation5 + $0x142c] ss:$16 sps:$4 sm:$0xff]   ;;  %v130_v47 = vpack.c.bf16 %v105_v42, %v105_v42 }
 0x2a3   :  { %v104_v42 = vld [vmem:[#allocation2 + $0xa0] sm:$0xff] }
 0x2a5   :  { %5238 = vmatpush1.bf16.msra.mxu0 %v8149_v48  ;;  %5771 = vmatpush1.bf16.msra.mxu1 %v8152_v49  ;;  %v8239_v48 = vld [vmem:[#allocation5 + $0x1420] ss:$16 sps:$4 sm:$0xff]   ;;  %v8242_v49 = vld [vmem:[#allocation5 + $0x1428] ss:$16 sps:$4 sm:$0xff]  }
 0x2a6   :  { %5239 = vmatprep.subr.bf16.mxu0 %v8157_v50  ;;  %5772 = vmatprep.subr.bf16.mxu1 %v8160_v51  ;;  %v8247_v50 = vld [vmem:[#allocation5 + $0x1444] ss:$16 sps:$4 sm:$0xff]   ;;  %v8250_v51 = vld [vmem:[#allocation5 + $0x144c] ss:$16 sps:$4 sm:$0xff]  }
 0x2a9   :  { %5240 = vmatpush1.bf16.msra.mxu0 %v8155_v52  ;;  %5773 = vmatpush1.bf16.msra.mxu1 %v8158_v53  ;;  %v8245_v52 = vld [vmem:[#allocation5 + $0x1440] ss:$16 sps:$4 sm:$0xff]   ;;  %v8248_v53 = vld [vmem:[#allocation5 + $0x1448] ss:$16 sps:$4 sm:$0xff]  }
 0x2aa   :  { %5241 = vmatprep.subr.bf16.mxu0 %v8163_v54  ;;  %5774 = vmatprep.subr.bf16.mxu1 %v8166_v55  ;;  %v8253_v54 = vld [vmem:[#allocation5 + $0x1464] ss:$16 sps:$4 sm:$0xff]   ;;  %v8256_v55 = vld [vmem:[#allocation5 + $0x146c] ss:$16 sps:$4 sm:$0xff]  }
 0x2ad   :  { %5242 = vmatpush1.bf16.msra.mxu0 %v8161_v56  ;;  %5775 = vmatpush1.bf16.msra.mxu1 %v8164_v57  ;;  %v8251_v56 = vld [vmem:[#allocation5 + $0x1460] ss:$16 sps:$4 sm:$0xff]   ;;  %v8254_v57 = vld [vmem:[#allocation5 + $0x1468] ss:$16 sps:$4 sm:$0xff]  }
 0x2ae   :  { %5243 = vmatprep.subr.bf16.mxu0 %v8169_v58  ;;  %5776 = vmatprep.subr.bf16.mxu1 %v8172_v59  ;;  %v8259_v58 = vld [vmem:[#allocation5 + $0x1484] ss:$16 sps:$4 sm:$0xff]   ;;  %v8262_v59 = vld [vmem:[#allocation5 + $0x148c] ss:$16 sps:$4 sm:$0xff]  }
 0x2b1   :  { %5244 = vmatpush1.bf16.msra.mxu0 %v8167_v60  ;;  %5777 = vmatpush1.bf16.msra.mxu1 %v8170_v61  ;;  %v8257_v60 = vld [vmem:[#allocation5 + $0x1480] ss:$16 sps:$4 sm:$0xff]   ;;  %v8260_v61 = vld [vmem:[#allocation5 + $0x1488] ss:$16 sps:$4 sm:$0xff]  }
 0x2b2   :  { %5245 = vmatprep.subr.bf16.mxu0 %v8175_v62  ;;  %5778 = vmatprep.subr.bf16.mxu1 %v8178_v63  ;;  %v8265_v62 = vld [vmem:[#allocation5 + $0x14a4] ss:$16 sps:$4 sm:$0xff]   ;;  %v8268_v63 = vld [vmem:[#allocation5 + $0x14ac] ss:$16 sps:$4 sm:$0xff]  }
 0x2b5   :  { %5246 = vmatpush1.bf16.msra.mxu0 %v8173_v0  ;;  %5779 = vmatpush1.bf16.msra.mxu1 %v8176_v1  ;;  %v8263_v0 = vld [vmem:[#allocation5 + $0x14a0] ss:$16 sps:$4 sm:$0xff]   ;;  %v8266_v1 = vld [vmem:[#allocation5 + $0x14a8] ss:$16 sps:$4 sm:$0xff]  }
 0x2b6   :  { %5247 = vmatprep.subr.bf16.mxu0 %v8181_v2  ;;  %5780 = vmatprep.subr.bf16.mxu1 %v8184_v3  ;;  %v8271_v2 = vld [vmem:[#allocation5 + $0x14c4] ss:$16 sps:$4 sm:$0xff]   ;;  %v8274_v3 = vld [vmem:[#allocation5 + $0x14cc] ss:$16 sps:$4 sm:$0xff]  }
 0x2b9   :  { %5248 = vmatpush1.bf16.msra.mxu0 %v8179_v4  ;;  %5781 = vmatpush1.bf16.msra.mxu1 %v8182_v5  ;;  %v8269_v4 = vld [vmem:[#allocation5 + $0x14c0] ss:$16 sps:$4 sm:$0xff]   ;;  %v8272_v5 = vld [vmem:[#allocation5 + $0x14c8] ss:$16 sps:$4 sm:$0xff]  }
 0x2ba   :  { %5249 = vmatprep.subr.bf16.mxu0 %v8187_v6  ;;  %5782 = vmatprep.subr.bf16.mxu1 %v8190_v7  ;;  %v8277_v6 = vld [vmem:[#allocation5 + $0x14e4] ss:$16 sps:$4 sm:$0xff]   ;;  %v8280_v7 = vld [vmem:[#allocation5 + $0x14ec] ss:$16 sps:$4 sm:$0xff]  }
 0x2bd   :  { %5250 = vmatpush1.bf16.msra.mxu0 %v8185_v8  ;;  %5783 = vmatpush1.bf16.msra.mxu1 %v8188_v9  ;;  %v8275_v8 = vld [vmem:[#allocation5 + $0x14e0] ss:$16 sps:$4 sm:$0xff]   ;;  %v8278_v9 = vld [vmem:[#allocation5 + $0x14e8] ss:$16 sps:$4 sm:$0xff]  }
 0x2be   :  { %5251 = vmatprep.subr.bf16.mxu0 %v8193_v10  ;;  %5784 = vmatprep.subr.bf16.mxu1 %v8196_v11  ;;  %v8283_v10 = vld [vmem:[#allocation5 + $0x1504] ss:$16 sps:$4 sm:$0xff]   ;;  %v8286_v11 = vld [vmem:[#allocation5 + $0x150c] ss:$16 sps:$4 sm:$0xff]  }
 0x2c1   :  { %5252 = vmatpush1.bf16.msra.mxu0 %v8191_v12  ;;  %5785 = vmatpush1.bf16.msra.mxu1 %v8194_v13  ;;  %v8281_v12 = vld [vmem:[#allocation5 + $0x1500] ss:$16 sps:$4 sm:$0xff]   ;;  %v8284_v13 = vld [vmem:[#allocation5 + $0x1508] ss:$16 sps:$4 sm:$0xff]  }
 0x2c2   :  { %5253 = vmatprep.subr.bf16.mxu0 %v8199_v14  ;;  %5786 = vmatprep.subr.bf16.mxu1 %v8202_v15  ;;  %v8289_v14 = vld [vmem:[#allocation5 + $0x1524] ss:$16 sps:$4 sm:$0xff]   ;;  %v8292_v15 = vld [vmem:[#allocation5 + $0x152c] ss:$16 sps:$4 sm:$0xff]  }
 0x2c5   :  { %5254 = vmatpush1.bf16.msra.mxu0 %v8197_v16  ;;  %5787 = vmatpush1.bf16.msra.mxu1 %v8200_v17  ;;  %v8287_v16 = vld [vmem:[#allocation5 + $0x1520] ss:$16 sps:$4 sm:$0xff]   ;;  %v8290_v17 = vld [vmem:[#allocation5 + $0x1528] ss:$16 sps:$4 sm:$0xff]  }
 0x2c6   :  { %5255 = vmatprep.subr.bf16.mxu0 %v8205_v18  ;;  %5788 = vmatprep.subr.bf16.mxu1 %v8208_v19  ;;  %v8295_v18 = vld [vmem:[#allocation5 + $0x1544] ss:$16 sps:$4 sm:$0xff]   ;;  %v8298_v19 = vld [vmem:[#allocation5 + $0x154c] ss:$16 sps:$4 sm:$0xff]  }
 0x2c9   :  { %5256 = vmatpush1.bf16.msra.mxu0 %v8203_v20  ;;  %5789 = vmatpush1.bf16.msra.mxu1 %v8206_v21  ;;  %v8293_v20 = vld [vmem:[#allocation5 + $0x1540] ss:$16 sps:$4 sm:$0xff]   ;;  %v8296_v21 = vld [vmem:[#allocation5 + $0x1548] ss:$16 sps:$4 sm:$0xff]  }
 0x2ca   :  { %5257 = vmatprep.subr.bf16.mxu0 %v8211_v22  ;;  %5790 = vmatprep.subr.bf16.mxu1 %v8214_v23  ;;  %v8301_v22 = vld [vmem:[#allocation5 + $0x1564] ss:$16 sps:$4 sm:$0xff]   ;;  %v8304_v23 = vld [vmem:[#allocation5 + $0x156c] ss:$16 sps:$4 sm:$0xff]  }
 0x2cd   :  { %5258 = vmatpush1.bf16.msra.mxu0 %v8209_v24  ;;  %5791 = vmatpush1.bf16.msra.mxu1 %v8212_v25  ;;  %v8299_v24 = vld [vmem:[#allocation5 + $0x1560] ss:$16 sps:$4 sm:$0xff]   ;;  %v8302_v25 = vld [vmem:[#allocation5 + $0x1568] ss:$16 sps:$4 sm:$0xff]  }
 0x2ce   :  { %5259 = vmatprep.subr.bf16.mxu0 %v8217_v26  ;;  %5792 = vmatprep.subr.bf16.mxu1 %v8220_v27  ;;  %v8307_v26 = vld [vmem:[#allocation5 + $0x1584] ss:$16 sps:$4 sm:$0xff]   ;;  %v8310_v27 = vld [vmem:[#allocation5 + $0x158c] ss:$16 sps:$4 sm:$0xff]  }
 0x2d1   :  { %5260 = vmatpush1.bf16.msra.mxu0 %v8215_v28  ;;  %5793 = vmatpush1.bf16.msra.mxu1 %v8218_v29  ;;  %v8305_v28 = vld [vmem:[#allocation5 + $0x1580] ss:$16 sps:$4 sm:$0xff]   ;;  %v8308_v29 = vld [vmem:[#allocation5 + $0x1588] ss:$16 sps:$4 sm:$0xff]  }
 0x2d2   :  { %5261 = vmatprep.subr.bf16.mxu0 %v8223_v30  ;;  %5794 = vmatprep.subr.bf16.mxu1 %v8226_v31  ;;  %v8313_v30 = vld [vmem:[#allocation5 + $0x15a4] ss:$16 sps:$4 sm:$0xff]   ;;  %v8316_v31 = vld [vmem:[#allocation5 + $0x15ac] ss:$16 sps:$4 sm:$0xff]  }
 0x2d5   :  { %5262 = vmatpush1.bf16.msra.mxu0 %v8221_v32  ;;  %5795 = vmatpush1.bf16.msra.mxu1 %v8224_v33  ;;  %v8311_v32 = vld [vmem:[#allocation5 + $0x15a0] ss:$16 sps:$4 sm:$0xff]   ;;  %v8314_v33 = vld [vmem:[#allocation5 + $0x15a8] ss:$16 sps:$4 sm:$0xff]  }
 0x2d6   :  { %5263 = vmatprep.subr.bf16.mxu0 %v8229_v34  ;;  %5796 = vmatprep.subr.bf16.mxu1 %v8232_v35  ;;  %v8319_v34 = vld [vmem:[#allocation5 + $0x15c4] ss:$16 sps:$4 sm:$0xff]   ;;  %v8322_v35 = vld [vmem:[#allocation5 + $0x15cc] ss:$16 sps:$4 sm:$0xff]  }
 0x2d9   :  { %5264 = vmatpush1.bf16.msra.mxu0 %v8227_v36  ;;  %5797 = vmatpush1.bf16.msra.mxu1 %v8230_v37  ;;  %v8317_v36 = vld [vmem:[#allocation5 + $0x15c0] ss:$16 sps:$4 sm:$0xff]   ;;  %v8320_v37 = vld [vmem:[#allocation5 + $0x15c8] ss:$16 sps:$4 sm:$0xff]  }
 0x2da   :  { %5274 = vmatprep.subr.bf16.mxu0 %v8235_v39  ;;  %5807 = vmatprep.subr.bf16.mxu1 %v8238_v40  ;;  %v8328_v39 = vld [vmem:[#allocation5 + $0x15ec] ss:$16 sps:$4 sm:$0xff]   ;;  %v8323_v40 = vld [vmem:[#allocation5 + $0x15e0] ss:$16 sps:$4 sm:$0xff]  }
 0x2dc   :  { %5266 = vmatmul.mubr.bf16.vlgmr.msra.gmra.mrb[0].mxu0 %v127_v41  ;;  %5799 = vmatmul.mubr.bf16.vlgmr.msra.gmra.mrb[0].mxu1 %v127_v41  ;;  %v8326_v41 = vld [vmem:[#allocation5 + $0x15e8] ss:$16 sps:$4 sm:$0xff]  }
 0x2dd   :  { %5275 = vmatpush1.bf16.msra.mxu0 %v8233_v43  ;;  %5808 = vmatpush1.bf16.msra.mxu1 %v8236_v44  ;;  %v8331_v43 = vld [vmem:[#allocation5 + $0x1604] ss:$16 sps:$4 sm:$0xff]   ;;  %v8334_v44 = vld [vmem:[#allocation5 + $0x160c] ss:$16 sps:$4 sm:$0xff]  }
 0x2de   :  { %5276 = vmatprep.subr.bf16.mxu0 %v8241_v45  ;;  %5809 = vmatprep.subr.bf16.mxu1 %v8244_v46  ;;  %v129_v45 = vpack.c.bf16 %v104_v42, %v104_v42  ;;  %v107_v46 = vld [vmem:[#allocation2 + $0xb8] sm:$0xff] }
 0x2df   :  { %5306 = vmatprep.mubr.bf16.mxu0 %v130_v47  ;;  %5839 = vmatprep.mubr.bf16.mxu1 %v130_v47  ;;  %v8329_v47 = vld [vmem:[#allocation5 + $0x1600] ss:$16 sps:$4 sm:$0xff]   ;;  %v8421_v42 = vld [vmem:[#allocation5 + $0x17e4] ss:$16 sps:$4 sm:$0xff]  }
 0x2e1   :  { %5277 = vmatpush1.bf16.msra.mxu0 %v8239_v48  ;;  %5810 = vmatpush1.bf16.msra.mxu1 %v8242_v49  ;;  %v8332_v48 = vld [vmem:[#allocation5 + $0x1608] ss:$16 sps:$4 sm:$0xff]   ;;  %v8337_v49 = vld [vmem:[#allocation5 + $0x1624] ss:$16 sps:$4 sm:$0xff]  }
 0x2e2   :  { %5278 = vmatprep.subr.bf16.mxu0 %v8247_v50  ;;  %5811 = vmatprep.subr.bf16.mxu1 %v8250_v51  ;;  %v8340_v50 = vld [vmem:[#allocation5 + $0x162c] ss:$16 sps:$4 sm:$0xff]   ;;  %v132_v51 = vpack.c.bf16 %v107_v46, %v107_v46 }
 0x2e3   :  { %v106_v46 = vld [vmem:[#allocation2 + $0xb0] sm:$0xff] }
 0x2e5   :  { %5279 = vmatpush1.bf16.msra.mxu0 %v8245_v52  ;;  %5812 = vmatpush1.bf16.msra.mxu1 %v8248_v53  ;;  %v8335_v52 = vld [vmem:[#allocation5 + $0x1620] ss:$16 sps:$4 sm:$0xff]   ;;  %v8338_v53 = vld [vmem:[#allocation5 + $0x1628] ss:$16 sps:$4 sm:$0xff]  }
 0x2e6   :  { %5280 = vmatprep.subr.bf16.mxu0 %v8253_v54  ;;  %5813 = vmatprep.subr.bf16.mxu1 %v8256_v55  ;;  %v8343_v54 = vld [vmem:[#allocation5 + $0x1644] ss:$16 sps:$4 sm:$0xff]   ;;  %v8346_v55 = vld [vmem:[#allocation5 + $0x164c] ss:$16 sps:$4 sm:$0xff]  }
 0x2e9   :  { %5281 = vmatpush1.bf16.msra.mxu0 %v8251_v56  ;;  %5814 = vmatpush1.bf16.msra.mxu1 %v8254_v57  ;;  %v8341_v56 = vld [vmem:[#allocation5 + $0x1640] ss:$16 sps:$4 sm:$0xff]   ;;  %v8344_v57 = vld [vmem:[#allocation5 + $0x1648] ss:$16 sps:$4 sm:$0xff]  }
 0x2ea   :  { %5282 = vmatprep.subr.bf16.mxu0 %v8259_v58  ;;  %5815 = vmatprep.subr.bf16.mxu1 %v8262_v59  ;;  %v8349_v58 = vld [vmem:[#allocation5 + $0x1664] ss:$16 sps:$4 sm:$0xff]   ;;  %v8352_v59 = vld [vmem:[#allocation5 + $0x166c] ss:$16 sps:$4 sm:$0xff]  }
 0x2ed   :  { %5283 = vmatpush1.bf16.msra.mxu0 %v8257_v60  ;;  %5816 = vmatpush1.bf16.msra.mxu1 %v8260_v61  ;;  %v8347_v60 = vld [vmem:[#allocation5 + $0x1660] ss:$16 sps:$4 sm:$0xff]   ;;  %v8350_v61 = vld [vmem:[#allocation5 + $0x1668] ss:$16 sps:$4 sm:$0xff]  }
 0x2ee   :  { %5284 = vmatprep.subr.bf16.mxu0 %v8265_v62  ;;  %5817 = vmatprep.subr.bf16.mxu1 %v8268_v63  ;;  %v8355_v62 = vld [vmem:[#allocation5 + $0x1684] ss:$16 sps:$4 sm:$0xff]   ;;  %v8358_v63 = vld [vmem:[#allocation5 + $0x168c] ss:$16 sps:$4 sm:$0xff]  }
 0x2f1   :  { %5285 = vmatpush1.bf16.msra.mxu0 %v8263_v0  ;;  %5818 = vmatpush1.bf16.msra.mxu1 %v8266_v1  ;;  %v8353_v0 = vld [vmem:[#allocation5 + $0x1680] ss:$16 sps:$4 sm:$0xff]   ;;  %v8356_v1 = vld [vmem:[#allocation5 + $0x1688] ss:$16 sps:$4 sm:$0xff]  }
 0x2f2   :  { %5286 = vmatprep.subr.bf16.mxu0 %v8271_v2  ;;  %5819 = vmatprep.subr.bf16.mxu1 %v8274_v3  ;;  %v8361_v2 = vld [vmem:[#allocation5 + $0x16a4] ss:$16 sps:$4 sm:$0xff]   ;;  %v8364_v3 = vld [vmem:[#allocation5 + $0x16ac] ss:$16 sps:$4 sm:$0xff]  }
 0x2f5   :  { %5287 = vmatpush1.bf16.msra.mxu0 %v8269_v4  ;;  %5820 = vmatpush1.bf16.msra.mxu1 %v8272_v5  ;;  %v8359_v4 = vld [vmem:[#allocation5 + $0x16a0] ss:$16 sps:$4 sm:$0xff]   ;;  %v8362_v5 = vld [vmem:[#allocation5 + $0x16a8] ss:$16 sps:$4 sm:$0xff]  }
 0x2f6   :  { %5288 = vmatprep.subr.bf16.mxu0 %v8277_v6  ;;  %5821 = vmatprep.subr.bf16.mxu1 %v8280_v7  ;;  %v8367_v6 = vld [vmem:[#allocation5 + $0x16c4] ss:$16 sps:$4 sm:$0xff]   ;;  %v8370_v7 = vld [vmem:[#allocation5 + $0x16cc] ss:$16 sps:$4 sm:$0xff]  }
 0x2f9   :  { %5289 = vmatpush1.bf16.msra.mxu0 %v8275_v8  ;;  %5822 = vmatpush1.bf16.msra.mxu1 %v8278_v9  ;;  %v8365_v8 = vld [vmem:[#allocation5 + $0x16c0] ss:$16 sps:$4 sm:$0xff]   ;;  %v8368_v9 = vld [vmem:[#allocation5 + $0x16c8] ss:$16 sps:$4 sm:$0xff]  }
 0x2fa   :  { %5290 = vmatprep.subr.bf16.mxu0 %v8283_v10  ;;  %5823 = vmatprep.subr.bf16.mxu1 %v8286_v11  ;;  %v8373_v10 = vld [vmem:[#allocation5 + $0x16e4] ss:$16 sps:$4 sm:$0xff]   ;;  %v8376_v11 = vld [vmem:[#allocation5 + $0x16ec] ss:$16 sps:$4 sm:$0xff]  }
 0x2fd   :  { %5291 = vmatpush1.bf16.msra.mxu0 %v8281_v12  ;;  %5824 = vmatpush1.bf16.msra.mxu1 %v8284_v13  ;;  %v8371_v12 = vld [vmem:[#allocation5 + $0x16e0] ss:$16 sps:$4 sm:$0xff]   ;;  %v8374_v13 = vld [vmem:[#allocation5 + $0x16e8] ss:$16 sps:$4 sm:$0xff]  }
 0x2fe   :  { %5292 = vmatprep.subr.bf16.mxu0 %v8289_v14  ;;  %5825 = vmatprep.subr.bf16.mxu1 %v8292_v15  ;;  %v8379_v14 = vld [vmem:[#allocation5 + $0x1704] ss:$16 sps:$4 sm:$0xff]   ;;  %v8382_v15 = vld [vmem:[#allocation5 + $0x170c] ss:$16 sps:$4 sm:$0xff]  }
 0x301   :  { %5293 = vmatpush1.bf16.msra.mxu0 %v8287_v16  ;;  %5826 = vmatpush1.bf16.msra.mxu1 %v8290_v17  ;;  %v8377_v16 = vld [vmem:[#allocation5 + $0x1700] ss:$16 sps:$4 sm:$0xff]   ;;  %v8380_v17 = vld [vmem:[#allocation5 + $0x1708] ss:$16 sps:$4 sm:$0xff]  }
 0x302   :  { %5294 = vmatprep.subr.bf16.mxu0 %v8295_v18  ;;  %5827 = vmatprep.subr.bf16.mxu1 %v8298_v19  ;;  %v8385_v18 = vld [vmem:[#allocation5 + $0x1724] ss:$16 sps:$4 sm:$0xff]   ;;  %v8388_v19 = vld [vmem:[#allocation5 + $0x172c] ss:$16 sps:$4 sm:$0xff]  }
 0x305   :  { %5295 = vmatpush1.bf16.msra.mxu0 %v8293_v20  ;;  %5828 = vmatpush1.bf16.msra.mxu1 %v8296_v21  ;;  %v8383_v20 = vld [vmem:[#allocation5 + $0x1720] ss:$16 sps:$4 sm:$0xff]   ;;  %v8386_v21 = vld [vmem:[#allocation5 + $0x1728] ss:$16 sps:$4 sm:$0xff]  }
 0x306   :  { %5296 = vmatprep.subr.bf16.mxu0 %v8301_v22  ;;  %5829 = vmatprep.subr.bf16.mxu1 %v8304_v23  ;;  %v8391_v22 = vld [vmem:[#allocation5 + $0x1744] ss:$16 sps:$4 sm:$0xff]   ;;  %v8394_v23 = vld [vmem:[#allocation5 + $0x174c] ss:$16 sps:$4 sm:$0xff]  }
 0x309   :  { %5297 = vmatpush1.bf16.msra.mxu0 %v8299_v24  ;;  %5830 = vmatpush1.bf16.msra.mxu1 %v8302_v25  ;;  %v8389_v24 = vld [vmem:[#allocation5 + $0x1740] ss:$16 sps:$4 sm:$0xff]   ;;  %v8392_v25 = vld [vmem:[#allocation5 + $0x1748] ss:$16 sps:$4 sm:$0xff]  }
 0x30a   :  { %5298 = vmatprep.subr.bf16.mxu0 %v8307_v26  ;;  %5831 = vmatprep.subr.bf16.mxu1 %v8310_v27  ;;  %v8397_v26 = vld [vmem:[#allocation5 + $0x1764] ss:$16 sps:$4 sm:$0xff]   ;;  %v8400_v27 = vld [vmem:[#allocation5 + $0x176c] ss:$16 sps:$4 sm:$0xff]  }
 0x30d   :  { %5299 = vmatpush1.bf16.msra.mxu0 %v8305_v28  ;;  %5832 = vmatpush1.bf16.msra.mxu1 %v8308_v29  ;;  %v8395_v28 = vld [vmem:[#allocation5 + $0x1760] ss:$16 sps:$4 sm:$0xff]   ;;  %v8398_v29 = vld [vmem:[#allocation5 + $0x1768] ss:$16 sps:$4 sm:$0xff]  }
 0x30e   :  { %5300 = vmatprep.subr.bf16.mxu0 %v8313_v30  ;;  %5833 = vmatprep.subr.bf16.mxu1 %v8316_v31  ;;  %v8403_v30 = vld [vmem:[#allocation5 + $0x1784] ss:$16 sps:$4 sm:$0xff]   ;;  %v8406_v31 = vld [vmem:[#allocation5 + $0x178c] ss:$16 sps:$4 sm:$0xff]  }
 0x311   :  { %5301 = vmatpush1.bf16.msra.mxu0 %v8311_v32  ;;  %5834 = vmatpush1.bf16.msra.mxu1 %v8314_v33  ;;  %v8401_v32 = vld [vmem:[#allocation5 + $0x1780] ss:$16 sps:$4 sm:$0xff]   ;;  %v8404_v33 = vld [vmem:[#allocation5 + $0x1788] ss:$16 sps:$4 sm:$0xff]  }
 0x312   :  { %5302 = vmatprep.subr.bf16.mxu0 %v8319_v34  ;;  %5835 = vmatprep.subr.bf16.mxu1 %v8322_v35  ;;  %v8409_v34 = vld [vmem:[#allocation5 + $0x17a4] ss:$16 sps:$4 sm:$0xff]   ;;  %v8412_v35 = vld [vmem:[#allocation5 + $0x17ac] ss:$16 sps:$4 sm:$0xff]  }
 0x315   :  { %5303 = vmatpush1.bf16.msra.mxu0 %v8317_v36  ;;  %5836 = vmatpush1.bf16.msra.mxu1 %v8320_v37  ;;  %v8407_v36 = vld [vmem:[#allocation5 + $0x17a0] ss:$16 sps:$4 sm:$0xff]   ;;  %v8410_v37 = vld [vmem:[#allocation5 + $0x17a8] ss:$16 sps:$4 sm:$0xff]  }
 0x316   :  { %5304 = vmatprep.subr.bf16.mxu0 %v8325_v38  ;;  %5837 = vmatprep.subr.bf16.mxu1 %v8328_v39  ;;  %v8415_v38 = vld [vmem:[#allocation5 + $0x17c4] ss:$16 sps:$4 sm:$0xff]   ;;  %v8418_v39 = vld [vmem:[#allocation5 + $0x17cc] ss:$16 sps:$4 sm:$0xff]  }
 0x319   :  { %5305 = vmatpush1.bf16.msra.mxu0 %v8323_v40  ;;  %5838 = vmatpush1.bf16.msra.mxu1 %v8326_v41  ;;  %v8413_v40 = vld [vmem:[#allocation5 + $0x17c0] ss:$16 sps:$4 sm:$0xff]   ;;  %v8416_v41 = vld [vmem:[#allocation5 + $0x17c8] ss:$16 sps:$4 sm:$0xff]  }
 0x31a   :  { %5315 = vmatprep.subr.bf16.mxu0 %v8331_v43  ;;  %5848 = vmatprep.subr.bf16.mxu1 %v8334_v44  ;;  %v8424_v43 = vld [vmem:[#allocation5 + $0x17ec] ss:$16 sps:$4 sm:$0xff]   ;;  %v8419_v44 = vld [vmem:[#allocation5 + $0x17e0] ss:$16 sps:$4 sm:$0xff]  }
 0x31c   :  { %5307 = vmatmul.mubr.bf16.vlgmr.msra.gmra.mrb[0].mxu0 %v129_v45  ;;  %5840 = vmatmul.mubr.bf16.vlgmr.msra.gmra.mrb[0].mxu1 %v129_v45  ;;  %v8422_v45 = vld [vmem:[#allocation5 + $0x17e8] ss:$16 sps:$4 sm:$0xff]  }
 0x31d   :  { %5316 = vmatpush1.bf16.msra.mxu0 %v8329_v47  ;;  %5849 = vmatpush1.bf16.msra.mxu1 %v8332_v48  ;;  %v8427_v47 = vld [vmem:[#allocation5 + $0x1804] ss:$16 sps:$4 sm:$0xff]   ;;  %v8430_v48 = vld [vmem:[#allocation5 + $0x180c] ss:$16 sps:$4 sm:$0xff]  }
 0x31e   :  { %5317 = vmatprep.subr.bf16.mxu0 %v8337_v49  ;;  %5850 = vmatprep.subr.bf16.mxu1 %v8340_v50  ;;  %v131_v49 = vpack.c.bf16 %v106_v46, %v106_v46  ;;  %v8425_v50 = vld [vmem:[#allocation5 + $0x1800] ss:$16 sps:$4 sm:$0xff]  }
 0x31f   :  { %5347 = vmatprep.mubr.bf16.mxu0 %v132_v51  ;;  %5880 = vmatprep.mubr.bf16.mxu1 %v132_v51  ;;  %v8428_v51 = vld [vmem:[#allocation5 + $0x1808] ss:$16 sps:$4 sm:$0xff]  }
 0x321   :  { %5318 = vmatpush1.bf16.msra.mxu0 %v8335_v52  ;;  %5851 = vmatpush1.bf16.msra.mxu1 %v8338_v53  ;;  %v8433_v52 = vld [vmem:[#allocation5 + $0x1824] ss:$16 sps:$4 sm:$0xff]   ;;  %v8436_v53 = vld [vmem:[#allocation5 + $0x182c] ss:$16 sps:$4 sm:$0xff]  }
 0x322   :  { %5319 = vmatprep.subr.bf16.mxu0 %v8343_v54  ;;  %5852 = vmatprep.subr.bf16.mxu1 %v8346_v55  ;;  %v8431_v54 = vld [vmem:[#allocation5 + $0x1820] ss:$16 sps:$4 sm:$0xff]   ;;  %v8434_v55 = vld [vmem:[#allocation5 + $0x1828] ss:$16 sps:$4 sm:$0xff]  }
 0x325   :  { %5320 = vmatpush1.bf16.msra.mxu0 %v8341_v56  ;;  %5853 = vmatpush1.bf16.msra.mxu1 %v8344_v57  ;;  %v8439_v56 = vld [vmem:[#allocation5 + $0x1844] ss:$16 sps:$4 sm:$0xff]   ;;  %v8442_v57 = vld [vmem:[#allocation5 + $0x184c] ss:$16 sps:$4 sm:$0xff]  }
 0x326   :  { %5321 = vmatprep.subr.bf16.mxu0 %v8349_v58  ;;  %5854 = vmatprep.subr.bf16.mxu1 %v8352_v59  ;;  %v8630_v58 = vmov 0   ;;  %v8437_v59 = vld [vmem:[#allocation5 + $0x1840] ss:$16 sps:$4 sm:$0xff]  }
 0x329   :  { %5322 = vmatpush1.bf16.msra.mxu0 %v8347_v60  ;;  %5855 = vmatpush1.bf16.msra.mxu1 %v8350_v61  ;;  %v8440_v60 = vld [vmem:[#allocation5 + $0x1848] ss:$16 sps:$4 sm:$0xff]   ;;  %v8445_v61 = vld [vmem:[#allocation5 + $0x1864] ss:$16 sps:$4 sm:$0xff]  }
 0x32a   :  { %5323 = vmatprep.subr.bf16.mxu0 %v8355_v62  ;;  %5856 = vmatprep.subr.bf16.mxu1 %v8358_v63  ;;  %v8448_v62 = vld [vmem:[#allocation5 + $0x186c] ss:$16 sps:$4 sm:$0xff]   ;;  %v8443_v63 = vld [vmem:[#allocation5 + $0x1860] ss:$16 sps:$4 sm:$0xff]  }
 0x32d   :  { %5324 = vmatpush1.bf16.msra.mxu0 %v8353_v0  ;;  %5857 = vmatpush1.bf16.msra.mxu1 %v8356_v1  ;;  %v8446_v0 = vld [vmem:[#allocation5 + $0x1868] ss:$16 sps:$4 sm:$0xff]  }
 0x32e   :  { %5325 = vmatprep.subr.bf16.mxu0 %v8361_v2  ;;  %5858 = vmatprep.subr.bf16.mxu1 %v8364_v3  ;;  %v108_v1 = vld [vmem:[#allocation2 + $0xc0] sm:$0xff]  ;;  %v8449_v2 = vld [vmem:[#allocation8 + $0x40] sm:$0xff]  }
 0x32f   :  { %v8450_v3 = vld [vmem:[#allocation8 + $0xc0] sm:$0xff]  }
 0x331   :  { %5326 = vmatpush1.bf16.msra.mxu0 %v8359_v4  ;;  %5859 = vmatpush1.bf16.msra.mxu1 %v8362_v5  ;;  %v133_v4 = vpack.c.bf16 %v108_v1, %v108_v1  ;;  %v8451_v5 = vld [vmem:[#allocation8] sm:$0xff]  }
 0x332   :  { %5327 = vmatprep.subr.bf16.mxu0 %v8367_v6  ;;  %5860 = vmatprep.subr.bf16.mxu1 %v8370_v7  ;;  %v8452_v6 = vld [vmem:[#allocation8 + $0x80] sm:$0xff]   ;;  %v8453_v7 = vld [vmem:[#allocation8 + $0x48] sm:$0xff]  }
 0x335   :  { %5328 = vmatpush1.bf16.msra.mxu0 %v8365_v8  ;;  %5861 = vmatpush1.bf16.msra.mxu1 %v8368_v9  ;;  %v8454_v8 = vld [vmem:[#allocation8 + $0xc8] sm:$0xff]  }
 0x336   :  { %5329 = vmatprep.subr.bf16.mxu0 %v8373_v10  ;;  %5862 = vmatprep.subr.bf16.mxu1 %v8376_v11  ;;  %v8455_v9 = vld [vmem:[#allocation8 + $0x8] sm:$0xff]   ;;  %v8457_v11 = vld [vmem:[#allocation8 + $0x50] sm:$0xff]  }
 0x337   :  { %v8456_v10 = vld [vmem:[#allocation8 + $0x88] sm:$0xff]  }
 0x339   :  { %5330 = vmatpush1.bf16.msra.mxu0 %v8371_v12  ;;  %5863 = vmatpush1.bf16.msra.mxu1 %v8374_v13  ;;  %v8458_v12 = vld [vmem:[#allocation8 + $0xd0] sm:$0xff]  }
 0x33a   :  { %5331 = vmatprep.subr.bf16.mxu0 %v8379_v14  ;;  %5864 = vmatprep.subr.bf16.mxu1 %v8382_v15  ;;  %v8459_v13 = vld [vmem:[#allocation8 + $0x10] sm:$0xff]   ;;  %v8461_v15 = vld [vmem:[#allocation8 + $0x58] sm:$0xff]  }
 0x33b   :  { %v8460_v14 = vld [vmem:[#allocation8 + $0x90] sm:$0xff]  }
 0x33d   :  { %5332 = vmatpush1.bf16.msra.mxu0 %v8377_v16  ;;  %5865 = vmatpush1.bf16.msra.mxu1 %v8380_v17  ;;  %v8462_v16 = vld [vmem:[#allocation8 + $0xd8] sm:$0xff]  }
 0x33e   :  { %5333 = vmatprep.subr.bf16.mxu0 %v8385_v18  ;;  %5866 = vmatprep.subr.bf16.mxu1 %v8388_v19  ;;  %v8463_v17 = vld [vmem:[#allocation8 + $0x18] sm:$0xff]   ;;  %v8465_v19 = vld [vmem:[#allocation8 + $0x60] sm:$0xff]  }
 0x33f   :  { %v8464_v18 = vld [vmem:[#allocation8 + $0x98] sm:$0xff]  }
 0x341   :  { %5334 = vmatpush1.bf16.msra.mxu0 %v8383_v20  ;;  %5867 = vmatpush1.bf16.msra.mxu1 %v8386_v21  ;;  %v8466_v20 = vld [vmem:[#allocation8 + $0xe0] sm:$0xff]  }
 0x342   :  { %5335 = vmatprep.subr.bf16.mxu0 %v8391_v22  ;;  %5868 = vmatprep.subr.bf16.mxu1 %v8394_v23  ;;  %v8467_v21 = vld [vmem:[#allocation8 + $0x20] sm:$0xff]   ;;  %v8469_v23 = vld [vmem:[#allocation8 + $0x68] sm:$0xff]  }
 0x343   :  { %v8468_v22 = vld [vmem:[#allocation8 + $0xa0] sm:$0xff]  }
 0x345   :  { %5336 = vmatpush1.bf16.msra.mxu0 %v8389_v24  ;;  %5869 = vmatpush1.bf16.msra.mxu1 %v8392_v25  ;;  %v8470_v24 = vld [vmem:[#allocation8 + $0xe8] sm:$0xff]  }
 0x346   :  { %5337 = vmatprep.subr.bf16.mxu0 %v8397_v26  ;;  %5870 = vmatprep.subr.bf16.mxu1 %v8400_v27  ;;  %v8471_v25 = vld [vmem:[#allocation8 + $0x28] sm:$0xff]   ;;  %v8473_v27 = vld [vmem:[#allocation8 + $0x70] sm:$0xff]  }
 0x347   :  { %v8472_v26 = vld [vmem:[#allocation8 + $0xa8] sm:$0xff]  }
 0x349   :  { %5338 = vmatpush1.bf16.msra.mxu0 %v8395_v28  ;;  %5871 = vmatpush1.bf16.msra.mxu1 %v8398_v29  ;;  %v8474_v28 = vld [vmem:[#allocation8 + $0xf0] sm:$0xff]  }
 0x34a   :  { %5339 = vmatprep.subr.bf16.mxu0 %v8403_v30  ;;  %5872 = vmatprep.subr.bf16.mxu1 %v8406_v31  ;;  %v8475_v29 = vld [vmem:[#allocation8 + $0x30] sm:$0xff]   ;;  %v8477_v31 = vld [vmem:[#allocation8 + $0x78] sm:$0xff]  }
 0x34b   :  { %v8476_v30 = vld [vmem:[#allocation8 + $0xb0] sm:$0xff]  }
 0x34d   :  { %5340 = vmatpush1.bf16.msra.mxu0 %v8401_v32  ;;  %5873 = vmatpush1.bf16.msra.mxu1 %v8404_v33  ;;  %v8478_v32 = vld [vmem:[#allocation8 + $0xf8] sm:$0xff]  }
 0x34e   :  { %5341 = vmatprep.subr.bf16.mxu0 %v8409_v34  ;;  %5874 = vmatprep.subr.bf16.mxu1 %v8412_v35  ;;  %v8479_v33 = vld [vmem:[#allocation8 + $0x38] sm:$0xff]   ;;  %v920_v35 = vlaneseq }
 0x34f   :  { %v8480_v34 = vld [vmem:[#allocation8 + $0xb8] sm:$0xff]  }
 0x351   :  { %5342 = vmatpush1.bf16.msra.mxu0 %v8407_v36  ;;  %5875 = vmatpush1.bf16.msra.mxu1 %v8410_v37  ;;  %v921_v36 = vshrl.u32 %v920_v35, 7 }
 0x352   :  { %5343 = vmatprep.subr.bf16.mxu0 %v8415_v38  ;;  %5876 = vmatprep.subr.bf16.mxu1 %v8418_v39  ;;  %v918_v39 = vld [vmem:[#allocation7] sm:$0xf] }
 0x353   :  { %v922_v37 = vsub.s32 0, %v921_v36  ;;  %v930_v38 = vsub.s32 2, %v921_v36 }
 0x355   :  { %5344 = vmatpush1.bf16.msra.mxu0 %v8413_v40  ;;  %5877 = vmatpush1.bf16.msra.mxu1 %v8416_v41  ;;  %v926_v40 = vsub.s32 1, %v921_v36  ;;  %v934_v41 = vsub.s32 3, %v921_v36 }
 0x356   :  { %5345 = vmatprep.subr.bf16.mxu0 %v8421_v42  ;;  %5878 = vmatprep.subr.bf16.mxu1 %v8424_v43  ;;  %v923_v42 = vrot.slane %v918_v39, %v922_v37  ;;  %v931_v43 = vrot.slane %v918_v39, %v930_v38 }
 0x359   :  { %5346 = vmatpush1.bf16.msra.mxu0 %v8419_v44  ;;  %5879 = vmatpush1.bf16.msra.mxu1 %v8422_v45  ;;  %v927_v44 = vrot.slane %v918_v39, %v926_v40  ;;  %v935_v45 = vrot.slane %v918_v39, %v934_v41 }
 0x35a   :  { %5356 = vmatprep.subr.bf16.mxu0 %v8427_v47  ;;  %5889 = vmatprep.subr.bf16.mxu1 %v8430_v48 }
 0x35c   :  { %5348 = vmatmul.mubr.bf16.vlgmr.msra.gmra.mrb[0].mxu0 %v131_v49  ;;  %5881 = vmatmul.mubr.bf16.vlgmr.msra.gmra.mrb[0].mxu1 %v131_v49 }
 0x35d   :  { %5357 = vmatpush1.bf16.msra.mxu0 %v8425_v50  ;;  %5890 = vmatpush1.bf16.msra.mxu1 %v8428_v51 }
 0x35e   :  { %5358 = vmatprep.subr.bf16.mxu0 %v8433_v52  ;;  %5891 = vmatprep.subr.bf16.mxu1 %v8436_v53 }
 0x35f   :  { %5388 = vmatprep.mubr.bf16.mxu0 %v8630_v58  ;;  %5921 = vmatprep.mubr.bf16.mxu1 %v8630_v58 }
 0x361   :  { %5359 = vmatpush1.bf16.msra.mxu0 %v8431_v54  ;;  %5892 = vmatpush1.bf16.msra.mxu1 %v8434_v55 }
 0x362   :  { %5360 = vmatprep.subr.bf16.mxu0 %v8439_v56  ;;  %5893 = vmatprep.subr.bf16.mxu1 %v8442_v57 }
 0x365   :  { %5361 = vmatpush1.bf16.msra.mxu0 %v8437_v59  ;;  %5894 = vmatpush1.bf16.msra.mxu1 %v8440_v60 }
 0x366   :  { %5362 = vmatprep.subr.bf16.mxu0 %v8445_v61  ;;  %5895 = vmatprep.subr.bf16.mxu1 %v8448_v62 }
 0x369   :  { %5363 = vmatpush1.bf16.msra.mxu0 %v8443_v63  ;;  %5896 = vmatpush1.bf16.msra.mxu1 %v8446_v0 }
 0x36a   :  { %7118 = vmatprep.subr.bf16.mxu0 %v8449_v2  ;;  %7140 = vmatprep.subr.bf16.mxu1 %v8450_v3 }
 0x36c   :  { %7083 = vmatmul.mubr.msk.bf16.vlgmr.msra.gmra.mrb[0].mxu0 %vm4860_vm0, %v133_v4  ;;  %7084 = vmatmul.mubr.msk.bf16.vlgmr.msra.gmra.mrb[0].mxu1 %vm4860_vm0, %v133_v4  ;;  %v7085_v4 = vld [vmem:[#allocation10] ss:$0 sm:$0xff] }
 0x36d   :  { %7119 = vmatpush3.bf16.msra.mxu0 %v8451_v5  ;;  %7141 = vmatpush3.bf16.msra.mxu1 %v8452_v6 }
 0x36e   :  { %7120 = vmatprep.subr.bf16.mxu0 %v8453_v7  ;;  %7142 = vmatprep.subr.bf16.mxu1 %v8454_v8 }
 0x371   :  { %7121 = vmatpush3.bf16.msra.mxu0 %v8455_v9  ;;  %7143 = vmatpush3.bf16.msra.mxu1 %v8456_v10 }
 0x372   :  { %7122 = vmatprep.subr.bf16.mxu0 %v8457_v11  ;;  %7144 = vmatprep.subr.bf16.mxu1 %v8458_v12 }
 0x375   :  { %7123 = vmatpush3.bf16.msra.mxu0 %v8459_v13  ;;  %7145 = vmatpush3.bf16.msra.mxu1 %v8460_v14 }
 0x376   :  { %7124 = vmatprep.subr.bf16.mxu0 %v8461_v15  ;;  %7146 = vmatprep.subr.bf16.mxu1 %v8462_v16 }
 0x379   :  { %7125 = vmatpush3.bf16.msra.mxu0 %v8463_v17  ;;  %7147 = vmatpush3.bf16.msra.mxu1 %v8464_v18 }
 0x37a   :  { %7126 = vmatprep.subr.bf16.mxu0 %v8465_v19  ;;  %7148 = vmatprep.subr.bf16.mxu1 %v8466_v20 }
 0x37d   :  { %7127 = vmatpush3.bf16.msra.mxu0 %v8467_v21  ;;  %7149 = vmatpush3.bf16.msra.mxu1 %v8468_v22 }
 0x37e   :  { %7128 = vmatprep.subr.bf16.mxu0 %v8469_v23  ;;  %7150 = vmatprep.subr.bf16.mxu1 %v8470_v24 }
 0x381   :  { %7129 = vmatpush3.bf16.msra.mxu0 %v8471_v25  ;;  %7151 = vmatpush3.bf16.msra.mxu1 %v8472_v26 }
 0x382   :  { %7130 = vmatprep.subr.bf16.mxu0 %v8473_v27  ;;  %7152 = vmatprep.subr.bf16.mxu1 %v8474_v28 }
 0x385   :  { %7131 = vmatpush3.bf16.msra.mxu0 %v8475_v29  ;;  %7153 = vmatpush3.bf16.msra.mxu1 %v8476_v30 }
 0x386   :  { %7132 = vmatprep.subr.bf16.mxu0 %v8477_v31  ;;  %7154 = vmatprep.subr.bf16.mxu1 %v8478_v32 }
 0x389   :  { %7133 = vmatpush3.bf16.msra.mxu0 %v8479_v33  ;;  %7155 = vmatpush3.bf16.msra.mxu1 %v8480_v34 }
 0x43f   :  { %v5390_v46 = vpop.f32.mrb[0].mxu0  ;;  %v5923_v47 = vpop.f32.mrb[0].mxu1 }
 0x440   :  { %v7162_v48 = vadd.f32 %v5390_v46, %v923_v42  ;;  %v7164_v49 = vadd.f32 %v5923_v47, %v931_v43  ;;  %v5392_v50 = vpop.f32.mrb[1].mxu0  ;;  %v5925_v51 = vpop.f32.mrb[1].mxu1 }
 0x441   :  { %v7163_v52 = vadd.f32 %v5392_v50, %v927_v44  ;;  %v7165_v53 = vadd.f32 %v5925_v51, %v935_v45  ;;  %v5394_v54 = vpop.f32.mrb[2].mxu0  ;;  %v5927_v55 = vpop.f32.mrb[2].mxu1 }
 0x442   :  { %v5930_v56 = vmax.f32 %v7162_v48, 0.0  ;;  %v5932_v57 = vmax.f32 %v7164_v49, 0.0  ;;  %v5395_v58 = vpop.f32.mrb[3].mxu0  ;;  %v5928_v59 = vpop.f32.mrb[3].mxu1 }
 0x443   :  { %v5931_v60 = vmax.f32 %v7163_v52, 0.0  ;;  %v5933_v61 = vmax.f32 %v7165_v53, 0.0 }
 0x444   :  { %v5934_v0 = vpack.c.bf16 %v5930_v56, %v5930_v56  ;;  %v5936_v1 = vpack.c.bf16 %v5932_v57, %v5932_v57 }
 0x445   :  { %v5935_v62 = vpack.c.bf16 %v5931_v60, %v5931_v60  ;;  %v5937_v63 = vpack.c.bf16 %v5933_v61, %v5933_v61 }
 0x447   :  { %6233 = vmatprep.mubr.bf16.mxu0 %v5935_v62  ;;  %6273 = vmatprep.mubr.bf16.mxu1 %v5937_v63 }
 0x448   :  { %6234 = vmatmul.mubr.bf16.vlgmr.msra.gmra.mrb[4].mxu0 %v5934_v0  ;;  %6274 = vmatmul.mubr.bf16.vlgmr.msra.gmra.mrb[4].mxu1 %v5936_v1 }
 0x51b   :  { %v7134_v2 = vpop.f32.mrb[4].mxu0  ;;  %v7156_v3 = vpop.f32.mrb[4].mxu1 }
 0x51c   :  { %v7135_v5 = vpop.f32.mrb[5].mxu0  ;;  %v7157_v6 = vpop.f32.mrb[5].mxu1 }
 0x51d   :  { %v7136_v7 = vadd.f32 %v7135_v5, %v7134_v2  ;;  %v7158_v8 = vadd.f32 %v7157_v6, %v7156_v3  ;;  %v7137_v9 = vpop.f32.mrb[6].mxu0  ;;  %v7159_v10 = vpop.f32.mrb[6].mxu1 }
 0x51e   :  { %v7138_v11 = vpop.f32.mrb[7].mxu0  ;;  %v7160_v12 = vpop.f32.mrb[7].mxu1 }
 0x51f   :  { %v6236_v13 = vadd.f32 %v7136_v7, %v7085_v4 }
 0x521   :  { %v6276_v14 = vadd.f32 %v7158_v8, %v6236_v13 }
 0x523   :  { %6281 = vst [vmem:[#allocation11] sm:$0xff] %v6276_v14 }
 0x524   :  { %8602 = shalt.err (!%p8599_p2)
}
 0x525   :  { %s8603_s6 = scalar_lea.hbm %s8739_s5, 128 }
 0x526   :  { %p8604_p3 = scmp.ne.s32.totalorder %s8739_s5, %s8603_s6  ;;  %p8607_p4 = scmp.lt.u32.totalorder %s8603_s6, %s8739_s5 }
 0x528   :  { %p8609_p5 = pnand %p8607_p4, %p8604_p3 }
 0x52a   :  { %8612 = shalt.err (!%p8609_p5)
}
 0x52b   :  { %6291 = dma.vmem_to_hbm [thread:$0]  %s6289_s28, 128, %s8739_s5, [#allocation4]  }
 0x52c   :  { %8619 = dma.done.wait [#allocation4], 128  }
 0x52d   :  { %8620 = vsyncadd [#allocation4], 4294967168 }
 0x52e   :  { %6295 = vsyncpa [#allocation3], 1 }
 0x52f   :  { %6296 = vsyncpa [#allocation6], 1 }
 0x530   :  { %6297 = vsyncpa [#allocation9], 1 }
 0x531   :  { %6298 = vsyncpa [#allocation4], 1 }

</bundles_post_ra>
